<compile_context>
chip_gen: v6e
topology: v6e:2x2x1
jax: 0.10.0
libtpu: 0.0.40
codegen_flags: <defaults>
</compile_context>

<pallas_src>
import jax
import jax.numpy as jnp
from jax import lax
from jax.experimental import pallas as pl
from jax.experimental.pallas import tpu as pltpu

INNER = 2500   # "inner" (== "inner6") in the original source
CODE = 16      # "inner7": latent code width (assumed)


def _round_up(x, m):
    return ((x + m - 1) // m) * m


def _ae_kernel(x_ref, w1t_ref, b1_ref, w2t_ref, b2_ref, w3t_ref, b3_ref,
               w4t_ref, b4_ref, recon_ref, code_ref):
    # x_ref:     (Bt, D_in)
    # w1t_ref:   (D_in, INNER)   encoder_hidden weight, pre-transposed
    # b1_ref:    (1, INNER)
    # w2t_ref:   (INNER, CODE)   encoder_output weight, pre-transposed
    # b2_ref:    (1, CODE)
    # w3t_ref:   (CODE, INNER)   decoder_hidden weight, pre-transposed
    # b3_ref:    (1, INNER)
    # w4t_ref:   (INNER, D_in)   decoder_output weight, pre-transposed
    # b4_ref:    (1, D_in)
    # recon_ref: (Bt, D_in)      output 1 (reconstructed)
    # code_ref:  (Bt, CODE)      output 2 (code, pre-ReLU)
    x = x_ref[...]

    # encoder hidden + relu : (Bt, D_in) @ (D_in, INNER)
    act = jnp.dot(x, w1t_ref[...], preferred_element_type=jnp.float32)
    act = jnp.maximum(act + b1_ref[...], 0.0)                       # (Bt, INNER)

    # encoder output ("code") : (Bt, INNER) @ (INNER, CODE)
    code = jnp.dot(act, w2t_ref[...], preferred_element_type=jnp.float32)
    code = code + b2_ref[...]                                       # (Bt, CODE)
    code_ref[...] = code.astype(code_ref.dtype)

    code1 = jnp.maximum(code, 0.0)

    # decoder hidden (no relu, per forward) : (Bt, CODE) @ (CODE, INNER)
    act = jnp.dot(code1, w3t_ref[...], preferred_element_type=jnp.float32)
    act = act + b3_ref[...]                                         # (Bt, INNER)

    # decoder output + relu : (Bt, INNER) @ (INNER, D_in)
    recon = jnp.dot(act, w4t_ref[...], preferred_element_type=jnp.float32)
    recon = jnp.maximum(recon + b4_ref[...], 0.0)                   # (Bt, D_in)
    recon_ref[...] = recon.astype(recon_ref.dtype)


def _choose_block_b(B):
    if B <= 512:
        # Two grid steps (keeps both v7x TensorCores busy, single-TC chips
        # just run two big steps); rows rounded to the sublane multiple of 8.
        return max(8, _round_up(pl.cdiv(B, 2), 8))
    # Large batch: MXU-native row tile (multiple of 128 for v5e, 256 for
    # v6e/v7x) streamed over many parallel grid steps.
    return 256


def linear_attention_ae_forward(x, w1, b1, w2, b2, w3, b3, w4, b4, *, block_b=None):
    """Fused AE forward.

    x : (B, D_in) f32
    w1: (INNER, D_in), b1: (INNER,)    encoder_hidden_layer (PyTorch layout)
    w2: (CODE, INNER), b2: (CODE,)     encoder_output_layer
    w3: (INNER, CODE), b3: (INNER,)    decoder_hidden_layer
    w4: (D_in, INNER), b4: (D_in,)     decoder_output_layer
    Returns (reconstructed (B, D_in), code (B, CODE)).
    """
    B, D_in = x.shape
    inner = w1.shape[0]
    code_dim = w2.shape[0]

    if block_b is None:
        block_b = _choose_block_b(B)
    block_b = _round_up(block_b, 8)
    block_b = min(block_b, _round_up(B, 8))
    grid_b = pl.cdiv(B, block_b)   # ragged last block handled by masked writes

    # One-time weight transposes outside the kernel (no per-step vxpose).
    w1t = w1.T                        # (D_in, INNER)
    w2t = w2.T                        # (INNER, CODE)
    w3t = w3.T                        # (CODE, INNER)
    w4t = w4.T                        # (INNER, D_in)
    b1r = b1.reshape(1, inner)
    b2r = b2.reshape(1, code_dim)
    b3r = b3.reshape(1, inner)
    b4r = b4.reshape(1, D_in)

    const = lambda b: (0, 0)

    recon, code = pl.pallas_call(
        _ae_kernel,
        out_shape=(
            jax.ShapeDtypeStruct((B, D_in), jnp.float32),
            jax.ShapeDtypeStruct((B, code_dim), jnp.float32),
        ),
        grid_spec=pltpu.PrefetchScalarGridSpec(
            num_scalar_prefetch=0,
            grid=(grid_b,),
            in_specs=[
                pl.BlockSpec((block_b, D_in), lambda b: (b, 0)),   # x
                pl.BlockSpec((D_in, inner), const),                # w1t
                pl.BlockSpec((1, inner), const),                   # b1
                pl.BlockSpec((inner, code_dim), const),            # w2t
                pl.BlockSpec((1, code_dim), const),                # b2
                pl.BlockSpec((code_dim, inner), const),            # w3t
                pl.BlockSpec((1, inner), const),                   # b3
                pl.BlockSpec((inner, D_in), const),                # w4t
                pl.BlockSpec((1, D_in), const),                    # b4
            ],
            out_specs=(
                pl.BlockSpec((block_b, D_in), lambda b: (b, 0)),      # recon
                pl.BlockSpec((block_b, code_dim), lambda b: (b, 0)),  # code
            ),
        ),
        compiler_params=pltpu.CompilerParams(
            dimension_semantics=("parallel",),
            vmem_limit_bytes=32 * 1024 * 1024,
        ),
    )(x, w1t, b1r, w2t, b2r, w3t, b3r, w4t, b4r)

    return recon, code


def _reference(x, w1, b1, w2, b2, w3, b3, w4, b4):
    # Pure-JAX reference (highest precision) for correctness checking.
    hp = lax.Precision.HIGHEST
    act = jnp.maximum(jnp.dot(x, w1.T, precision=hp) + b1, 0.0)
    code = jnp.dot(act, w2.T, precision=hp) + b2
    code1 = jnp.maximum(code, 0.0)
    act = jnp.dot(code1, w3.T, precision=hp) + b3
    recon = jnp.maximum(jnp.dot(act, w4.T, precision=hp) + b4, 0.0)
    return recon, code


if __name__ == "__main__":
    key = jax.random.PRNGKey(0)
    ks = jax.random.split(key, 9)

    # Small test shapes: 16 batch rows (2 grid steps of 8), input_shape = 64.
    B, D_in = 16, 64
    s = 0.05

    x = jax.random.normal(ks[0], (B, D_in), dtype=jnp.float32)
    w1 = s * jax.random.normal(ks[1], (INNER, D_in), dtype=jnp.float32)
    b1 = s * jax.random.normal(ks[2], (INNER,), dtype=jnp.float32)
    w2 = s * jax.random.normal(ks[3], (CODE, INNER), dtype=jnp.float32)
    b2 = s * jax.random.normal(ks[4], (CODE,), dtype=jnp.float32)
    w3 = s * jax.random.normal(ks[5], (INNER, CODE), dtype=jnp.float32)
    b3 = s * jax.random.normal(ks[6], (INNER,), dtype=jnp.float32)
    w4 = s * jax.random.normal(ks[7], (D_in, INNER), dtype=jnp.float32)
    b4 = s * jax.random.normal(ks[8], (D_in,), dtype=jnp.float32)

    recon, code = linear_attention_ae_forward(x, w1, b1, w2, b2, w3, b3, w4, b4)
    recon = jax.block_until_ready(recon)
    code = jax.block_until_ready(code)

    ref_recon, ref_code = _reference(x, w1, b1, w2, b2, w3, b3, w4, b4)
    assert recon.shape == (B, D_in), recon.shape
    assert code.shape == (B, CODE), code.shape
    assert jnp.allclose(code, ref_code, atol=2e-3, rtol=2e-3), "code mismatch"
    assert jnp.allclose(recon, ref_recon, atol=2e-3, rtol=2e-3), "recon mismatch"

    print("KERNEL_OK")
</pallas_src>

<mosaic_0001>
module attributes {stable_mosaic.version = 11 : i64} {
  func.func @_ae_kernel(%arg0: i32, %arg1: memref<8x64xf32, #tpu.memory_space<vmem>>, %arg2: memref<64x2500xf32, #tpu.memory_space<vmem>>, %arg3: memref<1x2500xf32, #tpu.memory_space<vmem>>, %arg4: memref<2500x16xf32, #tpu.memory_space<vmem>>, %arg5: memref<1x16xf32, #tpu.memory_space<vmem>>, %arg6: memref<16x2500xf32, #tpu.memory_space<vmem>>, %arg7: memref<1x2500xf32, #tpu.memory_space<vmem>>, %arg8: memref<2500x64xf32, #tpu.memory_space<vmem>>, %arg9: memref<1x64xf32, #tpu.memory_space<vmem>>, %arg10: memref<8x64xf32, #tpu.memory_space<vmem>>, %arg11: memref<8x16xf32, #tpu.memory_space<vmem>>) attributes {dimension_semantics = [#tpu.dimension_semantics<parallel>], iteration_bounds = array<i64: 2>, scalar_prefetch = 0 : i64, scratch_operands = 0 : i64, tpu.core_type = #tpu.core_type<tc>, window_params = [{transform_indices = @transform_0, window_bounds = array<i64: 8, 64>}, {pipeline_mode = #tpu.pipeline_mode<synchronous>, transform_indices = @transform_1, window_bounds = array<i64: 64, 2500>}, {pipeline_mode = #tpu.pipeline_mode<synchronous>, transform_indices = @transform_2, window_bounds = array<i64: 1, 2500>}, {pipeline_mode = #tpu.pipeline_mode<synchronous>, transform_indices = @transform_3, window_bounds = array<i64: 2500, 16>}, {pipeline_mode = #tpu.pipeline_mode<synchronous>, transform_indices = @transform_4, window_bounds = array<i64: 1, 16>}, {pipeline_mode = #tpu.pipeline_mode<synchronous>, transform_indices = @transform_5, window_bounds = array<i64: 16, 2500>}, {pipeline_mode = #tpu.pipeline_mode<synchronous>, transform_indices = @transform_6, window_bounds = array<i64: 1, 2500>}, {pipeline_mode = #tpu.pipeline_mode<synchronous>, transform_indices = @transform_7, window_bounds = array<i64: 2500, 64>}, {pipeline_mode = #tpu.pipeline_mode<synchronous>, transform_indices = @transform_8, window_bounds = array<i64: 1, 64>}, {transform_indices = @transform_9, window_bounds = array<i64: 8, 64>}, {transform_indices = @transform_10, window_bounds = array<i64: 8, 16>}]} {
    %c0 = arith.constant 0 : index
    %c0_0 = arith.constant 0 : index
    %0 = vector.load %arg1[%c0, %c0_0] : memref<8x64xf32, #tpu.memory_space<vmem>>, vector<8x64xf32>
    %c0_1 = arith.constant 0 : index
    %c0_2 = arith.constant 0 : index
    %1 = vector.load %arg2[%c0_1, %c0_2] : memref<64x2500xf32, #tpu.memory_space<vmem>>, vector<64x2500xf32>
    %cst = arith.constant dense<0.000000e+00> : vector<8x2500xf32>
    %2 = tpu.matmul %0, %1, %cst {dimension_numbers = #tpu.dot_dimension_numbers<[1], [0], [0], [1], [0, 0, 1, 1], [], []>} : vector<8x64xf32>, vector<64x2500xf32>, vector<8x2500xf32> -> vector<8x2500xf32>
    %c0_3 = arith.constant 0 : index
    %c0_4 = arith.constant 0 : index
    %3 = vector.load %arg3[%c0_3, %c0_4] : memref<1x2500xf32, #tpu.memory_space<vmem>>, vector<1x2500xf32>
    %4 = vector.broadcast %3 : vector<1x2500xf32> to vector<8x2500xf32>
    %5 = arith.addf %2, %4 : vector<8x2500xf32>
    %cst_5 = arith.constant 0.000000e+00 : f32
    %6 = vector.broadcast %cst_5 : f32 to vector<8x2500xf32>
    %7 = arith.maximumf %5, %6 : vector<8x2500xf32>
    %c0_6 = arith.constant 0 : index
    %c0_7 = arith.constant 0 : index
    %8 = vector.load %arg4[%c0_6, %c0_7] : memref<2500x16xf32, #tpu.memory_space<vmem>>, vector<2500x16xf32>
    %cst_8 = arith.constant dense<0.000000e+00> : vector<8x16xf32>
    %9 = tpu.matmul %7, %8, %cst_8 {dimension_numbers = #tpu.dot_dimension_numbers<[1], [0], [0], [1], [0, 0, 1, 1], [], []>} : vector<8x2500xf32>, vector<2500x16xf32>, vector<8x16xf32> -> vector<8x16xf32>
    %c0_9 = arith.constant 0 : index
    %c0_10 = arith.constant 0 : index
    %10 = vector.load %arg5[%c0_9, %c0_10] : memref<1x16xf32, #tpu.memory_space<vmem>>, vector<1x16xf32>
    %11 = vector.broadcast %10 : vector<1x16xf32> to vector<8x16xf32>
    %12 = arith.addf %9, %11 : vector<8x16xf32>
    %c0_11 = arith.constant 0 : index
    %c0_12 = arith.constant 0 : index
    %13 = vector.load %arg11[%c0_11, %c0_12] : memref<8x16xf32, #tpu.memory_space<vmem>>, vector<8x16xf32>
    tpu.vector_store %arg11[%c0_11, %c0_12], %12 {strides = array<i32>} : memref<8x16xf32, #tpu.memory_space<vmem>>, vector<8x16xf32>,
    %cst_13 = arith.constant 0.000000e+00 : f32
    %14 = vector.broadcast %cst_13 : f32 to vector<8x16xf32>
    %15 = arith.maximumf %12, %14 : vector<8x16xf32>
    %c0_14 = arith.constant 0 : index
    %c0_15 = arith.constant 0 : index
    %16 = vector.load %arg6[%c0_14, %c0_15] : memref<16x2500xf32, #tpu.memory_space<vmem>>, vector<16x2500xf32>
    %cst_16 = arith.constant dense<0.000000e+00> : vector<8x2500xf32>
    %17 = tpu.matmul %15, %16, %cst_16 {dimension_numbers = #tpu.dot_dimension_numbers<[1], [0], [0], [1], [0, 0, 1, 1], [], []>} : vector<8x16xf32>, vector<16x2500xf32>, vector<8x2500xf32> -> vector<8x2500xf32>
    %c0_17 = arith.constant 0 : index
    %c0_18 = arith.constant 0 : index
    %18 = vector.load %arg7[%c0_17, %c0_18] : memref<1x2500xf32, #tpu.memory_space<vmem>>, vector<1x2500xf32>
    %19 = vector.broadcast %18 : vector<1x2500xf32> to vector<8x2500xf32>
    %20 = arith.addf %17, %19 : vector<8x2500xf32>
    %c0_19 = arith.constant 0 : index
    %c0_20 = arith.constant 0 : index
    %21 = vector.load %arg8[%c0_19, %c0_20] : memref<2500x64xf32, #tpu.memory_space<vmem>>, vector<2500x64xf32>
    %cst_21 = arith.constant dense<0.000000e+00> : vector<8x64xf32>
    %22 = tpu.matmul %20, %21, %cst_21 {dimension_numbers = #tpu.dot_dimension_numbers<[1], [0], [0], [1], [0, 0, 1, 1], [], []>} : vector<8x2500xf32>, vector<2500x64xf32>, vector<8x64xf32> -> vector<8x64xf32>
    %c0_22 = arith.constant 0 : index
    %c0_23 = arith.constant 0 : index
    %23 = vector.load %arg9[%c0_22, %c0_23] : memref<1x64xf32, #tpu.memory_space<vmem>>, vector<1x64xf32>
    %24 = vector.broadcast %23 : vector<1x64xf32> to vector<8x64xf32>
    %25 = arith.addf %22, %24 : vector<8x64xf32>
    %cst_24 = arith.constant 0.000000e+00 : f32
    %26 = vector.broadcast %cst_24 : f32 to vector<8x64xf32>
    %27 = arith.maximumf %25, %26 : vector<8x64xf32>
    %c0_25 = arith.constant 0 : index
    %c0_26 = arith.constant 0 : index
    %28 = vector.load %arg10[%c0_25, %c0_26] : memref<8x64xf32, #tpu.memory_space<vmem>>, vector<8x64xf32>
    tpu.vector_store %arg10[%c0_25, %c0_26], %27 {strides = array<i32>} : memref<8x64xf32, #tpu.memory_space<vmem>>, vector<8x64xf32>,
    return
  }
  func.func @transform_0(%arg0: i32) -> (i32, i32) {
    %c0_i32 = arith.constant 0 : i32
    %c0_i32_0 = arith.constant 0 : i32
    return %arg0, %c0_i32 : i32, i32
  }
  func.func @transform_1(%arg0: i32) -> (i32, i32) {
    %c0_i32 = arith.constant 0 : i32
    %c0_i32_0 = arith.constant 0 : i32
    %c0_i32_1 = arith.constant 0 : i32
    return %c0_i32, %c0_i32_0 : i32, i32
  }
  func.func @transform_2(%arg0: i32) -> (i32, i32) {
    %c0_i32 = arith.constant 0 : i32
    %c0_i32_0 = arith.constant 0 : i32
    %c0_i32_1 = arith.constant 0 : i32
    return %c0_i32, %c0_i32_0 : i32, i32
  }
  func.func @transform_3(%arg0: i32) -> (i32, i32) {
    %c0_i32 = arith.constant 0 : i32
    %c0_i32_0 = arith.constant 0 : i32
    %c0_i32_1 = arith.constant 0 : i32
    return %c0_i32, %c0_i32_0 : i32, i32
  }
  func.func @transform_4(%arg0: i32) -> (i32, i32) {
    %c0_i32 = arith.constant 0 : i32
    %c0_i32_0 = arith.constant 0 : i32
    %c0_i32_1 = arith.constant 0 : i32
    return %c0_i32, %c0_i32_0 : i32, i32
  }
  func.func @transform_5(%arg0: i32) -> (i32, i32) {
    %c0_i32 = arith.constant 0 : i32
    %c0_i32_0 = arith.constant 0 : i32
    %c0_i32_1 = arith.constant 0 : i32
    return %c0_i32, %c0_i32_0 : i32, i32
  }
  func.func @transform_6(%arg0: i32) -> (i32, i32) {
    %c0_i32 = arith.constant 0 : i32
    %c0_i32_0 = arith.constant 0 : i32
    %c0_i32_1 = arith.constant 0 : i32
    return %c0_i32, %c0_i32_0 : i32, i32
  }
  func.func @transform_7(%arg0: i32) -> (i32, i32) {
    %c0_i32 = arith.constant 0 : i32
    %c0_i32_0 = arith.constant 0 : i32
    %c0_i32_1 = arith.constant 0 : i32
    return %c0_i32, %c0_i32_0 : i32, i32
  }
  func.func @transform_8(%arg0: i32) -> (i32, i32) {
    %c0_i32 = arith.constant 0 : i32
    %c0_i32_0 = arith.constant 0 : i32
    %c0_i32_1 = arith.constant 0 : i32
    return %c0_i32, %c0_i32_0 : i32, i32
  }
  func.func @transform_9(%arg0: i32) -> (i32, i32) {
    %c0_i32 = arith.constant 0 : i32
    %c0_i32_0 = arith.constant 0 : i32
    return %arg0, %c0_i32 : i32, i32
  }
  func.func @transform_10(%arg0: i32) -> (i32, i32) {
    %c0_i32 = arith.constant 0 : i32
    %c0_i32_0 = arith.constant 0 : i32
    return %arg0, %c0_i32 : i32, i32
  }
}

</mosaic_0001>

<bundles_post_ra>
// kernel: tpu_custom_call.1
= control target key start
LH: loop header
LB: loop body
LE: loop exit
PB: predicated region body
PF: predicated region fallthrough
CT: control target
= control target key end

     0   :  { %s8158_s0 = inlined_call_operand.vmem [shape: f32[16,64], index: 0, kind: input, shape index: {}]   ;;  %s8159_s1 = inlined_call_operand.vmem [shape: f32[64,2500], index: 1, kind: input, shape index: {}]   ;;  %s8160_s2 = inlined_call_operand.vmem [shape: f32[1,2500], index: 2, kind: input, shape index: {}]   ;;  %s8161_s3 = inlined_call_operand.vmem [shape: f32[2500,16], index: 3, kind: input, shape index: {}]   ;;  %s8162_s4 = inlined_call_operand.vmem [shape: f32[1,16], index: 4, kind: input, shape index: {}]   ;;  %s8163_s5 = inlined_call_operand.vmem [shape: f32[16,2500], index: 5, kind: input, shape index: {}]   ;;  %s8164_s6 = inlined_call_operand.vmem [shape: f32[1,2500], index: 6, kind: input, shape index: {}]   ;;  %s8165_s7 = inlined_call_operand.vmem [shape: f32[2500,64], index: 7, kind: input, shape index: {}]   ;;  %s8166_s8 = inlined_call_operand.vmem [shape: f32[1,64], index: 8, kind: input, shape index: {}]   ;;  %s8167_s9 = inlined_call_operand.hbm [shape: f32[16,64], index: 9, kind: output, shape index: {0}]   ;;  %s8168_s10 = inlined_call_operand.hbm [shape: f32[16,16], index: 10, kind: output, shape index: {1}]  }
   0x1   :  { %8171 = sst [smem:[#allocation9_spill]] %s8158_s0 }
   0x2   :  { %8172 = sst [smem:[#allocation10_spill]] %s8159_s1 }
   0x3   :  { %16 = vsyncpa [#allocation3], 0 }
   0x4   :  { %18 = vsyncpa [#allocation3 + $0x1], 0 }
   0x5   :  { %19 = vsyncpa [#allocation5], 0 }
   0x6   :  { %21 = vsyncpa [#allocation5 + $0x1], 0  ;;  %s5272_s13 = smov 0   ;;  %s5274_s14 = smov 0  }
   0x7   :  { %s5276_s15 = smov 0   ;;  %s5278_s16 = smov 0  }
   0x8 LB: > { %s5293_s17 = sadd.s32 4294967295, %s5212_s16   ;;  %s4408_s18 = sadd.s32 4294967294, %s5212_s16   ;;  %s5212_s16 = sphi %s5278_s16, %s8184_s16   ;;  %s5208_s15 = sphi %s5276_s15, %s8183_s15   ;;  %s5204_s14 = sphi %s5274_s14, %s8182_s14   ;;  %s5200_s13 = sphi %s5272_s13, %s8181_s13  }
   0x9   : > { %s5297_s19 = sadd.s32 1, %s5212_s16   ;;  %s228_s20 = sadd.s32 1, %s5208_s15 }
   0xa   : > { %s225_s21 = ssub.s32 %s5212_s16, %s5297_s19  ;;  %p238_p0 = scmp.ne.s32.totalorder %s5208_s15, %s5204_s14 }
   0xb   : > { %p226_p1 = scmp.eq.s32.totalorder %s225_s21, 0  ;;  %p239_p2 = scmp.eq.s32.totalorder %s5293_s17, 1 }
   0xc   : > { %p244_p3 = scmp.ne.s32.totalorder %s5204_s14, %s5200_s13  ;;  %p245_p4 = scmp.eq.s32.totalorder %s4408_s18, 1 }
   0xd   : > { %s5308_s22 = scalar_select %p226_p1, %s5208_s15, %s228_s20  }
   0xe   : > { %p5310_p5 = por %p239_p2, %p238_p0  ;;  %p5314_p6 = por %p245_p4, %p244_p3 }
   0xf   : > { %8173 = sst [smem:[#allocation8_spill]] %s5308_s22  ;;  %p4411_p7 = scmp.ge.s32.totalorder %s5212_s16, 1 }
  0x10   : > { %p320_p8 = scmp.lt.s32.totalorder %s5212_s16, 3 }
  0x12   : > { %p321_p9 = pnand %p4411_p7, %p320_p8 }
  0x13   : > { %s8176_s1 = sld [smem:[#allocation10_spill]] (!%p321_p9)  ;;  %p362_p10 = scmp.lt.s32.totalorder (!%p321_p9), %s5293_s17, 1 }
  0x14   : > { %324 = sbr.rel (%p321_p9) target bundleno = 1169 (0x491), region = 56  ;;  %s8177_s0 = sld [smem:[#allocation9_spill]] (!%p321_p9) }
  0x15   : > { %s6923_s20 = sand.u32 (!%p321_p9), 1, %s5204_s14  }
  0x16   : > { %s4291_s11 = scalar_lea.sflag (!%p321_p9), [#allocation5], %s6923_s20 }
  0x19   : > { %v508_v0 = vld [vmem:[%s8176_s1 + $0x468] sm:$0xff]  ;;  %v507_v1 = vld [vmem:[%s8176_s1 + $0x460] sm:$0xff]  ;;  %v5214_v4 = vmov 0.0   ;;  %s363_s28 = scalar_select %p362_p10, %s5293_s17, 1  ;;  %vm633_vm0 = vcmask 523264   ;;  %v510_v18 = vld [vmem:[%s8176_s1 + $0x478] sm:$0xff] }
  0x1a   : > { %v488_v2 = vld [vmem:[%s8176_s1 + $0x3c8] sm:$0xff]  ;;  %653 = vmatprep.subr.mxu0 %v508_v0  ;;  %v487_v3 = vld [vmem:[%s8176_s1 + $0x3c0] sm:$0xff]  ;;  %701 = vmatprep.mubr.f32.mxu0 %v5214_v4  ;;  %v509_v19 = vld [vmem:[%s8176_s1 + $0x470] sm:$0xff]  ;;  %vm1687_vm1 = vcmask 556032   ;;  %vm1691_vm2 = vcmask 1043456   ;;  %vm2395_vm3 = vcmask 130048  }
  0x1b   : > { %654 = vmatpush1.msra.mxu0 %v507_v1  ;;  %v468_v5 = vld [vmem:[%s8176_s1 + $0x328] sm:$0xff]  ;;  %914 = vmatprep.mubr.f32.mxu1 %v5214_v4  ;;  %v467_v6 = vld [vmem:[%s8176_s1 + $0x320] sm:$0xff]  ;;  %s4414_s26 = sshll.u32 %s363_s28, 3  ;;  %v490_v20 = vld [vmem:[%s8176_s1 + $0x3d8] sm:$0xff]  ;;  %s8169_s28 = sshll.u32 %s6923_s20, 3 }
  0x1c   : > { %655 = vmatprep.subr.mxu0 %v488_v2  ;;  %v448_v7 = vld [vmem:[%s8176_s1 + $0x288] sm:$0xff]  ;;  %v447_v8 = vld [vmem:[%s8176_s1 + $0x280] sm:$0xff]  ;;  %s365_s21 = scalar_lea.vmem %s8177_s0, %s4414_s26  ;;  %v514_v21 = vld [vmem:[%s8176_s1 + $0x498] sm:$0xff]  ;;  %s6936_s30 = scalar_lea.vmem [#allocation4], %s8169_s28 }
  0x1d   : > { %656 = vmatpush1.msra.mxu0 %v487_v3  ;;  %v428_v9 = vld [vmem:[%s8176_s1 + $0x1e8] sm:$0xff]  ;;  %v427_v10 = vld [vmem:[%s8176_s1 + $0x1e0] sm:$0xff]  ;;  %v489_v22 = vld [vmem:[%s8176_s1 + $0x3d0] sm:$0xff]  ;;  %866 = vmatprep.subr.mxu1 %v514_v21  ;;  %s8170_s28 = sshll.u32 %s5293_s17, 7  ;;  %s4317_s29 = sshll.u32 %s6936_s30, 4  ;;  %s4318_s29 = int_to_ptr.vmem [resolvable:$true] %s4317_s29 }
  0x1e   : > { %657 = vmatprep.subr.mxu0 %v468_v5  ;;  %v408_v11 = vld [vmem:[%s8176_s1 + $0x148] sm:$0xff]  ;;  %v407_v12 = vld [vmem:[%s8176_s1 + $0x140] sm:$0xff]  ;;  %v513_v23 = vld [vmem:[%s8176_s1 + $0x490] sm:$0xff]  ;;  %s4315_s27 = scalar_lea.hbm %s8168_s10, %s8170_s28  ;;  %s5122_s22 = scalar_lea.vmem %s4318_s29, 128 }
  0x1f   : > { %658 = vmatpush1.msra.mxu0 %v467_v6  ;;  %v388_v13 = vld [vmem:[%s8176_s1 + $0xa8] sm:$0xff]  ;;  %v387_v14 = vld [vmem:[%s8176_s1 + $0xa0] sm:$0xff]  ;;  %v470_v24 = vld [vmem:[%s8176_s1 + $0x338] sm:$0xff]  ;;  %867 = vmatpush1.msra.mxu1 %v513_v23  ;;  %p5123_p11 = scmp.ne.s32.totalorder %s4318_s29, %s5122_s22  ;;  %s5215_s26 = smov [#allocation4]  }
  0x20   : > { %659 = vmatprep.subr.mxu0 %v448_v7  ;;  %v368_v15 = vld [vmem:[%s8176_s1 + $0x8] sm:$0xff]  ;;  %v367_v16 = vld [vmem:[%s8176_s1] sm:$0xff]  ;;  %v494_v25 = vld [vmem:[%s8176_s1 + $0x3f8] sm:$0xff]  ;;  %s5126_s12 = sshll.u32 %s5215_s26, 4  ;;  %s5127_s12 = int_to_ptr.vmem [resolvable:$false] %s5126_s12 }
  0x21   : > { %660 = vmatpush1.msra.mxu0 %v447_v8  ;;  %v5375_v17 = vld [vmem:[%s365_s21] sm:$0xff]  ;;  %v469_v26 = vld [vmem:[%s8176_s1 + $0x330] sm:$0xff]  ;;  %v450_v28 = vld [vmem:[%s8176_s1 + $0x298] sm:$0xff]  ;;  %868 = vmatprep.subr.mxu1 %v494_v25  ;;  %p5124_p12 = pnand %p5123_p11, %p5310_p5  ;;  %s5128_s18 = scalar_lea.vmem %s5127_s12, 256 }
  0x22   : > { %661 = vmatprep.subr.mxu0 %v428_v9  ;;  %v493_v27 = vld [vmem:[%s8176_s1 + $0x3f0] sm:$0xff]  ;;  %v474_v29 = vld [vmem:[%s8176_s1 + $0x358] sm:$0xff]  ;;  %v512_v48 = vld [vmem:[%s8176_s1 + $0x488] sm:$0xff]  ;;  %p5129_p0 = scmp.lt.s32.totalorder %s4318_s29, %s5127_s12  ;;  %p5130_p1 = scmp.lt.s32.totalorder %s5128_s18, %s5122_s22 }
  0x23   : > { %662 = vmatpush1.msra.mxu0 %v427_v10  ;;  %v449_v30 = vld [vmem:[%s8176_s1 + $0x290] sm:$0xff]  ;;  %v430_v32 = vld [vmem:[%s8176_s1 + $0x1f8] sm:$0xff]  ;;  %869 = vmatpush1.msra.mxu1 %v493_v27  ;;  %v511_v49 = vld [vmem:[%s8176_s1 + $0x480] sm:$0xff]  ;;  %p5125_p13 = pneg %p5124_p12 }
  0x24   : > { %663 = vmatprep.subr.mxu0 %v408_v11  ;;  %v473_v31 = vld [vmem:[%s8176_s1 + $0x350] sm:$0xff]  ;;  %v454_v33 = vld [vmem:[%s8176_s1 + $0x2b8] sm:$0xff]  ;;  %870 = vmatprep.subr.mxu1 %v474_v29  ;;  %v492_v50 = vld [vmem:[%s8176_s1 + $0x3e8] sm:$0xff]  ;;  %p5131_p2 = por %p5130_p1, %p5129_p0 }
  0x25   : > { %664 = vmatpush1.msra.mxu0 %v407_v12  ;;  %v429_v34 = vld [vmem:[%s8176_s1 + $0x1f0] sm:$0xff]  ;;  %v410_v36 = vld [vmem:[%s8176_s1 + $0x158] sm:$0xff]  ;;  %871 = vmatpush1.msra.mxu1 %v473_v31  ;;  %v491_v52 = vld [vmem:[%s8176_s1 + $0x3e0] sm:$0xff] }
  0x26   : > { %665 = vmatprep.subr.mxu0 %v388_v13  ;;  %v453_v35 = vld [vmem:[%s8176_s1 + $0x2b0] sm:$0xff]  ;;  %v434_v37 = vld [vmem:[%s8176_s1 + $0x218] sm:$0xff]  ;;  %872 = vmatprep.subr.mxu1 %v454_v33  ;;  %v472_v54 = vld [vmem:[%s8176_s1 + $0x348] sm:$0xff]  ;;  %p5132_p3 = pnand %p5131_p2, %p5125_p13 }
  0x27   : > { %666 = vmatpush1.msra.mxu0 %v387_v14  ;;  %v409_v38 = vld [vmem:[%s8176_s1 + $0x150] sm:$0xff]  ;;  %v390_v40 = vld [vmem:[%s8176_s1 + $0xb8] sm:$0xff]  ;;  %873 = vmatpush1.msra.mxu1 %v453_v35  ;;  %v471_v55 = vld [vmem:[%s8176_s1 + $0x340] sm:$0xff] }
  0x28   : > { %667 = vmatprep.subr.mxu0 %v368_v15  ;;  %v433_v39 = vld [vmem:[%s8176_s1 + $0x210] sm:$0xff]  ;;  %v414_v41 = vld [vmem:[%s8176_s1 + $0x178] sm:$0xff]  ;;  %874 = vmatprep.subr.mxu1 %v434_v37  ;;  %v452_v57 = vld [vmem:[%s8176_s1 + $0x2a8] sm:$0xff] }
  0x29   : > { %668 = vmatpush1.msra.mxu0 %v367_v16  ;;  %v389_v42 = vld [vmem:[%s8176_s1 + $0xb0] sm:$0xff]  ;;  %v370_v44 = vld [vmem:[%s8176_s1 + $0x18] sm:$0xff]  ;;  %875 = vmatpush1.msra.mxu1 %v433_v39  ;;  %v451_v59 = vld [vmem:[%s8176_s1 + $0x2a0] sm:$0xff] }
  0x2a   : > { %4415 = vmatmul.mubr.msk.f32.vlgmr.msra.gmra.mxu0 %vm633_vm0, %v5375_v17  ;;  %724 = vmatprep.subr.mxu0 %v510_v18  ;;  %v413_v43 = vld [vmem:[%s8176_s1 + $0x170] sm:$0xff]  ;;  %v394_v45 = vld [vmem:[%s8176_s1 + $0xd8] sm:$0xff]  ;;  %v432_v61 = vld [vmem:[%s8176_s1 + $0x208] sm:$0xff] }
  0x2b   : > { %725 = vmatpush1.msra.mxu0 %v509_v19  ;;  %772 = vmatprep.mubr.f32.mxu0 %v5214_v4  ;;  %v369_v46 = vld [vmem:[%s8176_s1 + $0x10] sm:$0xff]  ;;  %v374_v51 = vld [vmem:[%s8176_s1 + $0x38] sm:$0xff]  ;;  %v431_v63 = vld [vmem:[%s8176_s1 + $0x200] sm:$0xff] }
  0x2c   : > { %726 = vmatprep.subr.mxu0 %v490_v20  ;;  %876 = vmatprep.subr.mxu1 %v414_v41  ;;  %v393_v47 = vld [vmem:[%s8176_s1 + $0xd0] sm:$0xff]  ;;  %v518_v56 = vld [vmem:[%s8176_s1 + $0x4b8] sm:$0xff]  ;;  %v412_v1 = vld [vmem:[%s8176_s1 + $0x168] sm:$0xff] }
  0x2d   : > { %727 = vmatpush1.msra.mxu0 %v489_v22  ;;  %877 = vmatpush1.msra.mxu1 %v413_v43  ;;  %v373_v53 = vld [vmem:[%s8176_s1 + $0x30] sm:$0xff]  ;;  %v498_v60 = vld [vmem:[%s8176_s1 + $0x418] sm:$0xff]  ;;  %v411_v3 = vld [vmem:[%s8176_s1 + $0x160] sm:$0xff] }
  0x2e   : > { %728 = vmatprep.subr.mxu0 %v470_v24  ;;  %878 = vmatprep.subr.mxu1 %v394_v45  ;;  %v517_v58 = vld [vmem:[%s8176_s1 + $0x4b0] sm:$0xff]  ;;  %v478_v0 = vld [vmem:[%s8176_s1 + $0x378] sm:$0xff]  ;;  %v392_v6 = vld [vmem:[%s8176_s1 + $0xc8] sm:$0xff] }
  0x2f   : > { %729 = vmatpush1.msra.mxu0 %v469_v26  ;;  %879 = vmatpush1.msra.mxu1 %v393_v47  ;;  %v497_v62 = vld [vmem:[%s8176_s1 + $0x410] sm:$0xff]  ;;  %v458_v5 = vld [vmem:[%s8176_s1 + $0x2d8] sm:$0xff]  ;;  %v391_v8 = vld [vmem:[%s8176_s1 + $0xc0] sm:$0xff] }
  0x30   : > { %730 = vmatprep.subr.mxu0 %v450_v28  ;;  %880 = vmatprep.subr.mxu1 %v374_v51  ;;  %v477_v2 = vld [vmem:[%s8176_s1 + $0x370] sm:$0xff]  ;;  %v438_v9 = vld [vmem:[%s8176_s1 + $0x238] sm:$0xff]  ;;  %v372_v10 = vld [vmem:[%s8176_s1 + $0x28] sm:$0xff] }
  0x31   : > { %731 = vmatpush1.msra.mxu0 %v449_v30  ;;  %881 = vmatpush1.msra.mxu1 %v373_v53  ;;  %v457_v7 = vld [vmem:[%s8176_s1 + $0x2d0] sm:$0xff]  ;;  %v371_v12 = vld [vmem:[%s8176_s1 + $0x20] sm:$0xff]  ;;  %v418_v13 = vld [vmem:[%s8176_s1 + $0x198] sm:$0xff] }
  0x32   : > { %732 = vmatprep.subr.mxu0 %v430_v32  ;;  %4418 = vmatmul.mubr.msk.f32.vlgmr.msra.gmra.mxu1 %vm633_vm0, %v5375_v17  ;;  %v437_v11 = vld [vmem:[%s8176_s1 + $0x230] sm:$0xff]  ;;  %v516_v14 = vld [vmem:[%s8176_s1 + $0x4a8] sm:$0xff]  ;;  %v515_v15 = vld [vmem:[%s8176_s1 + $0x4a0] sm:$0xff] }
  0x33   : > { %733 = vmatpush1.msra.mxu0 %v429_v34  ;;  %1008 = vmatprep.subr.mxu1 %v518_v56  ;;  %v496_v16 = vld [vmem:[%s8176_s1 + $0x408] sm:$0xff]  ;;  %v417_v18 = vld [vmem:[%s8176_s1 + $0x190] sm:$0xff]  ;;  %v495_v19 = vld [vmem:[%s8176_s1 + $0x400] sm:$0xff] }
  0x34   : > { %734 = vmatprep.subr.mxu0 %v410_v36  ;;  %1009 = vmatpush1.msra.mxu1 %v517_v58  ;;  %v398_v20 = vld [vmem:[%s8176_s1 + $0xf8] sm:$0xff]  ;;  %v476_v21 = vld [vmem:[%s8176_s1 + $0x368] sm:$0xff]  ;;  %v397_v22 = vld [vmem:[%s8176_s1 + $0xf0] sm:$0xff] }
  0x35   : > { %735 = vmatpush1.msra.mxu0 %v409_v38  ;;  %1010 = vmatprep.subr.mxu1 %v498_v60  ;;  %v475_v23 = vld [vmem:[%s8176_s1 + $0x360] sm:$0xff]  ;;  %v378_v24 = vld [vmem:[%s8176_s1 + $0x58] sm:$0xff]  ;;  %v456_v25 = vld [vmem:[%s8176_s1 + $0x2c8] sm:$0xff] }
  0x36   : > { %736 = vmatprep.subr.mxu0 %v390_v40  ;;  %1011 = vmatpush1.msra.mxu1 %v497_v62  ;;  %v377_v26 = vld [vmem:[%s8176_s1 + $0x50] sm:$0xff]  ;;  %v455_v27 = vld [vmem:[%s8176_s1 + $0x2c0] sm:$0xff]  ;;  %v436_v28 = vld [vmem:[%s8176_s1 + $0x228] sm:$0xff] }
  0x37   : > { %737 = vmatpush1.msra.mxu0 %v389_v42  ;;  %1012 = vmatprep.subr.mxu1 %v478_v0  ;;  %v435_v29 = vld [vmem:[%s8176_s1 + $0x220] sm:$0xff]  ;;  %v522_v30 = vld [vmem:[%s8176_s1 + $0x4d8] sm:$0xff]  ;;  %v416_v31 = vld [vmem:[%s8176_s1 + $0x188] sm:$0xff] }
  0x38   : > { %738 = vmatprep.subr.mxu0 %v370_v44  ;;  %1013 = vmatpush1.msra.mxu1 %v477_v2  ;;  %v521_v32 = vld [vmem:[%s8176_s1 + $0x4d0] sm:$0xff]  ;;  %v415_v33 = vld [vmem:[%s8176_s1 + $0x180] sm:$0xff]  ;;  %v502_v34 = vld [vmem:[%s8176_s1 + $0x438] sm:$0xff] }
  0x39   : > { %739 = vmatpush1.msra.mxu0 %v369_v46  ;;  %1014 = vmatprep.subr.mxu1 %v458_v5  ;;  %v396_v35 = vld [vmem:[%s8176_s1 + $0xe8] sm:$0xff]  ;;  %v501_v36 = vld [vmem:[%s8176_s1 + $0x430] sm:$0xff]  ;;  %v395_v37 = vld [vmem:[%s8176_s1 + $0xe0] sm:$0xff] }
  0x3a   : > { %4416 = vmatmul.mubr.msk.f32.vlgmr.msra.gmra.mxu0 %vm633_vm0, %v5375_v17  ;;  %795 = vmatprep.subr.mxu0 %v512_v48  ;;  %v482_v38 = vld [vmem:[%s8176_s1 + $0x398] sm:$0xff]  ;;  %v376_v39 = vld [vmem:[%s8176_s1 + $0x48] sm:$0xff]  ;;  %v481_v40 = vld [vmem:[%s8176_s1 + $0x390] sm:$0xff] }
  0x3b   : > { %796 = vmatpush1.msra.mxu0 %v511_v49  ;;  %843 = vmatprep.mubr.f32.mxu0 %v5214_v4  ;;  %v375_v41 = vld [vmem:[%s8176_s1 + $0x40] sm:$0xff]  ;;  %v462_v42 = vld [vmem:[%s8176_s1 + $0x2f8] sm:$0xff]  ;;  %v520_v43 = vld [vmem:[%s8176_s1 + $0x4c8] sm:$0xff] }
  0x3c   : > { %797 = vmatprep.subr.mxu0 %v492_v50  ;;  %1015 = vmatpush1.msra.mxu1 %v457_v7  ;;  %v519_v44 = vld [vmem:[%s8176_s1 + $0x4c0] sm:$0xff]  ;;  %v500_v45 = vld [vmem:[%s8176_s1 + $0x428] sm:$0xff]  ;;  %v461_v46 = vld [vmem:[%s8176_s1 + $0x2f0] sm:$0xff] }
  0x3d   : > { %798 = vmatpush1.msra.mxu0 %v491_v52  ;;  %1016 = vmatprep.subr.mxu1 %v438_v9  ;;  %v499_v47 = vld [vmem:[%s8176_s1 + $0x420] sm:$0xff]  ;;  %v442_v48 = vld [vmem:[%s8176_s1 + $0x258] sm:$0xff]  ;;  %v480_v49 = vld [vmem:[%s8176_s1 + $0x388] sm:$0xff] }
  0x3e   : > { %799 = vmatprep.subr.mxu0 %v472_v54  ;;  %1017 = vmatpush1.msra.mxu1 %v437_v11  ;;  %v441_v50 = vld [vmem:[%s8176_s1 + $0x250] sm:$0xff]  ;;  %v479_v51 = vld [vmem:[%s8176_s1 + $0x380] sm:$0xff]  ;;  %v422_v52 = vld [vmem:[%s8176_s1 + $0x1b8] sm:$0xff] }
  0x3f   : > { %800 = vmatpush1.msra.mxu0 %v471_v55  ;;  %1018 = vmatprep.subr.mxu1 %v418_v13  ;;  %v460_v53 = vld [vmem:[%s8176_s1 + $0x2e8] sm:$0xff]  ;;  %v421_v54 = vld [vmem:[%s8176_s1 + $0x1b0] sm:$0xff]  ;;  %v459_v55 = vld [vmem:[%s8176_s1 + $0x2e0] sm:$0xff] }
  0x40   : > { %801 = vmatprep.subr.mxu0 %v452_v57  ;;  %1019 = vmatpush1.msra.mxu1 %v417_v18  ;;  %v402_v56 = vld [vmem:[%s8176_s1 + $0x118] sm:$0xff]  ;;  %v440_v57 = vld [vmem:[%s8176_s1 + $0x248] sm:$0xff]  ;;  %v401_v58 = vld [vmem:[%s8176_s1 + $0x110] sm:$0xff] }
  0x41   : > { %802 = vmatpush1.msra.mxu0 %v451_v59  ;;  %1020 = vmatprep.subr.mxu1 %v398_v20  ;;  %v439_v59 = vld [vmem:[%s8176_s1 + $0x240] sm:$0xff]  ;;  %v382_v60 = vld [vmem:[%s8176_s1 + $0x78] sm:$0xff]  ;;  %v381_v62 = vld [vmem:[%s8176_s1 + $0x70] sm:$0xff] }
  0x42   : > { %803 = vmatprep.subr.mxu0 %v432_v61  ;;  %1021 = vmatpush1.msra.mxu1 %v397_v22  ;;  %v420_v61 = vld [vmem:[%s8176_s1 + $0x1a8] sm:$0xff]  ;;  %v526_v2 = vld [vmem:[%s8176_s1 + $0x4f8] sm:$0xff]  ;;  %v525_v5 = vld [vmem:[%s8176_s1 + $0x4f0] sm:$0xff] }
  0x43   : > { %804 = vmatpush1.msra.mxu0 %v431_v63  ;;  %1022 = vmatprep.subr.mxu1 %v378_v24  ;;  %v419_v63 = vld [vmem:[%s8176_s1 + $0x1a0] sm:$0xff]  ;;  %v400_v0 = vld [vmem:[%s8176_s1 + $0x108] sm:$0xff]  ;;  %v506_v7 = vld [vmem:[%s8176_s1 + $0x458] sm:$0xff] }
  0x44   : > { %805 = vmatprep.subr.mxu0 %v412_v1  ;;  %1023 = vmatpush1.msra.mxu1 %v377_v26  ;;  %v399_v1 = vld [vmem:[%s8176_s1 + $0x100] sm:$0xff]  ;;  %v505_v11 = vld [vmem:[%s8176_s1 + $0x450] sm:$0xff]  ;;  %v486_v13 = vld [vmem:[%s8176_s1 + $0x3b8] sm:$0xff] }
  0x45   : > { %806 = vmatpush1.msra.mxu0 %v411_v3  ;;  %1056 = vmatprep.mubr.f32.mxu1 %v5214_v4  ;;  %v380_v3 = vld [vmem:[%s8176_s1 + $0x68] sm:$0xff]  ;;  %v523_v9 = vld [vmem:[%s8176_s1 + $0x4e0] sm:$0xff]  ;;  %v466_v18 = vld [vmem:[%s8176_s1 + $0x318] sm:$0xff] }
  0x46   : > { %807 = vmatprep.subr.mxu0 %v392_v6  ;;  %4420 = vmatmul.mubr.msk.f32.vlgmr.msra.gmra.mxu1 %vm633_vm0, %v5375_v17  ;;  %v379_v6 = vld [vmem:[%s8176_s1 + $0x60] sm:$0xff]  ;;  %v465_v20 = vld [vmem:[%s8176_s1 + $0x310] sm:$0xff]  ;;  %v446_v22 = vld [vmem:[%s8176_s1 + $0x278] sm:$0xff] }
  0x47   : > { %808 = vmatpush1.msra.mxu0 %v391_v8  ;;  %1150 = vmatprep.subr.mxu1 %v522_v30  ;;  %v524_v8 = vld [vmem:[%s8176_s1 + $0x4e8] sm:$0xff]  ;;  %v445_v24 = vld [vmem:[%s8176_s1 + $0x270] sm:$0xff]  ;;  %v426_v26 = vld [vmem:[%s8176_s1 + $0x1d8] sm:$0xff] }
  0x48   : > { %809 = vmatprep.subr.mxu0 %v372_v10  ;;  %1151 = vmatpush1.msra.mxu1 %v521_v32  ;;  %v504_v10 = vld [vmem:[%s8176_s1 + $0x448] sm:$0xff]  ;;  %v406_v30 = vld [vmem:[%s8176_s1 + $0x138] sm:$0xff]  ;;  %v405_v32 = vld [vmem:[%s8176_s1 + $0x130] sm:$0xff] }
  0x49   : > { %810 = vmatpush1.msra.mxu0 %v371_v12  ;;  %1152 = vmatprep.subr.mxu1 %v502_v34  ;;  %v503_v12 = vld [vmem:[%s8176_s1 + $0x440] sm:$0xff]  ;;  %v386_v34 = vld [vmem:[%s8176_s1 + $0x98] sm:$0xff] }
  0x4a   : > { %4417 = vmatmul.mubr.msk.f32.vlgmr.msra.gmra.mxu0 %vm633_vm0, %v5375_v17  ;;  %937 = vmatprep.subr.mxu0 %v516_v14  ;;  %v484_v14 = vld [vmem:[%s8176_s1 + $0x3a8] sm:$0xff] }
  0x4b   : > { %938 = vmatpush1.msra.mxu0 %v515_v15  ;;  %985 = vmatprep.mubr.f32.mxu0 %v5214_v4  ;;  %v485_v15 = vld [vmem:[%s8176_s1 + $0x3b0] sm:$0xff] }
  0x4c   : > { %939 = vmatprep.subr.mxu0 %v496_v16  ;;  %1153 = vmatpush1.msra.mxu1 %v501_v36  ;;  %v483_v16 = vld [vmem:[%s8176_s1 + $0x3a0] sm:$0xff]  ;;  %v385_v36 = vld [vmem:[%s8176_s1 + $0x90] sm:$0xff] }
  0x4d   : > { %940 = vmatpush1.msra.mxu0 %v495_v19  ;;  %1154 = vmatprep.subr.mxu1 %v482_v38  ;;  %v464_v19 = vld [vmem:[%s8176_s1 + $0x308] sm:$0xff]  ;;  %v1398_v38 = vld [vmem:[%s8161_s3 + $0xf8] sm:$0xff] }
  0x4e   : > { %941 = vmatprep.subr.mxu0 %v476_v21  ;;  %1155 = vmatpush1.msra.mxu1 %v481_v40  ;;  %v463_v21 = vld [vmem:[%s8176_s1 + $0x300] sm:$0xff]  ;;  %v1382_v40 = vld [vmem:[%s8161_s3 + $0x78] sm:$0xff] }
  0x4f   : > { %942 = vmatpush1.msra.mxu0 %v475_v23  ;;  %1156 = vmatprep.subr.mxu1 %v462_v42  ;;  %v444_v23 = vld [vmem:[%s8176_s1 + $0x268] sm:$0xff]  ;;  %v1397_v42 = vld [vmem:[%s8161_s3 + $0xf0] sm:$0xff] }
  0x50   : > { %943 = vmatprep.subr.mxu0 %v456_v25  ;;  %1157 = vmatpush1.msra.mxu1 %v461_v46  ;;  %v443_v25 = vld [vmem:[%s8176_s1 + $0x260] sm:$0xff]  ;;  %v1428_v46 = vld [vmem:[%s8161_s3 + $0x1e8] sm:$0xff] }
  0x51   : > { %944 = vmatpush1.msra.mxu0 %v455_v27  ;;  %1158 = vmatprep.subr.mxu1 %v442_v48  ;;  %v424_v27 = vld [vmem:[%s8176_s1 + $0x1c8] sm:$0xff] }
  0x52   : > { %945 = vmatprep.subr.mxu0 %v436_v28  ;;  %1159 = vmatpush1.msra.mxu1 %v441_v50  ;;  %v425_v28 = vld [vmem:[%s8176_s1 + $0x1d0] sm:$0xff]  ;;  %v1412_v48 = vld [vmem:[%s8161_s3 + $0x168] sm:$0xff]  ;;  %v1427_v50 = vld [vmem:[%s8161_s3 + $0x1e0] sm:$0xff] }
  0x53   : > { %946 = vmatpush1.msra.mxu0 %v435_v29  ;;  %1160 = vmatprep.subr.mxu1 %v422_v52  ;;  %v423_v29 = vld [vmem:[%s8176_s1 + $0x1c0] sm:$0xff] }
  0x54   : > { %947 = vmatprep.subr.mxu0 %v416_v31  ;;  %1161 = vmatpush1.msra.mxu1 %v421_v54  ;;  %v404_v31 = vld [vmem:[%s8176_s1 + $0x128] sm:$0xff]  ;;  %v1411_v52 = vld [vmem:[%s8161_s3 + $0x160] sm:$0xff]  ;;  %v1426_v54 = vld [vmem:[%s8161_s3 + $0x1d8] sm:$0xff] }
  0x55   : > { %948 = vmatpush1.msra.mxu0 %v415_v33  ;;  %1162 = vmatprep.subr.mxu1 %v402_v56  ;;  %v403_v33 = vld [vmem:[%s8176_s1 + $0x120] sm:$0xff]  ;;  %v1410_v56 = vld [vmem:[%s8161_s3 + $0x158] sm:$0xff] }
  0x56   : > { %949 = vmatprep.subr.mxu0 %v396_v35  ;;  %1163 = vmatpush1.msra.mxu1 %v401_v58  ;;  %v384_v35 = vld [vmem:[%s8176_s1 + $0x88] sm:$0xff]  ;;  %v1425_v58 = vld [vmem:[%s8161_s3 + $0x1d0] sm:$0xff] }
  0x57   : > { %950 = vmatpush1.msra.mxu0 %v395_v37  ;;  %1164 = vmatprep.subr.mxu1 %v382_v60  ;;  %v383_v37 = vld [vmem:[%s8176_s1 + $0x80] sm:$0xff]  ;;  %v1409_v60 = vld [vmem:[%s8161_s3 + $0x150] sm:$0xff] }
  0x58   : > { %951 = vmatprep.subr.mxu0 %v376_v39  ;;  %1165 = vmatpush1.msra.mxu1 %v381_v62  ;;  %v1430_v39 = vld [vmem:[%s8161_s3 + $0x1f8] sm:$0xff]  ;;  %v1424_v62 = vld [vmem:[%s8161_s3 + $0x1c8] sm:$0xff] }
  0x59   : > { %952 = vmatpush1.msra.mxu0 %v375_v41  ;;  %1198 = vmatprep.mubr.f32.mxu1 %v5214_v4  ;;  %v1414_v41 = vld [vmem:[%s8161_s3 + $0x178] sm:$0xff] }
  0x5a   : > { %4419 = vmatmul.mubr.msk.f32.vlgmr.msra.gmra.mxu0 %vm633_vm0, %v5375_v17  ;;  %1079 = vmatprep.subr.mxu0 %v520_v43  ;;  %v1429_v43 = vld [vmem:[%s8161_s3 + $0x1f0] sm:$0xff] }
  0x5b   : > { %1080 = vmatpush1.msra.mxu0 %v519_v44  ;;  %1127 = vmatprep.mubr.f32.mxu0 %v5214_v4  ;;  %v1381_v44 = vld [vmem:[%s8161_s3 + $0x70] sm:$0xff] }
  0x5c   : > { %1081 = vmatprep.subr.mxu0 %v500_v45  ;;  %4422 = vmatmul.mubr.msk.f32.vlgmr.msra.gmra.mxu1 %vm633_vm0, %v5375_v17  ;;  %v1413_v45 = vld [vmem:[%s8161_s3 + $0x170] sm:$0xff] }
  0x5d   : > { %1082 = vmatpush1.msra.mxu0 %v499_v47  ;;  %1292 = vmatprep.subr.mxu1 %v526_v2  ;;  %v1380_v47 = vld [vmem:[%s8161_s3 + $0x68] sm:$0xff]  ;;  %v1423_v2 = vld [vmem:[%s8161_s3 + $0x1c0] sm:$0xff] }
  0x5e   : > { %1083 = vmatprep.subr.mxu0 %v480_v49  ;;  %1293 = vmatpush1.msra.mxu1 %v525_v5  ;;  %v1395_v49 = vld [vmem:[%s8161_s3 + $0xe0] sm:$0xff] }
  0x5f   : > { %1084 = vmatpush1.msra.mxu0 %v479_v51  ;;  %1294 = vmatprep.subr.mxu1 %v506_v7  ;;  %v1379_v51 = vld [vmem:[%s8161_s3 + $0x60] sm:$0xff]  ;;  %v1422_v7 = vld [vmem:[%s8161_s3 + $0x1b8] sm:$0xff] }
  0x60   : > { %1085 = vmatprep.subr.mxu0 %v460_v53  ;;  %1295 = vmatpush1.msra.mxu1 %v505_v11  ;;  %v1394_v53 = vld [vmem:[%s8161_s3 + $0xd8] sm:$0xff]  ;;  %v1407_v5 = vld [vmem:[%s8161_s3 + $0x140] sm:$0xff]  ;;  %v1421_v11 = vld [vmem:[%s8161_s3 + $0x1b0] sm:$0xff] }
  0x61   : > { %1086 = vmatpush1.msra.mxu0 %v459_v55  ;;  %1296 = vmatprep.subr.mxu1 %v486_v13  ;;  %v1378_v55 = vld [vmem:[%s8161_s3 + $0x58] sm:$0xff]  ;;  %v1405_v13 = vld [vmem:[%s8161_s3 + $0x130] sm:$0xff] }
  0x62   : > { %1087 = vmatprep.subr.mxu0 %v440_v57  ;;  %1297 = vmatpush1.msra.mxu1 %v485_v15  ;;  %v1393_v57 = vld [vmem:[%s8161_s3 + $0xd0] sm:$0xff]  ;;  %v1420_v15 = vld [vmem:[%s8161_s3 + $0x1a8] sm:$0xff] }
  0x63   : > { %1088 = vmatpush1.msra.mxu0 %v439_v59  ;;  %1298 = vmatprep.subr.mxu1 %v466_v18  ;;  %v1377_v59 = vld [vmem:[%s8161_s3 + $0x50] sm:$0xff]  ;;  %v1404_v18 = vld [vmem:[%s8161_s3 + $0x128] sm:$0xff] }
  0x64   : > { %1089 = vmatprep.subr.mxu0 %v420_v61  ;;  %1299 = vmatpush1.msra.mxu1 %v465_v20  ;;  %v1392_v61 = vld [vmem:[%s8161_s3 + $0xc8] sm:$0xff]  ;;  %v1419_v20 = vld [vmem:[%s8161_s3 + $0x1a0] sm:$0xff] }
  0x65   : > { %1090 = vmatpush1.msra.mxu0 %v419_v63  ;;  %1300 = vmatprep.subr.mxu1 %v446_v22  ;;  %v1376_v63 = vld [vmem:[%s8161_s3 + $0x48] sm:$0xff]  ;;  %v1403_v22 = vld [vmem:[%s8161_s3 + $0x120] sm:$0xff] }
  0x66   : > { %1091 = vmatprep.subr.mxu0 %v400_v0  ;;  %1301 = vmatpush1.msra.mxu1 %v445_v24  ;;  %v1408_v0 = vld [vmem:[%s8161_s3 + $0x148] sm:$0xff]  ;;  %v1418_v24 = vld [vmem:[%s8161_s3 + $0x198] sm:$0xff] }
  0x67   : > { %1092 = vmatpush1.msra.mxu0 %v399_v1  ;;  %1302 = vmatprep.subr.mxu1 %v426_v26  ;;  %v1391_v1 = vld [vmem:[%s8161_s3 + $0xc0] sm:$0xff]  ;;  %v1402_v26 = vld [vmem:[%s8161_s3 + $0x118] sm:$0xff] }
  0x68   : > { %1093 = vmatprep.subr.mxu0 %v380_v3  ;;  %1303 = vmatpush1.msra.mxu1 %v425_v28  ;;  %v1375_v3 = vld [vmem:[%s8161_s3 + $0x40] sm:$0xff]  ;;  %v1417_v28 = vld [vmem:[%s8161_s3 + $0x190] sm:$0xff] }
  0x69   : > { %1094 = vmatpush1.msra.mxu0 %v379_v6  ;;  %1304 = vmatprep.subr.mxu1 %v406_v30  ;;  %v1390_v6 = vld [vmem:[%s8161_s3 + $0xb8] sm:$0xff]  ;;  %v1401_v30 = vld [vmem:[%s8161_s3 + $0x110] sm:$0xff] }
  0x6a   : > { %4421 = vmatmul.mubr.msk.f32.vlgmr.msra.gmra.mxu0 %vm633_vm0, %v5375_v17  ;;  %1221 = vmatprep.subr.mxu0 %v524_v8  ;;  %v1374_v8 = vld [vmem:[%s8161_s3 + $0x38] sm:$0xff] }
  0x6b   : > { %1222 = vmatpush1.msra.mxu0 %v523_v9  ;;  %1269 = vmatprep.mubr.f32.mxu0 %v5214_v4  ;;  %v1406_v9 = vld [vmem:[%s8161_s3 + $0x138] sm:$0xff] }
  0x6c   : > { %1223 = vmatprep.subr.mxu0 %v504_v10  ;;  %1305 = vmatpush1.msra.mxu1 %v405_v32  ;;  %v1389_v10 = vld [vmem:[%s8161_s3 + $0xb0] sm:$0xff]  ;;  %v1416_v32 = vld [vmem:[%s8161_s3 + $0x188] sm:$0xff] }
  0x6d   : > { %1224 = vmatpush1.msra.mxu0 %v503_v12  ;;  %1306 = vmatprep.subr.mxu1 %v386_v34  ;;  %v1373_v12 = vld [vmem:[%s8161_s3 + $0x30] sm:$0xff]  ;;  %v1400_v34 = vld [vmem:[%s8161_s3 + $0x108] sm:$0xff] }
  0x6e   : > { %1225 = vmatprep.subr.mxu0 %v484_v14  ;;  %1307 = vmatpush1.msra.mxu1 %v385_v36  ;;  %v1388_v14 = vld [vmem:[%s8161_s3 + $0xa8] sm:$0xff]  ;;  %v1415_v36 = vld [vmem:[%s8161_s3 + $0x180] sm:$0xff] }
  0x6f   : > { %1226 = vmatpush1.msra.mxu0 %v483_v16  ;;  %1340 = vmatprep.mubr.f32.mxu1 %v5214_v4  ;;  %v1372_v16 = vld [vmem:[%s8161_s3 + $0x28] sm:$0xff] }
  0x70   : > { %1227 = vmatprep.subr.mxu0 %v464_v19  ;;  %4424 = vmatmul.mubr.msk.f32.vlgmr.msra.gmra.mxu1 %vm633_vm0, %v5375_v17  ;;  %v1387_v19 = vld [vmem:[%s8161_s3 + $0xa0] sm:$0xff] }
  0x71   : > { %1228 = vmatpush1.msra.mxu0 %v463_v21  ;;  %4482 = vmatprep.subr.mxu1 %v1430_v39  ;;  %v1371_v21 = vld [vmem:[%s8161_s3 + $0x20] sm:$0xff]  ;;  %v1462_v39 = vld [vmem:[%s8161_s3 + $0x2f8] sm:$0xff] }
  0x72   : > { %1229 = vmatprep.subr.mxu0 %v444_v23  ;;  %4483 = vmatpush3.msra.mxu1 %v1414_v41  ;;  %v1386_v23 = vld [vmem:[%s8161_s3 + $0x98] sm:$0xff]  ;;  %v533_v41 = vlaneseq }
  0x73   : > { %1230 = vmatpush1.msra.mxu0 %v443_v25  ;;  %4484 = vmatprep.subr.mxu1 %v1429_v43  ;;  %v1370_v25 = vld [vmem:[%s8161_s3 + $0x18] sm:$0xff] }
  0x74   : > { %1231 = vmatprep.subr.mxu0 %v424_v27  ;;  %4485 = vmatpush3.msra.mxu1 %v1413_v45  ;;  %v1385_v27 = vld [vmem:[%s8161_s3 + $0x90] sm:$0xff] }
  0x75   : > { %1232 = vmatpush1.msra.mxu0 %v423_v29  ;;  %4486 = vmatprep.subr.mxu1 %v1428_v46  ;;  %v1369_v29 = vld [vmem:[%s8161_s3 + $0x10] sm:$0xff] }
  0x76   : > { %1233 = vmatprep.subr.mxu0 %v404_v31  ;;  %4487 = vmatpush3.msra.mxu1 %v1412_v48  ;;  %v1384_v31 = vld [vmem:[%s8161_s3 + $0x88] sm:$0xff] }
  0x77   : > { %1234 = vmatpush1.msra.mxu0 %v403_v33  ;;  %4488 = vmatprep.subr.mxu1 %v1427_v50  ;;  %v1368_v33 = vld [vmem:[%s8161_s3 + $0x8] sm:$0xff] }
  0x78   : > { %1235 = vmatprep.subr.mxu0 %v384_v35  ;;  %4489 = vmatpush3.msra.mxu1 %v1411_v52  ;;  %v1383_v35 = vld [vmem:[%s8161_s3 + $0x80] sm:$0xff] }
  0x79   : > { %1236 = vmatpush1.msra.mxu0 %v383_v37  ;;  %4490 = vmatprep.subr.mxu1 %v1426_v54  ;;  %v1367_v37 = vld [vmem:[%s8161_s3] sm:$0xff]  ;;  %v1461_v54 = vld [vmem:[%s8161_s3 + $0x2f0] sm:$0xff] }
  0x7a   : > { %4423 = vmatmul.mubr.msk.f32.vlgmr.msra.gmra.mxu0 %vm633_vm0, %v5375_v17  ;;  %4447 = vmatprep.subr.mxu0 %v1398_v38  ;;  %v1396_v17 = vld [vmem:[%s8161_s3 + $0xe8] sm:$0xff]  ;;  %v1399_v38 = vld [vmem:[%s8161_s3 + $0x100] sm:$0xff] }
  0x7b   : > { %4448 = vmatpush3.msra.mxu0 %v1382_v40  ;;  %4491 = vmatpush3.msra.mxu1 %v1410_v56  ;;  %v1494_v40 = vld [vmem:[%s8161_s3 + $0x3f8] sm:$0xff]  ;;  %v1460_v56 = vld [vmem:[%s8161_s3 + $0x2e8] sm:$0xff] }
  0x7c   : > { %4449 = vmatprep.subr.mxu0 %v1397_v42  ;;  %4492 = vmatprep.subr.mxu1 %v1425_v58  ;;  %v6035_v42 = vshrl.u32 %v533_v41, 7 }
  0x7d   : > { %4450 = vmatpush3.msra.mxu0 %v1381_v44  ;;  %4493 = vmatpush3.msra.mxu1 %v1409_v60  ;;  %v6043_v44 = vld [vmem:[%s8160_s2] sm:$0xff] }
  0x7e   : > { %4451 = vmatprep.subr.mxu0 %v1396_v17  ;;  %4494 = vmatprep.subr.mxu1 %v1424_v62  ;;  %v6038_v43 = vsub.s32 0, %v6035_v42  ;;  %v6046_v45 = vsub.s32 1, %v6035_v42  ;;  %v6068_v58 = vsub.s32 2, %v6035_v42  ;;  %v6074_v60 = vsub.s32 3, %v6035_v42  ;;  %v1458_v62 = vld [vmem:[%s8161_s3 + $0x2d8] sm:$0xff] }
  0x7f   : > { %4452 = vmatpush3.msra.mxu0 %v1380_v47  ;;  %4495 = vmatpush3.msra.mxu1 %v1408_v0  ;;  %v1442_v0 = vld [vmem:[%s8161_s3 + $0x258] sm:$0xff] }
  0x80   : > { %4453 = vmatprep.subr.mxu0 %v1395_v49  ;;  %4496 = vmatprep.subr.mxu1 %v1423_v2  ;;  %v536_v17 = vrot.slane %v6043_v44, %v6038_v43  ;;  %v540_v46 = vrot.slane %v6043_v44, %v6046_v45  ;;  %v548_v2 = vrot.slane %v6043_v44, %v6074_v60 }
  0x81   : > { %4454 = vmatpush3.msra.mxu0 %v1379_v51  ;;  %4497 = vmatpush3.msra.mxu1 %v1407_v5  ;;  %v1441_v5 = vld [vmem:[%s8161_s3 + $0x250] sm:$0xff] }
  0x82   : > { %4455 = vmatprep.subr.mxu0 %v1394_v53  ;;  %4498 = vmatprep.subr.mxu1 %v1422_v7  ;;  %v1446_v53 = vld [vmem:[%s8161_s3 + $0x278] sm:$0xff] }
  0x83   : > { %4456 = vmatpush3.msra.mxu0 %v1378_v55  ;;  %4499 = vmatpush3.msra.mxu1 %v1406_v9  ;;  %v1445_v55 = vld [vmem:[%s8161_s3 + $0x270] sm:$0xff]  ;;  %v1440_v9 = vld [vmem:[%s8161_s3 + $0x248] sm:$0xff] }
  0x84   : > { %4457 = vmatprep.subr.mxu0 %v1393_v57  ;;  %4500 = vmatprep.subr.mxu1 %v1421_v11  ;;  %v1444_v57 = vld [vmem:[%s8161_s3 + $0x268] sm:$0xff]  ;;  %v1455_v11 = vld [vmem:[%s8161_s3 + $0x2c0] sm:$0xff] }
  0x85   : > { %4458 = vmatpush3.msra.mxu0 %v1377_v59  ;;  %4501 = vmatpush3.msra.mxu1 %v1405_v13  ;;  %v1459_v59 = vld [vmem:[%s8161_s3 + $0x2e0] sm:$0xff] }
  0x86   : > { %4459 = vmatprep.subr.mxu0 %v1392_v61  ;;  %4502 = vmatprep.subr.mxu1 %v1420_v15  ;;  %v1443_v61 = vld [vmem:[%s8161_s3 + $0x260] sm:$0xff] }
  0x87   : > { %4460 = vmatpush3.msra.mxu0 %v1376_v63  ;;  %4503 = vmatpush3.msra.mxu1 %v1404_v18  ;;  %v544_v63 = vrot.slane %v6043_v44, %v6068_v58  ;;  %v1478_v18 = vld [vmem:[%s8161_s3 + $0x378] sm:$0xff] }
  0x88   : > { %4461 = vmatprep.subr.mxu0 %v1391_v1  ;;  %4504 = vmatprep.subr.mxu1 %v1419_v20  ;;  %v1457_v1 = vld [vmem:[%s8161_s3 + $0x2d0] sm:$0xff] }
  0x89   : > { %4462 = vmatpush3.msra.mxu0 %v1375_v3  ;;  %4505 = vmatpush3.msra.mxu1 %v1403_v22  ;;  %v1493_v20 = vld [vmem:[%s8161_s3 + $0x3f0] sm:$0xff] }
  0x8a   : > { %4463 = vmatprep.subr.mxu0 %v1390_v6  ;;  %4506 = vmatprep.subr.mxu1 %v1418_v24  ;;  %v1456_v6 = vld [vmem:[%s8161_s3 + $0x2c8] sm:$0xff]  ;;  %v1477_v22 = vld [vmem:[%s8161_s3 + $0x370] sm:$0xff] }
  0x8b   : > { %4464 = vmatpush3.msra.mxu0 %v1374_v8  ;;  %4507 = vmatpush3.msra.mxu1 %v1402_v26  ;;  %v1492_v24 = vld [vmem:[%s8161_s3 + $0x3e8] sm:$0xff] }
  0x8c   : > { %4465 = vmatprep.subr.mxu0 %v1389_v10  ;;  %4508 = vmatprep.subr.mxu1 %v1417_v28  ;;  %v1436_v26 = vld [vmem:[%s8161_s3 + $0x228] sm:$0xff]  ;;  %v1451_v28 = vld [vmem:[%s8161_s3 + $0x2a0] sm:$0xff] }
  0x8d   : > { %4466 = vmatpush3.msra.mxu0 %v1373_v12  ;;  %4509 = vmatpush3.msra.mxu1 %v1401_v30  ;;  %v1439_v12 = vld [vmem:[%s8161_s3 + $0x240] sm:$0xff]  ;;  %v6150_v30 = vsub.s32 5, %v6035_v42 }
  0x8e   : > { %4467 = vmatprep.subr.mxu0 %v1388_v14  ;;  %4510 = vmatprep.subr.mxu1 %v1416_v32  ;;  %v1454_v14 = vld [vmem:[%s8161_s3 + $0x2b8] sm:$0xff]  ;;  %v1475_v32 = vld [vmem:[%s8161_s3 + $0x360] sm:$0xff] }
  0x8f   : > { %4468 = vmatpush3.msra.mxu0 %v1372_v16  ;;  %4511 = vmatpush3.msra.mxu1 %v1400_v34  ;;  %v1438_v16 = vld [vmem:[%s8161_s3 + $0x238] sm:$0xff] }
  0x90   : > { %4469 = vmatprep.subr.mxu0 %v1387_v19  ;;  %4512 = vmatprep.subr.mxu1 %v1415_v36  ;;  %v1453_v19 = vld [vmem:[%s8161_s3 + $0x2b0] sm:$0xff]  ;;  %v1490_v34 = vld [vmem:[%s8161_s3 + $0x3d8] sm:$0xff] }
  0x91   : > { %4470 = vmatpush3.msra.mxu0 %v1371_v21  ;;  %4513 = vmatpush3.msra.mxu1 %v1399_v38  ;;  %v1437_v21 = vld [vmem:[%s8161_s3 + $0x230] sm:$0xff]  ;;  %v1434_v36 = vld [vmem:[%s8161_s3 + $0x218] sm:$0xff] }
  0x92   : > { %4471 = vmatprep.subr.mxu0 %v1386_v23  ;;  %4552 = vmatprep.subr.mxu1 %v1494_v40  ;;  %v1452_v23 = vld [vmem:[%s8161_s3 + $0x2a8] sm:$0xff]  ;;  %v1449_v38 = vld [vmem:[%s8161_s3 + $0x290] sm:$0xff]  ;;  %v556_v40 = vrot.slane %v6043_v44, %v6150_v30 }
  0x93   : > { %4472 = vmatpush3.msra.mxu0 %v1370_v25  ;;  %v6135_v25 = vsub.s32 4, %v6035_v42 }
  0x94   : > { %4473 = vmatprep.subr.mxu0 %v1385_v27  ;;  %v1476_v27 = vld [vmem:[%s8161_s3 + $0x368] sm:$0xff] }
  0x95   : > { %4474 = vmatpush3.msra.mxu0 %v1369_v29  ;;  %v1491_v29 = vld [vmem:[%s8161_s3 + $0x3e0] sm:$0xff] }
  0x96   : > { %4475 = vmatprep.subr.mxu0 %v1384_v31  ;;  %v1435_v31 = vld [vmem:[%s8161_s3 + $0x220] sm:$0xff] }
  0x97   : > { %4476 = vmatpush3.msra.mxu0 %v1368_v33  ;;  %v1450_v33 = vld [vmem:[%s8161_s3 + $0x298] sm:$0xff] }
  0x98   : > { %4477 = vmatprep.subr.mxu0 %v1383_v35  ;;  %v552_v35 = vrot.slane %v6043_v44, %v6135_v25 }
  0x99   : > { %4478 = vmatpush3.msra.mxu0 %v1367_v37  ;;  %v1474_v37 = vld [vmem:[%s8161_s3 + $0x358] sm:$0xff] }
  0x9a   : > { %4517 = vmatprep.subr.mxu0 %v1462_v39  ;;  %v1489_v39 = vld [vmem:[%s8161_s3 + $0x3d0] sm:$0xff] }
  0xea   : > { %v703_v47 = vpop.f32.mrf.mxu0 }
  0xeb   : > { %v704_v48 = vadd.f32 %v703_v47, %v536_v17  ;;  %v1433_v17 = vld [vmem:[%s8161_s3 + $0x210] sm:$0xff] }
  0xec   : > { %v705_v49 = vpop.f32.mrf.mxu0 }
  0xed   : > { %v706_v50 = vadd.f32 %v705_v49, %v540_v46  ;;  %v1347_v52 = vmax.f32 %v704_v48, 0.0  ;;  %v1473_v46 = vld [vmem:[%s8161_s3 + $0x350] sm:$0xff]  ;;  %v1448_v48 = vld [vmem:[%s8161_s3 + $0x288] sm:$0xff] }
  0xee   : > { %v1488_v49 = vld [vmem:[%s8161_s3 + $0x3c8] sm:$0xff] }
  0xef   : > { %v1348_v51 = vmax.f32 %v706_v50, 0.0 }
  0xf1   : > { %1759 = vmatprep.mubr.f32.mxu0 %v1348_v51  ;;  %v1432_v51 = vld [vmem:[%s8161_s3 + $0x208] sm:$0xff] }
  0xf2   : > { %1760 = vmatmul.mubr.f32.vlgmr.msra.gmra.mxu0 %v1347_v52  ;;  %v1472_v52 = vld [vmem:[%s8161_s3 + $0x348] sm:$0xff] }
  0xf3   : > { %4518 = vmatpush3.msra.mxu0 %v1446_v53 }
  0xf4   : > { %4519 = vmatprep.subr.mxu0 %v1461_v54  ;;  %v1447_v54 = vld [vmem:[%s8161_s3 + $0x280] sm:$0xff] }
  0xf5   : > { %4520 = vmatpush3.msra.mxu0 %v1445_v55  ;;  %v1487_v55 = vld [vmem:[%s8161_s3 + $0x3c0] sm:$0xff] }
  0xf6   : > { %4521 = vmatprep.subr.mxu0 %v1460_v56  ;;  %v1431_v56 = vld [vmem:[%s8161_s3 + $0x200] sm:$0xff] }
  0xf7   : > { %4522 = vmatpush3.msra.mxu0 %v1444_v57  ;;  %v1471_v57 = vld [vmem:[%s8161_s3 + $0x340] sm:$0xff] }
  0xf8   : > { %4523 = vmatprep.subr.mxu0 %v1459_v59 }
  0xf9   : > { %4524 = vmatpush3.msra.mxu0 %v1443_v61 }
  0xfa   : > { %4525 = vmatprep.subr.mxu0 %v1458_v62  ;;  %v774_v3 = vpop.f32.mrf.mxu0  ;;  %v1486_v62 = vld [vmem:[%s8161_s3 + $0x3b8] sm:$0xff] }
  0xfb   : > { %4526 = vmatpush3.msra.mxu0 %v1442_v0  ;;  %v775_v7 = vadd.f32 %v774_v3, %v544_v63  ;;  %v1526_v63 = vld [vmem:[%s8161_s3 + $0x4f8] sm:$0xff]  ;;  %v1485_v3 = vld [vmem:[%s8161_s3 + $0x3b0] sm:$0xff] }
  0xfc   : > { %4527 = vmatprep.subr.mxu0 %v1457_v1  ;;  %v776_v8 = vpop.f32.mrf.mxu0  ;;  %v1470_v0 = vld [vmem:[%s8161_s3 + $0x338] sm:$0xff] }
  0xfd   : > { %v777_v10 = vadd.f32 %v776_v8, %v548_v2  ;;  %4528 = vmatpush3.msra.mxu0 %v1441_v5  ;;  %v1349_v15 = vmax.f32 %v775_v7, 0.0  ;;  %v1510_v1 = vld [vmem:[%s8161_s3 + $0x478] sm:$0xff]  ;;  %v6223_v2 = vsub.s32 7, %v6035_v42  ;;  %v1525_v5 = vld [vmem:[%s8161_s3 + $0x4f0] sm:$0xff] }
  0xfe   : > { %4529 = vmatprep.subr.mxu0 %v1456_v6  ;;  %v916_v6 = vpop.f32.mrf.mxu1  ;;  %v1469_v7 = vld [vmem:[%s8161_s3 + $0x330] sm:$0xff] }
  0xff   : > { %v1350_v13 = vmax.f32 %v777_v10, 0.0  ;;  %4530 = vmatpush3.msra.mxu0 %v1440_v9  ;;  %v1509_v8 = vld [vmem:[%s8161_s3 + $0x470] sm:$0xff]  ;;  %v1484_v9 = vld [vmem:[%s8161_s3 + $0x3a8] sm:$0xff] }
 0x100   : > { %4531 = vmatprep.subr.mxu0 %v1455_v11  ;;  %v1524_v10 = vld [vmem:[%s8161_s3 + $0x4e8] sm:$0xff] }
 0x101   : > { %4532 = vmatpush3.msra.mxu0 %v1439_v12  ;;  %1829 = vmatprep.mubr.f32.mxu1 %v1350_v13  ;;  %v1468_v11 = vld [vmem:[%s8161_s3 + $0x328] sm:$0xff]  ;;  %v6250_v13 = vsub.s32 6, %v6035_v42  ;;  %v1467_v42 = vld [vmem:[%s8161_s3 + $0x320] sm:$0xff] }
 0x102   : > { %4533 = vmatprep.subr.mxu0 %v1454_v14  ;;  %1830 = vmatmul.mubr.f32.vlgmr.msra.gmra.mxu1 %v1349_v15  ;;  %v1508_v12 = vld [vmem:[%s8161_s3 + $0x468] sm:$0xff]  ;;  %v564_v14 = vrot.slane %v6043_v44, %v6223_v2  ;;  %v1483_v15 = vld [vmem:[%s8161_s3 + $0x3a0] sm:$0xff] }
 0x103   : > { %4534 = vmatpush3.msra.mxu0 %v1438_v16  ;;  %4553 = vmatpush3.msra.mxu1 %v1478_v18  ;;  %v1523_v16 = vld [vmem:[%s8161_s3 + $0x4e0] sm:$0xff]  ;;  %v918_v18 = vpop.f32.mrf.mxu1 }
 0x104   : > { %4535 = vmatprep.subr.mxu0 %v1453_v19  ;;  %4554 = vmatprep.subr.mxu1 %v1493_v20  ;;  %v1507_v19 = vld [vmem:[%s8161_s3 + $0x460] sm:$0xff]  ;;  %v1482_v20 = vld [vmem:[%s8161_s3 + $0x398] sm:$0xff] }
 0x105   : > { %4536 = vmatpush3.msra.mxu0 %v1437_v21  ;;  %4555 = vmatpush3.msra.mxu1 %v1477_v22  ;;  %v1522_v21 = vld [vmem:[%s8161_s3 + $0x4d8] sm:$0xff]  ;;  %v560_v22 = vrot.slane %v6043_v44, %v6250_v13  ;;  %v1465_v44 = vld [vmem:[%s8161_s3 + $0x310] sm:$0xff] }
 0x106   : > { %4537 = vmatprep.subr.mxu0 %v1452_v23  ;;  %4556 = vmatprep.subr.mxu1 %v1492_v24  ;;  %v919_v23 = vadd.f32 %v918_v18, %v564_v14  ;;  %v1466_v24 = vld [vmem:[%s8161_s3 + $0x318] sm:$0xff]  ;;  %v1512_v18 = vld [vmem:[%s8161_s3 + $0x488] sm:$0xff] }
 0x107   : > { %4538 = vmatpush3.msra.mxu0 %v1436_v26  ;;  %4557 = vmatpush3.msra.mxu1 %v1476_v27  ;;  %v1506_v26 = vld [vmem:[%s8161_s3 + $0x458] sm:$0xff]  ;;  %v1481_v27 = vld [vmem:[%s8161_s3 + $0x390] sm:$0xff] }
 0x108   : > { %4539 = vmatprep.subr.mxu0 %v1451_v28  ;;  %4558 = vmatprep.subr.mxu1 %v1491_v29  ;;  %v1521_v28 = vld [vmem:[%s8161_s3 + $0x4d0] sm:$0xff] }
 0x109   : > { %4540 = vmatpush3.msra.mxu0 %v1435_v31  ;;  %4559 = vmatpush3.msra.mxu1 %v1475_v32  ;;  %v1505_v29 = vld [vmem:[%s8161_s3 + $0x450] sm:$0xff]  ;;  %v1480_v31 = vld [vmem:[%s8161_s3 + $0x388] sm:$0xff] }
 0x10a   : > { %4541 = vmatprep.subr.mxu0 %v1450_v33  ;;  %4560 = vmatprep.subr.mxu1 %v1490_v34  ;;  %v845_v41 = vpop.f32.mrf.mxu0  ;;  %v1520_v32 = vld [vmem:[%s8161_s3 + $0x4c8] sm:$0xff]  ;;  %v917_v33 = vadd.f32 %v916_v6, %v560_v22  ;;  %v1354_v34 = vmax.f32 %v919_v23, 0.0  ;;  %v1514_v6 = vld [vmem:[%s8161_s3 + $0x498] sm:$0xff]  ;;  %v1511_v22 = vld [vmem:[%s8161_s3 + $0x480] sm:$0xff] }
 0x10b   : > { %v846_v47 = vadd.f32 %v845_v41, %v552_v35  ;;  %4542 = vmatpush3.msra.mxu0 %v1434_v36  ;;  %4561 = vmatpush3.msra.mxu1 %v1474_v37  ;;  %v1464_v35 = vld [vmem:[%s8161_s3 + $0x308] sm:$0xff]  ;;  %v1479_v37 = vld [vmem:[%s8161_s3 + $0x380] sm:$0xff] }
 0x10c   : > { %4543 = vmatprep.subr.mxu0 %v1449_v38  ;;  %4562 = vmatprep.subr.mxu1 %v1489_v39  ;;  %v847_v50 = vpop.f32.mrf.mxu0  ;;  %v1504_v36 = vld [vmem:[%s8161_s3 + $0x448] sm:$0xff]  ;;  %v1519_v38 = vld [vmem:[%s8161_s3 + $0x4c0] sm:$0xff]  ;;  %v1353_v41 = vmax.f32 %v917_v33, 0.0  ;;  %v1589_v33 = vld [vmem:[%s8161_s3 + $0x6f0] sm:$0xff] }
 0x10d   : > { %v848_v53 = vadd.f32 %v847_v50, %v556_v40  ;;  %4544 = vmatpush3.msra.mxu0 %v1433_v17  ;;  %4563 = vmatpush3.msra.mxu1 %v1473_v46  ;;  %v1351_v59 = vmax.f32 %v846_v47, 0.0  ;;  %v1463_v39 = vld [vmem:[%s8161_s3 + $0x300] sm:$0xff]  ;;  %v1518_v17 = vld [vmem:[%s8161_s3 + $0x4b8] sm:$0xff]  ;;  %v1557_v50 = vld [vmem:[%s8161_s3 + $0x5f0] sm:$0xff] }
 0x10e   : > { %4545 = vmatprep.subr.mxu0 %v1448_v48  ;;  %4564 = vmatprep.subr.mxu1 %v1488_v49  ;;  %v1503_v40 = vld [vmem:[%s8161_s3 + $0x440] sm:$0xff]  ;;  %v1558_v46 = vld [vmem:[%s8161_s3 + $0x5f8] sm:$0xff]  ;;  %v1517_v49 = vld [vmem:[%s8161_s3 + $0x4b0] sm:$0xff] }
 0x10f   : > { %v1352_v61 = vmax.f32 %v848_v53, 0.0  ;;  %4546 = vmatpush3.msra.mxu0 %v1432_v51  ;;  %4565 = vmatpush3.msra.mxu1 %v1472_v52  ;;  %v1502_v47 = vld [vmem:[%s8161_s3 + $0x438] sm:$0xff]  ;;  %v1501_v51 = vld [vmem:[%s8161_s3 + $0x430] sm:$0xff]  ;;  %v6343_v53 = vld [vmem:[%s8160_s2 + $0x8] sm:$0xff] }
 0x110   : > { %4547 = vmatprep.subr.mxu0 %v1447_v54  ;;  %4566 = vmatprep.subr.mxu1 %v1487_v55  ;;  %v1542_v48 = vld [vmem:[%s8161_s3 + $0x578] sm:$0xff]  ;;  %v1541_v52 = vld [vmem:[%s8161_s3 + $0x570] sm:$0xff]  ;;  %v1516_v55 = vld [vmem:[%s8161_s3 + $0x4a8] sm:$0xff] }
 0x111   : > { %4548 = vmatpush3.msra.mxu0 %v1431_v56  ;;  %4567 = vmatpush3.msra.mxu1 %v1471_v57  ;;  %v1556_v56 = vld [vmem:[%s8161_s3 + $0x5e8] sm:$0xff]  ;;  %v1551_v23 = vld [vmem:[%s8161_s3 + $0x5c0] sm:$0xff] }
 0x112   : > { %1899 = vmatprep.mubr.f32.mxu0 %v1352_v61  ;;  %4568 = vmatprep.subr.mxu1 %v1486_v62  ;;  %v1500_v57 = vld [vmem:[%s8161_s3 + $0x428] sm:$0xff]  ;;  %v1515_v61 = vld [vmem:[%s8161_s3 + $0x4a0] sm:$0xff] }
 0x113   : > { %4587 = vmatprep.subr.mxu0 %v1526_v63  ;;  %1900 = vmatmul.mubr.f32.vlgmr.msra.gmra.mxu0 %v1351_v59  ;;  %v1540_v59 = vld [vmem:[%s8161_s3 + $0x568] sm:$0xff]  ;;  %v1555_v62 = vld [vmem:[%s8161_s3 + $0x5e0] sm:$0xff]  ;;  %v572_v63 = vrot.slane %v6343_v53, %v6046_v45 }
 0x114   : > { %4569 = vmatpush3.msra.mxu1 %v1470_v0  ;;  %4588 = vmatpush3.msra.mxu0 %v1510_v1  ;;  %v1499_v0 = vld [vmem:[%s8161_s3 + $0x420] sm:$0xff] }
 0x115   : > { %4570 = vmatprep.subr.mxu1 %v1485_v3  ;;  %4589 = vmatprep.subr.mxu0 %v1525_v5  ;;  %v1539_v1 = vld [vmem:[%s8161_s3 + $0x560] sm:$0xff]  ;;  %v568_v3 = vrot.slane %v6343_v53, %v6038_v43 }
 0x116   : > { %4571 = vmatpush3.msra.mxu1 %v1469_v7  ;;  %4590 = vmatpush3.msra.mxu0 %v1509_v8  ;;  %v1554_v7 = vld [vmem:[%s8161_s3 + $0x5d8] sm:$0xff] }
 0x117   : > { %4572 = vmatprep.subr.mxu1 %v1484_v9  ;;  %4591 = vmatprep.subr.mxu0 %v1524_v10  ;;  %v1498_v8 = vld [vmem:[%s8161_s3 + $0x418] sm:$0xff] }
 0x118   : > { %4573 = vmatpush3.msra.mxu1 %v1468_v11  ;;  %4592 = vmatpush3.msra.mxu0 %v1508_v12  ;;  %v1538_v9 = vld [vmem:[%s8161_s3 + $0x558] sm:$0xff]  ;;  %v1513_v11 = vld [vmem:[%s8161_s3 + $0x490] sm:$0xff] }
 0x119   : > { %4574 = vmatprep.subr.mxu1 %v1483_v15  ;;  %4593 = vmatprep.subr.mxu0 %v1523_v16  ;;  %v1553_v12 = vld [vmem:[%s8161_s3 + $0x5d0] sm:$0xff] }
 0x11a   : > { %4575 = vmatpush3.msra.mxu1 %v1467_v42  ;;  %4594 = vmatpush3.msra.mxu0 %v1507_v19  ;;  %v987_v54 = vpop.f32.mrf.mxu0  ;;  %v1497_v15 = vld [vmem:[%s8161_s3 + $0x410] sm:$0xff]  ;;  %v1552_v42 = vld [vmem:[%s8161_s3 + $0x5c8] sm:$0xff] }
 0x11b   : > { %4576 = vmatprep.subr.mxu1 %v1482_v20  ;;  %4595 = vmatprep.subr.mxu0 %v1522_v21  ;;  %v988_v14 = vadd.f32 %v987_v54, %v568_v3  ;;  %v1537_v16 = vld [vmem:[%s8161_s3 + $0x550] sm:$0xff]  ;;  %v1496_v19 = vld [vmem:[%s8161_s3 + $0x408] sm:$0xff] }
 0x11c   : > { %4577 = vmatpush3.msra.mxu1 %v1466_v24  ;;  %4596 = vmatpush3.msra.mxu0 %v1506_v26  ;;  %v989_v5 = vpop.f32.mrf.mxu0  ;;  %v1536_v20 = vld [vmem:[%s8161_s3 + $0x548] sm:$0xff]  ;;  %v1495_v26 = vld [vmem:[%s8161_s3 + $0x400] sm:$0xff] }
 0x11d   : > { %4578 = vmatprep.subr.mxu1 %v1481_v27  ;;  %4597 = vmatprep.subr.mxu0 %v1521_v28  ;;  %v990_v10 = vadd.f32 %v989_v5, %v572_v63  ;;  %v1355_v24 = vmax.f32 %v988_v14, 0.0  ;;  %v1535_v27 = vld [vmem:[%s8161_s3 + $0x540] sm:$0xff]  ;;  %v1550_v28 = vld [vmem:[%s8161_s3 + $0x5b8] sm:$0xff]  ;;  %v1544_v63 = vld [vmem:[%s8161_s3 + $0x588] sm:$0xff] }
 0x11e   : > { %4579 = vmatpush3.msra.mxu1 %v1465_v44  ;;  %4598 = vmatpush3.msra.mxu0 %v1505_v29  ;;  %v1590_v44 = vld [vmem:[%s8161_s3 + $0x6f8] sm:$0xff]  ;;  %v1528_v5 = vld [vmem:[%s8161_s3 + $0x508] sm:$0xff] }
 0x11f   : > { %4580 = vmatprep.subr.mxu1 %v1480_v31  ;;  %4599 = vmatprep.subr.mxu0 %v1520_v32  ;;  %v1356_v21 = vmax.f32 %v990_v10, 0.0  ;;  %v1534_v29 = vld [vmem:[%s8161_s3 + $0x538] sm:$0xff]  ;;  %v1549_v32 = vld [vmem:[%s8161_s3 + $0x5b0] sm:$0xff]  ;;  %v1567_v10 = vld [vmem:[%s8161_s3 + $0x640] sm:$0xff] }
 0x120   : > { %4581 = vmatpush3.msra.mxu1 %v1464_v35  ;;  %4600 = vmatpush3.msra.mxu0 %v1504_v36  ;;  %v1574_v31 = vld [vmem:[%s8161_s3 + $0x678] sm:$0xff]  ;;  %v1533_v35 = vld [vmem:[%s8161_s3 + $0x530] sm:$0xff] }
 0x121   : > { %4582 = vmatprep.subr.mxu1 %v1479_v37  ;;  %1969 = vmatprep.mubr.f32.mxu1 %v1354_v34  ;;  %v1058_v34 = vpop.f32.mrf.mxu1  ;;  %v1573_v36 = vld [vmem:[%s8161_s3 + $0x670] sm:$0xff]  ;;  %v1548_v37 = vld [vmem:[%s8161_s3 + $0x5a8] sm:$0xff]  ;;  %v1622_v14 = vld [vmem:[%s8161_s3 + $0x7f8] sm:$0xff] }
 0x122   : > { %4601 = vmatprep.subr.mxu0 %v1519_v38  ;;  %4583 = vmatpush3.msra.mxu1 %v1463_v39  ;;  %v1588_v38 = vld [vmem:[%s8161_s3 + $0x6e8] sm:$0xff] }
 0x123   : > { %4602 = vmatpush3.msra.mxu0 %v1503_v40  ;;  %1970 = vmatmul.mubr.f32.vlgmr.msra.gmra.mxu1 %v1353_v41  ;;  %v1532_v39 = vld [vmem:[%s8161_s3 + $0x528] sm:$0xff]  ;;  %v580_v41 = vrot.slane %v6343_v53, %v6074_v60 }
 0x124   : > { %4603 = vmatprep.subr.mxu0 %v1518_v17  ;;  %4622 = vmatprep.subr.mxu1 %v1558_v46  ;;  %v1572_v40 = vld [vmem:[%s8161_s3 + $0x668] sm:$0xff]  ;;  %v1547_v17 = vld [vmem:[%s8161_s3 + $0x5a0] sm:$0xff] }
 0x125   : > { %4604 = vmatpush3.msra.mxu0 %v1502_v47  ;;  %4623 = vmatpush3.msra.mxu1 %v1542_v48  ;;  %v1587_v46 = vld [vmem:[%s8161_s3 + $0x6e0] sm:$0xff]  ;;  %v1060_v47 = vpop.f32.mrf.mxu1 }
 0x126   : > { %4605 = vmatprep.subr.mxu0 %v1517_v49  ;;  %4624 = vmatprep.subr.mxu1 %v1557_v50  ;;  %v1531_v48 = vld [vmem:[%s8161_s3 + $0x520] sm:$0xff]  ;;  %v1546_v50 = vld [vmem:[%s8161_s3 + $0x598] sm:$0xff]  ;;  %v1061_v54 = vadd.f32 %v1060_v47, %v580_v41  ;;  %v1576_v47 = vld [vmem:[%s8161_s3 + $0x688] sm:$0xff] }
 0x127   : > { %4606 = vmatpush3.msra.mxu0 %v1501_v51  ;;  %4625 = vmatpush3.msra.mxu1 %v1541_v52  ;;  %v1571_v49 = vld [vmem:[%s8161_s3 + $0x660] sm:$0xff]  ;;  %v1586_v51 = vld [vmem:[%s8161_s3 + $0x6d8] sm:$0xff]  ;;  %v576_v52 = vrot.slane %v6343_v53, %v6068_v58 }
 0x128   : > { %4607 = vmatprep.subr.mxu0 %v1516_v55  ;;  %4626 = vmatprep.subr.mxu1 %v1556_v56  ;;  %v1530_v55 = vld [vmem:[%s8161_s3 + $0x518] sm:$0xff]  ;;  %v1358_v3 = vmax.f32 %v1061_v54, 0.0  ;;  %v1615_v54 = vld [vmem:[%s8161_s3 + $0x7c0] sm:$0xff] }
 0x129   : > { %4608 = vmatpush3.msra.mxu0 %v1500_v57  ;;  %4627 = vmatpush3.msra.mxu1 %v1540_v59  ;;  %v1570_v56 = vld [vmem:[%s8161_s3 + $0x658] sm:$0xff]  ;;  %v1545_v57 = vld [vmem:[%s8161_s3 + $0x590] sm:$0xff] }
 0x12a   : > { %4609 = vmatprep.subr.mxu0 %v1515_v61  ;;  %4628 = vmatprep.subr.mxu1 %v1555_v62  ;;  %v1585_v59 = vld [vmem:[%s8161_s3 + $0x6d0] sm:$0xff] }
 0x12b   : > { %4610 = vmatpush3.msra.mxu0 %v1499_v0  ;;  %4629 = vmatpush3.msra.mxu1 %v1539_v1  ;;  %v1529_v61 = vld [vmem:[%s8161_s3 + $0x510] sm:$0xff]  ;;  %v1584_v0 = vld [vmem:[%s8161_s3 + $0x6c8] sm:$0xff]  ;;  %v1059_v1 = vadd.f32 %v1058_v34, %v576_v52  ;;  %v1578_v34 = vld [vmem:[%s8161_s3 + $0x698] sm:$0xff] }
 0x12c   : > { %4611 = vmatprep.subr.mxu0 %v1514_v6  ;;  %4630 = vmatprep.subr.mxu1 %v1554_v7  ;;  %v1569_v62 = vld [vmem:[%s8161_s3 + $0x650] sm:$0xff]  ;;  %v1568_v6 = vld [vmem:[%s8161_s3 + $0x648] sm:$0xff]  ;;  %v1543_v7 = vld [vmem:[%s8161_s3 + $0x580] sm:$0xff] }
 0x12d   : > { %4612 = vmatpush3.msra.mxu0 %v1498_v8  ;;  %4631 = vmatpush3.msra.mxu1 %v1538_v9  ;;  %v1583_v8 = vld [vmem:[%s8161_s3 + $0x6c0] sm:$0xff] }
 0x12e   : > { %4613 = vmatprep.subr.mxu0 %v1513_v11  ;;  %4632 = vmatprep.subr.mxu1 %v1553_v12  ;;  %v1527_v9 = vld [vmem:[%s8161_s3 + $0x500] sm:$0xff]  ;;  %v1357_v11 = vmax.f32 %v1059_v1, 0.0  ;;  %v1582_v12 = vld [vmem:[%s8161_s3 + $0x6b8] sm:$0xff]  ;;  %v1653_v1 = vld [vmem:[%s8161_s3 + $0x8f0] sm:$0xff] }
 0x12f   : > { %4614 = vmatpush3.msra.mxu0 %v1497_v15  ;;  %4633 = vmatpush3.msra.mxu1 %v1537_v16  ;;  %v1566_v15 = vld [vmem:[%s8161_s3 + $0x638] sm:$0xff]  ;;  %v1575_v52 = vld [vmem:[%s8161_s3 + $0x680] sm:$0xff] }
 0x130   : > { %4615 = vmatprep.subr.mxu0 %v1512_v18  ;;  %4634 = vmatprep.subr.mxu1 %v1552_v42  ;;  %v1606_v16 = vld [vmem:[%s8161_s3 + $0x778] sm:$0xff]  ;;  %v1581_v18 = vld [vmem:[%s8161_s3 + $0x6b0] sm:$0xff] }
 0x131   : > { %4616 = vmatpush3.msra.mxu0 %v1496_v19  ;;  %4635 = vmatpush3.msra.mxu1 %v1536_v20  ;;  %v1621_v42 = vld [vmem:[%s8161_s3 + $0x7f0] sm:$0xff] }
 0x132   : > { %4617 = vmatprep.subr.mxu0 %v1511_v22  ;;  %4636 = vmatprep.subr.mxu1 %v1551_v23  ;;  %v1565_v19 = vld [vmem:[%s8161_s3 + $0x630] sm:$0xff]  ;;  %v1580_v22 = vld [vmem:[%s8161_s3 + $0x6a8] sm:$0xff] }
 0x133   : > { %4618 = vmatpush3.msra.mxu0 %v1495_v26  ;;  %2039 = vmatprep.mubr.f32.mxu0 %v1356_v21  ;;  %v1605_v20 = vld [vmem:[%s8161_s3 + $0x770] sm:$0xff]  ;;  %v1129_v21 = vpop.f32.mrf.mxu0  ;;  %v1620_v23 = vld [vmem:[%s8161_s3 + $0x7e8] sm:$0xff] }
 0x134   : > { %4637 = vmatpush3.msra.mxu1 %v1535_v27  ;;  %2040 = vmatmul.mubr.f32.vlgmr.msra.gmra.mxu0 %v1355_v24  ;;  %v1564_v24 = vld [vmem:[%s8161_s3 + $0x628] sm:$0xff]  ;;  %v1579_v27 = vld [vmem:[%s8161_s3 + $0x6a0] sm:$0xff] }
 0x135   : > { %4638 = vmatprep.subr.mxu1 %v1550_v28  ;;  %4657 = vmatprep.subr.mxu0 %v1590_v44  ;;  %v1604_v26 = vld [vmem:[%s8161_s3 + $0x768] sm:$0xff]  ;;  %v1619_v28 = vld [vmem:[%s8161_s3 + $0x7e0] sm:$0xff]  ;;  %v588_v44 = vrot.slane %v6343_v53, %v6150_v30 }
 0x136   : > { %4639 = vmatpush3.msra.mxu1 %v1534_v29  ;;  %4658 = vmatpush3.msra.mxu0 %v1574_v31  ;;  %v1563_v29 = vld [vmem:[%s8161_s3 + $0x620] sm:$0xff] }
 0x137   : > { %4640 = vmatprep.subr.mxu1 %v1549_v32  ;;  %4659 = vmatprep.subr.mxu0 %v1589_v33  ;;  %v1603_v31 = vld [vmem:[%s8161_s3 + $0x760] sm:$0xff]  ;;  %v584_v32 = vrot.slane %v6343_v53, %v6135_v25  ;;  %v1131_v33 = vpop.f32.mrf.mxu0 }
 0x138   : > { %4641 = vmatpush3.msra.mxu1 %v1533_v35  ;;  %4660 = vmatpush3.msra.mxu0 %v1573_v36  ;;  %v1618_v35 = vld [vmem:[%s8161_s3 + $0x7d8] sm:$0xff] }
 0x139   : > { %4642 = vmatprep.subr.mxu1 %v1548_v37  ;;  %4661 = vmatprep.subr.mxu0 %v1588_v38  ;;  %v1562_v36 = vld [vmem:[%s8161_s3 + $0x618] sm:$0xff]  ;;  %v1132_v38 = vadd.f32 %v1131_v33, %v588_v44  ;;  %v1130_v41 = vadd.f32 %v1129_v21, %v584_v32  ;;  %v1648_v44 = vld [vmem:[%s8161_s3 + $0x8c8] sm:$0xff] }
 0x13a   : > { %4643 = vmatpush3.msra.mxu1 %v1532_v39  ;;  %4662 = vmatpush3.msra.mxu0 %v1572_v40  ;;  %v1602_v37 = vld [vmem:[%s8161_s3 + $0x758] sm:$0xff]  ;;  %v1577_v39 = vld [vmem:[%s8161_s3 + $0x690] sm:$0xff]  ;;  %v1592_v32 = vld [vmem:[%s8161_s3 + $0x708] sm:$0xff] }
 0x13b   : > { %4644 = vmatprep.subr.mxu1 %v1547_v17  ;;  %4663 = vmatprep.subr.mxu0 %v1587_v46  ;;  %v1617_v40 = vld [vmem:[%s8161_s3 + $0x7d0] sm:$0xff]  ;;  %v1632_v33 = vld [vmem:[%s8161_s3 + $0x848] sm:$0xff] }
 0x13c   : > { %4645 = vmatpush3.msra.mxu1 %v1531_v48  ;;  %4664 = vmatpush3.msra.mxu0 %v1571_v49  ;;  %v1561_v17 = vld [vmem:[%s8161_s3 + $0x610] sm:$0xff]  ;;  %v1616_v48 = vld [vmem:[%s8161_s3 + $0x7c8] sm:$0xff] }
 0x13d   : > { %4646 = vmatprep.subr.mxu1 %v1546_v50  ;;  %4665 = vmatprep.subr.mxu0 %v1586_v51  ;;  %v1601_v46 = vld [vmem:[%s8161_s3 + $0x750] sm:$0xff]  ;;  %v1560_v49 = vld [vmem:[%s8161_s3 + $0x608] sm:$0xff]  ;;  %v1360_v51 = vmax.f32 %v1132_v38, 0.0 }
 0x13e   : > { %4647 = vmatpush3.msra.mxu1 %v1530_v55  ;;  %4666 = vmatpush3.msra.mxu0 %v1570_v56  ;;  %v1600_v50 = vld [vmem:[%s8161_s3 + $0x748] sm:$0xff]  ;;  %v1359_v55 = vmax.f32 %v1130_v41, 0.0  ;;  %v1559_v56 = vld [vmem:[%s8161_s3 + $0x600] sm:$0xff]  ;;  %v1670_v41 = vld [vmem:[%s8161_s3 + $0x978] sm:$0xff] }
 0x13f   : > { %4648 = vmatprep.subr.mxu1 %v1545_v57  ;;  %4667 = vmatprep.subr.mxu0 %v1585_v59  ;;  %v1599_v57 = vld [vmem:[%s8161_s3 + $0x740] sm:$0xff]  ;;  %v1614_v59 = vld [vmem:[%s8161_s3 + $0x7b8] sm:$0xff] }
 0x140   : > { %4649 = vmatpush3.msra.mxu1 %v1529_v61  ;;  %4668 = vmatpush3.msra.mxu0 %v1569_v62  ;;  %v1654_v61 = vld [vmem:[%s8161_s3 + $0x8f8] sm:$0xff] }
 0x141   : > { %4650 = vmatprep.subr.mxu1 %v1544_v63  ;;  %4669 = vmatprep.subr.mxu0 %v1584_v0  ;;  %v1598_v62 = vld [vmem:[%s8161_s3 + $0x738] sm:$0xff]  ;;  %v1613_v0 = vld [vmem:[%s8161_s3 + $0x7b0] sm:$0xff] }
 0x142   : > { %4651 = vmatpush3.msra.mxu1 %v1528_v5  ;;  %4670 = vmatpush3.msra.mxu0 %v1568_v6  ;;  %v1638_v63 = vld [vmem:[%s8161_s3 + $0x878] sm:$0xff]  ;;  %v1597_v5 = vld [vmem:[%s8161_s3 + $0x730] sm:$0xff] }
 0x143   : > { %4652 = vmatprep.subr.mxu1 %v1543_v7  ;;  %2109 = vmatprep.mubr.f32.mxu1 %v1358_v3  ;;  %v1200_v3 = vpop.f32.mrf.mxu1  ;;  %v1637_v6 = vld [vmem:[%s8161_s3 + $0x870] sm:$0xff]  ;;  %v1612_v7 = vld [vmem:[%s8161_s3 + $0x7a8] sm:$0xff] }
 0x144   : > { %4671 = vmatprep.subr.mxu0 %v1583_v8  ;;  %4653 = vmatpush3.msra.mxu1 %v1527_v9  ;;  %v1652_v8 = vld [vmem:[%s8161_s3 + $0x8e8] sm:$0xff] }
 0x145   : > { %4672 = vmatpush3.msra.mxu0 %v1567_v10  ;;  %2110 = vmatmul.mubr.f32.vlgmr.msra.gmra.mxu1 %v1357_v11  ;;  %v1596_v9 = vld [vmem:[%s8161_s3 + $0x728] sm:$0xff]  ;;  %v596_v11 = vrot.slane %v6343_v53, %v6223_v2 }
 0x146   : > { %4673 = vmatprep.subr.mxu0 %v1582_v12  ;;  %4692 = vmatprep.subr.mxu1 %v1622_v14  ;;  %v1636_v10 = vld [vmem:[%s8161_s3 + $0x868] sm:$0xff]  ;;  %v1611_v12 = vld [vmem:[%s8161_s3 + $0x7a0] sm:$0xff] }
 0x147   : > { %4674 = vmatpush3.msra.mxu0 %v1566_v15  ;;  %4693 = vmatpush3.msra.mxu1 %v1606_v16  ;;  %v1651_v14 = vld [vmem:[%s8161_s3 + $0x8e0] sm:$0xff]  ;;  %v1202_v15 = vpop.f32.mrf.mxu1 }
 0x148   : > { %4675 = vmatprep.subr.mxu0 %v1581_v18  ;;  %4694 = vmatprep.subr.mxu1 %v1621_v42  ;;  %v1595_v16 = vld [vmem:[%s8161_s3 + $0x720] sm:$0xff]  ;;  %v1610_v42 = vld [vmem:[%s8161_s3 + $0x798] sm:$0xff]  ;;  %v1203_v21 = vadd.f32 %v1202_v15, %v596_v11  ;;  %v1640_v11 = vld [vmem:[%s8161_s3 + $0x888] sm:$0xff] }
 0x149   : > { %4676 = vmatpush3.msra.mxu0 %v1565_v19  ;;  %4695 = vmatpush3.msra.mxu1 %v1605_v20  ;;  %v1635_v18 = vld [vmem:[%s8161_s3 + $0x860] sm:$0xff]  ;;  %v1650_v19 = vld [vmem:[%s8161_s3 + $0x8d8] sm:$0xff]  ;;  %v592_v20 = vrot.slane %v6343_v53, %v6250_v13  ;;  %v1593_v53 = vld [vmem:[%s8161_s3 + $0x710] sm:$0xff] }
 0x14a   : > { %4677 = vmatprep.subr.mxu0 %v1580_v22  ;;  %4696 = vmatprep.subr.mxu1 %v1620_v23  ;;  %v1594_v22 = vld [vmem:[%s8161_s3 + $0x718] sm:$0xff]  ;;  %v1664_v15 = vld [vmem:[%s8161_s3 + $0x948] sm:$0xff] }
 0x14b   : > { %4678 = vmatpush3.msra.mxu0 %v1564_v24  ;;  %4697 = vmatpush3.msra.mxu1 %v1604_v26  ;;  %v1634_v23 = vld [vmem:[%s8161_s3 + $0x858] sm:$0xff]  ;;  %v1609_v24 = vld [vmem:[%s8161_s3 + $0x790] sm:$0xff] }
 0x14c   : > { %4679 = vmatprep.subr.mxu0 %v1579_v27  ;;  %4698 = vmatprep.subr.mxu1 %v1619_v28  ;;  %v1649_v26 = vld [vmem:[%s8161_s3 + $0x8d0] sm:$0xff]  ;;  %v1608_v28 = vld [vmem:[%s8161_s3 + $0x788] sm:$0xff] }
 0x14d   : > { %4680 = vmatpush3.msra.mxu0 %v1563_v29  ;;  %4699 = vmatpush3.msra.mxu1 %v1603_v31  ;;  %v1633_v27 = vld [vmem:[%s8161_s3 + $0x850] sm:$0xff]  ;;  %v1201_v29 = vadd.f32 %v1200_v3, %v592_v20  ;;  %v1362_v31 = vmax.f32 %v1203_v21, 0.0  ;;  %v1666_v3 = vld [vmem:[%s8161_s3 + $0x958] sm:$0xff]  ;;  %v1663_v20 = vld [vmem:[%s8161_s3 + $0x940] sm:$0xff] }
 0x14e   : > { %4681 = vmatprep.subr.mxu0 %v1578_v34  ;;  %4700 = vmatprep.subr.mxu1 %v1618_v35  ;;  %v1607_v34 = vld [vmem:[%s8161_s3 + $0x780] sm:$0xff] }
 0x14f   : > { %4682 = vmatpush3.msra.mxu0 %v1562_v36  ;;  %4701 = vmatpush3.msra.mxu1 %v1602_v37  ;;  %v1647_v35 = vld [vmem:[%s8161_s3 + $0x8c0] sm:$0xff]  ;;  %v1361_v38 = vmax.f32 %v1201_v29, 0.0 }
 0x150   : > { %4683 = vmatprep.subr.mxu0 %v1577_v39  ;;  %4702 = vmatprep.subr.mxu1 %v1617_v40  ;;  %v1591_v36 = vld [vmem:[%s8161_s3 + $0x700] sm:$0xff]  ;;  %v1646_v39 = vld [vmem:[%s8161_s3 + $0x8b8] sm:$0xff] }
 0x151   : > { %4684 = vmatpush3.msra.mxu0 %v1561_v17  ;;  %4703 = vmatpush3.msra.mxu1 %v1601_v46  ;;  %v1631_v37 = vld [vmem:[%s8161_s3 + $0x840] sm:$0xff]  ;;  %v1630_v40 = vld [vmem:[%s8161_s3 + $0x838] sm:$0xff]  ;;  %v1645_v17 = vld [vmem:[%s8161_s3 + $0x8b0] sm:$0xff] }
 0x152   : > { %4685 = vmatprep.subr.mxu0 %v1576_v47  ;;  %4704 = vmatprep.subr.mxu1 %v1616_v48  ;;  %v1629_v46 = vld [vmem:[%s8161_s3 + $0x830] sm:$0xff]  ;;  %v1679_v29 = vld [vmem:[%s8161_s3 + $0x9c0] sm:$0xf] }
 0x153   : > { %4686 = vmatpush3.msra.mxu0 %v1560_v49  ;;  %4705 = vmatpush3.msra.mxu1 %v1600_v50  ;;  %v1669_v47 = vld [vmem:[%s8161_s3 + $0x970] sm:$0xff]  ;;  %v1271_v49 = vpop.f32.mrf.mxu0  ;;  %v1644_v50 = vld [vmem:[%s8161_s3 + $0x8a8] sm:$0xff] }
 0x154   : > { %4687 = vmatprep.subr.mxu0 %v1575_v52  ;;  %4706 = vmatprep.subr.mxu1 %v1615_v54  ;;  %v6743_v48 = vld [vmem:[%s8160_s2 + $0x10] sm:$0xf]  ;;  %v1668_v52 = vld [vmem:[%s8161_s3 + $0x968] sm:$0xff]  ;;  %v6755_v54 = vpop.f32.mrf.mxu1 }
 0x155   : > { %4688 = vmatpush3.msra.mxu0 %v1559_v56  ;;  %2179 = vmatprep.mubr.f32.mxu0 %v1360_v51  ;;  %v1628_v51 = vld [vmem:[%s8161_s3 + $0x828] sm:$0xff]  ;;  %v604_v56 = vrot.slane %v6743_v48, %v6046_v45 }
 0x156   : > { %4707 = vmatpush3.msra.mxu1 %v1599_v57  ;;  %2180 = vmatmul.mubr.f32.vlgmr.msra.gmra.mxu0 %v1359_v55  ;;  %v1643_v55 = vld [vmem:[%s8161_s3 + $0x8a0] sm:$0xff] }
 0x157   : > { %4708 = vmatprep.subr.mxu1 %v1614_v59  ;;  %4727 = vmatprep.subr.mxu0 %v1654_v61  ;;  %v1627_v57 = vld [vmem:[%s8161_s3 + $0x820] sm:$0xff]  ;;  %v600_v61 = vrot.slane %v6743_v48, %v6038_v43 }
 0x158   : > { %4709 = vmatpush3.msra.mxu1 %v1598_v62  ;;  %4728 = vmatpush3.msra.mxu0 %v1638_v63  ;;  %v1667_v59 = vld [vmem:[%s8161_s3 + $0x960] sm:$0xff]  ;;  %v1273_v62 = vpop.f32.mrf.mxu0  ;;  %v1642_v63 = vld [vmem:[%s8161_s3 + $0x898] sm:$0xff] }
 0x159   : > { %4710 = vmatprep.subr.mxu1 %v1613_v0  ;;  %4729 = vmatprep.subr.mxu0 %v1653_v1  ;;  %v612_v0 = vrot.slane %v6743_v48, %v6074_v60  ;;  %v1626_v1 = vld [vmem:[%s8161_s3 + $0x818] sm:$0xff] }
 0x15a   : > { %4711 = vmatpush3.msra.mxu1 %v1597_v5  ;;  %4730 = vmatpush3.msra.mxu0 %v1637_v6  ;;  %v1344_v5 = vpop.f32.mrf.mxu1  ;;  %v1274_v6 = vadd.f32 %v1273_v62, %v604_v56 }
 0x15b   : > { %4712 = vmatprep.subr.mxu1 %v1612_v7  ;;  %4731 = vmatprep.subr.mxu0 %v1652_v8  ;;  %v1641_v7 = vld [vmem:[%s8161_s3 + $0x890] sm:$0xff]  ;;  %v1272_v8 = vadd.f32 %v1271_v49, %v600_v61  ;;  %v2401_v49 = vld [vmem:[%s8163_s5 + $0x18] sm:$0xff] }
 0x15c   : > { %4713 = vmatpush3.msra.mxu1 %v1596_v9  ;;  %4732 = vmatpush3.msra.mxu0 %v1636_v10  ;;  %v1625_v9 = vld [vmem:[%s8161_s3 + $0x810] sm:$0xff] }
 0x15d   : > { %4714 = vmatprep.subr.mxu1 %v1611_v12  ;;  %4733 = vmatprep.subr.mxu0 %v1651_v14  ;;  %v1665_v10 = vld [vmem:[%s8161_s3 + $0x950] sm:$0xff]  ;;  %v1345_v12 = vadd.f32 %v1344_v5, %v612_v0  ;;  %v1624_v14 = vld [vmem:[%s8161_s3 + $0x808] sm:$0xff] }
 0x15e   : > { %4715 = vmatpush3.msra.mxu1 %v1595_v16  ;;  %4734 = vmatpush3.msra.mxu0 %v1635_v18  ;;  %v1364_v16 = vmax.f32 %v1274_v6, 0.0  ;;  %v1639_v18 = vld [vmem:[%s8161_s3 + $0x880] sm:$0xff] }
 0x15f   : > { %4716 = vmatprep.subr.mxu1 %v1610_v42  ;;  %4735 = vmatprep.subr.mxu0 %v1650_v19  ;;  %v1363_v42 = vmax.f32 %v1272_v8, 0.0  ;;  %v1623_v19 = vld [vmem:[%s8161_s3 + $0x800] sm:$0xff]  ;;  %v1366_v21 = vmax.f32 %v1345_v12, 0.0 }
 0x160   : > { %4717 = vmatpush3.msra.mxu1 %v1594_v22  ;;  %4736 = vmatpush3.msra.mxu0 %v1634_v23  ;;  %v1662_v22 = vld [vmem:[%s8161_s3 + $0x938] sm:$0xff]  ;;  %v1661_v23 = vld [vmem:[%s8161_s3 + $0x930] sm:$0xff]  ;;  %v4425_v6 = vld [vmem:[%s8162_s4] ss:$0 sm:$0xff] }
 0x161   : > { %4718 = vmatprep.subr.mxu1 %v1609_v24  ;;  %4737 = vmatprep.subr.mxu0 %v1649_v26  ;;  %v1660_v24 = vld [vmem:[%s8161_s3 + $0x928] sm:$0xff]  ;;  %v1659_v26 = vld [vmem:[%s8161_s3 + $0x920] sm:$0xff] }
 0x162   : > { %4719 = vmatpush3.msra.mxu1 %v1593_v53  ;;  %4738 = vmatpush3.msra.mxu0 %v1633_v27  ;;  %v1658_v53 = vld [vmem:[%s8161_s3 + $0x918] sm:$0xff]  ;;  %v1657_v27 = vld [vmem:[%s8161_s3 + $0x910] sm:$0xff] }
 0x163   : > { %4720 = vmatprep.subr.mxu1 %v1608_v28  ;;  %4739 = vmatprep.subr.mxu0 %v1648_v44  ;;  %v1656_v28 = vld [vmem:[%s8161_s3 + $0x908] sm:$0xff]  ;;  %v1655_v44 = vld [vmem:[%s8161_s3 + $0x900] sm:$0xff] }
 0x164   : > { %4721 = vmatpush3.msra.mxu1 %v1592_v32  ;;  %4740 = vmatpush3.msra.mxu0 %v1632_v33  ;;  %v1677_v32 = vld [vmem:[%s8161_s3 + $0x9b0] sm:$0xff]  ;;  %v1676_v33 = vld [vmem:[%s8161_s3 + $0x9a8] sm:$0xff] }
 0x165   : > { %4722 = vmatprep.subr.mxu1 %v1607_v34  ;;  %2249 = vmatprep.mubr.f32.mxu1 %v1362_v31  ;;  %v1678_v31 = vld [vmem:[%s8161_s3 + $0x9b8] sm:$0xff]  ;;  %v1675_v34 = vld [vmem:[%s8161_s3 + $0x9a0] sm:$0xff] }
 0x166   : > { %4741 = vmatprep.subr.mxu0 %v1647_v35  ;;  %4723 = vmatpush3.msra.mxu1 %v1591_v36  ;;  %v608_v35 = vrot.slane %v6743_v48, %v6068_v58  ;;  %v1674_v36 = vld [vmem:[%s8161_s3 + $0x998] sm:$0xff]  ;;  %v2418_v48 = vld [vmem:[%s8163_s5 + $0xa0] sm:$0xff] }
 0x167   : > { %4742 = vmatpush3.msra.mxu0 %v1631_v37  ;;  %2250 = vmatmul.mubr.f32.vlgmr.msra.gmra.mxu1 %v1361_v38  ;;  %v1673_v37 = vld [vmem:[%s8161_s3 + $0x990] sm:$0xff] }
 0x168   : > { %4743 = vmatprep.subr.mxu0 %v1646_v39  ;;  %2325 = vmatprep.subr.mxu1 %v5214_v4  ;;  %v1343_v38 = vadd.f32 %v6755_v54, %v608_v35  ;;  %v1672_v39 = vld [vmem:[%s8161_s3 + $0x988] sm:$0xff] }
 0x169   : > { %4744 = vmatpush3.msra.mxu0 %v1630_v40  ;;  %2326 = vmatpush1.msra.mxu1 %v1670_v41  ;;  %v1671_v40 = vld [vmem:[%s8161_s3 + $0x980] sm:$0xff]  ;;  %v2423_v54 = vld [vmem:[%s8163_s5 + $0xc8] sm:$0xff] }
 0x16a   : > { %4745 = vmatprep.subr.mxu0 %v1645_v17  ;;  %2327 = vmatprep.subr.mxu1 %v5214_v4  ;;  %v1365_v41 = vmax.f32 %v1343_v38, 0.0  ;;  %v2421_v17 = vld [vmem:[%s8163_s5 + $0xb8] sm:$0xff]  ;;  %v2422_v38 = vld [vmem:[%s8163_s5 + $0xc0] sm:$0xff] }
 0x16b   : > { %4746 = vmatpush3.msra.mxu0 %v1629_v46  ;;  %2328 = vmatpush1.msra.mxu1 %v1669_v47  ;;  %v2419_v46 = vld [vmem:[%s8163_s5 + $0xa8] sm:$0xff]  ;;  %v2420_v47 = vld [vmem:[%s8163_s5 + $0xb0] sm:$0xff] }
 0x16c   : > { %4747 = vmatprep.subr.mxu0 %v1644_v50  ;;  %2329 = vmatprep.subr.mxu1 %v5214_v4  ;;  %v2399_v50 = vld [vmem:[%s8163_s5 + $0x8] sm:$0xff] }
 0x16d   : > { %4748 = vmatpush3.msra.mxu0 %v1628_v51  ;;  %2330 = vmatpush1.msra.mxu1 %v1668_v52  ;;  %v2400_v51 = vld [vmem:[%s8163_s5 + $0x10] sm:$0xff]  ;;  %v2398_v52 = vld [vmem:[%s8163_s5] sm:$0xff] }
 0x16e   : > { %4749 = vmatprep.subr.mxu0 %v1643_v55  ;;  %2331 = vmatprep.subr.mxu1 %v5214_v4  ;;  %v2429_v55 = vld [vmem:[%s8163_s5 + $0xf8] sm:$0xff] }
 0x16f   : > { %4750 = vmatpush3.msra.mxu0 %v1627_v57  ;;  %2332 = vmatpush1.msra.mxu1 %v1667_v59 }
 0x170   : > { %4751 = vmatprep.subr.mxu0 %v1642_v63  ;;  %2333 = vmatprep.subr.mxu1 %v5214_v4 }
 0x171   : > { %4752 = vmatpush3.msra.mxu0 %v1626_v1  ;;  %2334 = vmatpush1.msra.mxu1 %v1666_v3 }
 0x172   : > { %4753 = vmatprep.subr.mxu0 %v1641_v7  ;;  %2335 = vmatprep.subr.mxu1 %v5214_v4 }
 0x173   : > { %4754 = vmatpush3.msra.mxu0 %v1625_v9  ;;  %2336 = vmatpush1.msra.mxu1 %v1665_v10 }
 0x174   : > { %4755 = vmatprep.subr.mxu0 %v1640_v11  ;;  %2337 = vmatprep.subr.mxu1 %v5214_v4 }
 0x175   : > { %4756 = vmatpush3.msra.mxu0 %v1624_v14  ;;  %2338 = vmatpush1.msra.mxu1 %v1664_v15 }
 0x176   : > { %4757 = vmatprep.subr.mxu0 %v1639_v18  ;;  %2339 = vmatprep.subr.mxu1 %v5214_v4 }
 0x177   : > { %4758 = vmatpush3.msra.mxu0 %v1623_v19  ;;  %2319 = vmatprep.mubr.f32.mxu0 %v1364_v16 }
 0x178   : > { %2340 = vmatpush1.msra.mxu1 %v1663_v20  ;;  %2320 = vmatmul.mubr.f32.vlgmr.msra.gmra.mxu0 %v1363_v42 }
 0x179   : > { %2341 = vmatprep.subr.mxu1 %v5214_v4  ;;  %4427 = vmatprep.mubr.msk.f32.mxu1 %vm1687_vm1, %v1366_v21 }
 0x17a   : > { %2342 = vmatpush1.msra.mxu1 %v1662_v22  ;;  %2682 = vmatprep.mubr.f32.mxu0 %v5214_v4 }
 0x17b   : > { %2343 = vmatprep.subr.mxu1 %v5214_v4  ;;  %2646 = vmatprep.subr.mxu0 %v2421_v17  ;;  %v2402_v17 = vld [vmem:[%s8163_s5 + $0x20] sm:$0xff] }
 0x17c   : > { %2344 = vmatpush1.msra.mxu1 %v1661_v23  ;;  %2647 = vmatpush1.msra.mxu0 %v2420_v47  ;;  %v2425_v47 = vld [vmem:[%s8163_s5 + $0xd8] sm:$0xff] }
 0x17d   : > { %2345 = vmatprep.subr.mxu1 %v5214_v4  ;;  %2648 = vmatprep.subr.mxu0 %v2401_v49  ;;  %v2424_v49 = vld [vmem:[%s8163_s5 + $0xd0] sm:$0xff] }
 0x17e   : > { %2346 = vmatpush1.msra.mxu1 %v1660_v24  ;;  %2649 = vmatpush1.msra.mxu0 %v2400_v51  ;;  %v2405_v51 = vld [vmem:[%s8163_s5 + $0x38] sm:$0xff] }
 0x17f   : > { %2347 = vmatprep.subr.mxu1 %v5214_v4  ;;  %2717 = vmatprep.subr.mxu0 %v2423_v54  ;;  %v2404_v54 = vld [vmem:[%s8163_s5 + $0x30] sm:$0xff] }
 0x180   : > { %2348 = vmatpush1.msra.mxu1 %v1659_v26 }
 0x181   : > { %2349 = vmatprep.subr.mxu1 %v5214_v4 }
 0x182   : > { %2350 = vmatpush1.msra.mxu1 %v1658_v53 }
 0x183   : > { %2351 = vmatprep.subr.mxu1 %v5214_v4 }
 0x184   : > { %2352 = vmatpush1.msra.mxu1 %v1657_v27 }
 0x185   : > { %2353 = vmatprep.subr.mxu1 %v5214_v4 }
 0x186   : > { %2354 = vmatpush1.msra.mxu1 %v1656_v28 }
 0x187   : > { %2355 = vmatprep.subr.mxu1 %v5214_v4 }
 0x188   : > { %2356 = vmatpush1.msra.mxu1 %v1655_v44 }
 0x189   : > { %2371 = vmatprep.subr.mxu1 %v5214_v4 }
 0x18a   : > { %4426 = vmatpush2.msk.msra.mxu1 %vm1691_vm2, %v1679_v29 }
 0x18b   : > { %2373 = vmatprep.subr.mxu1 %v5214_v4 }
 0x18c   : > { %2374 = vmatpush2.msra.mxu1 %v1678_v31 }
 0x18d   : > { %2375 = vmatprep.subr.mxu1 %v5214_v4 }
 0x18e   : > { %2376 = vmatpush2.msra.mxu1 %v1677_v32 }
 0x18f   : > { %2377 = vmatprep.subr.mxu1 %v5214_v4 }
 0x190   : > { %2378 = vmatpush2.msra.mxu1 %v1676_v33 }
 0x191   : > { %2379 = vmatprep.subr.mxu1 %v5214_v4 }
 0x192   : > { %2380 = vmatpush2.msra.mxu1 %v1675_v34 }
 0x193   : > { %2381 = vmatprep.subr.mxu1 %v5214_v4 }
 0x194   : > { %2382 = vmatpush2.msra.mxu1 %v1674_v36 }
 0x195   : > { %2383 = vmatprep.subr.mxu1 %v5214_v4 }
 0x196   : > { %2384 = vmatpush2.msra.mxu1 %v1673_v37 }
 0x197   : > { %2385 = vmatprep.subr.mxu1 %v5214_v4 }
 0x198   : > { %2386 = vmatpush2.msra.mxu1 %v1672_v39  ;;  %v2428_v39 = vld [vmem:[%s8163_s5 + $0xf0] sm:$0xff] }
 0x199   : > { %2387 = vmatprep.subr.mxu1 %v5214_v4 }
 0x19a   : > { %2388 = vmatpush2.msra.mxu1 %v1671_v40  ;;  %v2403_v40 = vld [vmem:[%s8163_s5 + $0x28] sm:$0xff] }
 0x19b   : > { %2390 = vmatmul.mubr.f32.vlgmr.msra.gmra.mxu1 %v1365_v41  ;;  %2575 = vmatprep.subr.mxu1 %v2419_v46  ;;  %v2409_v41 = vld [vmem:[%s8163_s5 + $0x58] sm:$0xff]  ;;  %v2408_v46 = vld [vmem:[%s8163_s5 + $0x50] sm:$0xff] }
 0x19c   : > { %2611 = vmatprep.mubr.f32.mxu1 %v5214_v4  ;;  %2576 = vmatpush1.msra.mxu1 %v2418_v48  ;;  %v2433_v48 = vld [vmem:[%s8163_s5 + $0x118] sm:$0xff] }
 0x19d   : > { %2577 = vmatprep.subr.mxu1 %v2399_v50  ;;  %v2432_v50 = vld [vmem:[%s8163_s5 + $0x110] sm:$0xff] }
 0x19e   : > { %2578 = vmatpush1.msra.mxu1 %v2398_v52  ;;  %v2413_v52 = vld [vmem:[%s8163_s5 + $0x78] sm:$0xff] }
 0x19f   : > { %2930 = vmatprep.subr.mxu1 %v2429_v55  ;;  %v2412_v55 = vld [vmem:[%s8163_s5 + $0x70] sm:$0xff] }
 0x1b2   : > { %v4479_v56 = vpop.f32.mrf.mxu0 }
 0x1b4   : > { %v4480_v57 = vpop.f32.mrf.mxu0 }
 0x1b5   : > { %v4481_v5 = vadd.f32 %v4480_v57, %v4479_v56  ;;  %v2427_v56 = vld [vmem:[%s8163_s5 + $0xe8] sm:$0xff]  ;;  %v2437_v57 = vld [vmem:[%s8163_s5 + $0x138] sm:$0xff] }
 0x1b7   : > { %v1762_v11 = vadd.f32 %v4481_v5, %v4425_v6  ;;  %v2430_v5 = vld [vmem:[%s8163_s5 + $0x100] sm:$0xff]  ;;  %v2411_v6 = vld [vmem:[%s8163_s5 + $0x68] sm:$0xff] }
 0x1c2   : > { %v4514_v59 = vpop.f32.mrf.mxu1 }
 0x1c4   : > { %v4515_v62 = vpop.f32.mrf.mxu1 }
 0x1c5   : > { %v4516_v9 = vadd.f32 %v4515_v62, %v4514_v59  ;;  %v2426_v59 = vld [vmem:[%s8163_s5 + $0xe0] sm:$0xff]  ;;  %v2407_v62 = vld [vmem:[%s8163_s5 + $0x48] sm:$0xff] }
 0x1c7   : > { %v1832_v15 = vadd.f32 %v4516_v9, %v1762_v11  ;;  %v2435_v9 = vld [vmem:[%s8163_s5 + $0x128] sm:$0xff] }
 0x1c8   : > { %v2415_v11 = vld [vmem:[%s8163_s5 + $0x88] sm:$0xff] }
 0x1d3   : > { %v4549_v61 = vpop.f32.mrf.mxu0 }
 0x1d5   : > { %v4550_v63 = vpop.f32.mrf.mxu0 }
 0x1d6   : > { %v4551_v12 = vadd.f32 %v4550_v63, %v4549_v61  ;;  %v2436_v61 = vld [vmem:[%s8163_s5 + $0x130] sm:$0xff]  ;;  %v2417_v63 = vld [vmem:[%s8163_s5 + $0x98] sm:$0xff] }
 0x1d8   : > { %v1902_v19 = vadd.f32 %v4551_v12, %v1832_v15  ;;  %v3304_v12 = vld [vmem:[%s8165_s7 + $0x178] sm:$0xff]  ;;  %v3319_v15 = vld [vmem:[%s8165_s7 + $0x1f0] sm:$0xff] }
 0x1e3   : > { %v4584_v0 = vpop.f32.mrf.mxu1 }
 0x1e5   : > { %v4585_v3 = vpop.f32.mrf.mxu1 }
 0x1e6   : > { %v4586_v16 = vadd.f32 %v4585_v3, %v4584_v0  ;;  %v2406_v0 = vld [vmem:[%s8163_s5 + $0x40] sm:$0xff]  ;;  %v2431_v3 = vld [vmem:[%s8163_s5 + $0x108] sm:$0xff] }
 0x1e8   : > { %v1972_v22 = vadd.f32 %v4586_v16, %v1902_v19  ;;  %v3288_v16 = vld [vmem:[%s8165_s7 + $0xf8] sm:$0xff]  ;;  %v3287_v19 = vld [vmem:[%s8165_s7 + $0xf0] sm:$0xff] }
 0x1f4   : > { %v4619_v1 = vpop.f32.mrf.mxu0 }
 0x1f6   : > { %v4620_v7 = vpop.f32.mrf.mxu0 }
 0x1f7   : > { %v4621_v20 = vadd.f32 %v4620_v7, %v4619_v1  ;;  %v2416_v1 = vld [vmem:[%s8163_s5 + $0x90] sm:$0xff]  ;;  %v2410_v7 = vld [vmem:[%s8163_s5 + $0x60] sm:$0xff] }
 0x1f9   : > { %v2042_v26 = vadd.f32 %v4621_v20, %v1972_v22  ;;  %v3318_v20 = vld [vmem:[%s8165_s7 + $0x1e8] sm:$0xff] }
 0x1fa   : > { %v3302_v22 = vld [vmem:[%s8165_s7 + $0x168] sm:$0xff] }
 0x205   : > { %v4654_v8 = vpop.f32.mrf.mxu1 }
 0x207   : > { %v4655_v14 = vpop.f32.mrf.mxu1 }
 0x208   : > { %v4656_v23 = vadd.f32 %v4655_v14, %v4654_v8  ;;  %v3320_v8 = vld [vmem:[%s8165_s7 + $0x1f8] sm:$0xff]  ;;  %v2414_v14 = vld [vmem:[%s8163_s5 + $0x80] sm:$0xff] }
 0x20a   : > { %v2112_v28 = vadd.f32 %v4656_v23, %v2042_v26  ;;  %v3286_v23 = vld [vmem:[%s8165_s7 + $0xe8] sm:$0xff] }
 0x20b   : > { %v3270_v26 = vld [vmem:[%s8165_s7 + $0x68] sm:$0xff] }
 0x216   : > { %v4689_v10 = vpop.f32.mrf.mxu0 }
 0x218   : > { %v4690_v18 = vpop.f32.mrf.mxu0 }
 0x219   : > { %v4691_v53 = vadd.f32 %v4690_v18, %v4689_v10  ;;  %v2434_v10 = vld [vmem:[%s8163_s5 + $0x120] sm:$0xff]  ;;  %v3272_v18 = vld [vmem:[%s8165_s7 + $0x78] sm:$0xff] }
 0x21b   : > { %v2182_v29 = vadd.f32 %v4691_v53, %v2112_v28  ;;  %v3301_v53 = vld [vmem:[%s8165_s7 + $0x160] sm:$0xff]  ;;  %v3316_v28 = vld [vmem:[%s8165_s7 + $0x1d8] sm:$0xff] }
 0x227   : > { %v4724_v42 = vpop.f32.mrf.mxu1 }
 0x229   : > { %v4725_v24 = vpop.f32.mrf.mxu1 }
 0x22a   : > { %v4726_v44 = vadd.f32 %v4725_v24, %v4724_v42  ;;  %v3303_v42 = vld [vmem:[%s8165_s7 + $0x170] sm:$0xff]  ;;  %v3317_v24 = vld [vmem:[%s8165_s7 + $0x1e0] sm:$0xff] }
 0x22c   : > { %v2252_v32 = vadd.f32 %v4726_v44, %v2182_v29  ;;  %v3269_v44 = vld [vmem:[%s8165_s7 + $0x60] sm:$0xff]  ;;  %v3300_v29 = vld [vmem:[%s8165_s7 + $0x158] sm:$0xff] }
 0x238   : > { %v4759_v21 = vpop.f32.mrf.mxu0 }
 0x23a   : > { %v4760_v27 = vpop.f32.mrf.mxu0 }
 0x23b   : > { %v4761_v31 = vadd.f32 %v4760_v27, %v4759_v21  ;;  %v3271_v21 = vld [vmem:[%s8165_s7 + $0x70] sm:$0xff]  ;;  %v3285_v27 = vld [vmem:[%s8165_s7 + $0xe0] sm:$0xff] }
 0x23d   : > { %v2322_v33 = vadd.f32 %v4761_v31, %v2252_v32  ;;  %v3284_v31 = vld [vmem:[%s8165_s7 + $0xd8] sm:$0xff]  ;;  %v3315_v32 = vld [vmem:[%s8165_s7 + $0x1d0] sm:$0xff] }
 0x25b   : > { %v2391_v34 = vpop.f32.mrf.mxu1 }
 0x25c   : > { %v2392_v35 = vadd.f32 %v2391_v34, %v2322_v33  ;;  %v3268_v33 = vld [vmem:[%s8165_s7 + $0x58] sm:$0xff]  ;;  %v3299_v34 = vld [vmem:[%s8165_s7 + $0x150] sm:$0xff] }
 0x25d   : > { %v2393_v36 = vpop.f32.mrf.mxu1 }
 0x25e   : > { %v6926_v37 = vmax.f32 %v2392_v35, 0.0  ;;  %2396 = vst.msk [vmem:[%s6936_s30] sm:$0xff] %vm2395_vm3, %v2392_v35  ;;  %v3283_v35 = vld [vmem:[%s8165_s7 + $0xd0] sm:$0xff]  ;;  %v3314_v36 = vld [vmem:[%s8165_s7 + $0x1c8] sm:$0xff] }
 0x260   : > { %4428 = vmatmul.mubr.msk.f32.vlgmr.msra.gmra.mxu1 %vm2395_vm3, %v6926_v37  ;;  %4429 = vmatmul.mubr.msk.f32.vlgmr.msra.gmra.mxu0 %vm2395_vm3, %v6926_v37 }
 0x261   : > { %2718 = vmatpush1.msra.mxu0 %v2422_v38  ;;  %2931 = vmatpush1.msra.mxu1 %v2428_v39  ;;  %v3298_v38 = vld [vmem:[%s8165_s7 + $0x148] sm:$0xff] }
 0x262   : > { %2719 = vmatprep.subr.mxu0 %v2403_v40  ;;  %2932 = vmatprep.subr.mxu1 %v2409_v41  ;;  %v3282_v39 = vld [vmem:[%s8165_s7 + $0xc8] sm:$0xff]  ;;  %v3313_v40 = vld [vmem:[%s8165_s7 + $0x1c0] sm:$0xff] }
 0x263   : > { %2720 = vmatpush1.msra.mxu0 %v2402_v17  ;;  %2753 = vmatprep.mubr.f32.mxu0 %v5214_v4  ;;  %v3266_v41 = vld [vmem:[%s8165_s7 + $0x48] sm:$0xff]  ;;  %v3297_v17 = vld [vmem:[%s8165_s7 + $0x140] sm:$0xff] }
 0x264   : > { %2933 = vmatpush1.msra.mxu1 %v2408_v46  ;;  %2966 = vmatprep.mubr.f32.mxu1 %v5214_v4  ;;  %v3281_v46 = vld [vmem:[%s8165_s7 + $0xc0] sm:$0xff] }
 0x265   : > { %4430 = vmatmul.mubr.msk.f32.vlgmr.msra.gmra.mxu0 %vm2395_vm3, %v6926_v37  ;;  %2788 = vmatprep.subr.mxu0 %v2425_v47  ;;  %v3312_v47 = vld [vmem:[%s8165_s7 + $0x1b8] sm:$0xff] }
 0x266   : > { %4433 = vmatmul.mubr.msk.f32.vlgmr.msra.gmra.mxu1 %vm2395_vm3, %v6926_v37  ;;  %3072 = vmatprep.subr.mxu1 %v2433_v48  ;;  %v3265_v48 = vld [vmem:[%s8165_s7 + $0x40] sm:$0xff] }
 0x267   : > { %2789 = vmatpush1.msra.mxu0 %v2424_v49  ;;  %3073 = vmatpush1.msra.mxu1 %v2432_v50  ;;  %v3296_v49 = vld [vmem:[%s8165_s7 + $0x138] sm:$0xff] }
 0x268   : > { %2790 = vmatprep.subr.mxu0 %v2405_v51  ;;  %3074 = vmatprep.subr.mxu1 %v2413_v52  ;;  %v3280_v50 = vld [vmem:[%s8165_s7 + $0xb8] sm:$0xff]  ;;  %v3311_v51 = vld [vmem:[%s8165_s7 + $0x1b0] sm:$0xff] }
 0x269   : > { %2791 = vmatpush1.msra.mxu0 %v2404_v54  ;;  %2824 = vmatprep.mubr.f32.mxu0 %v5214_v4  ;;  %v3264_v52 = vld [vmem:[%s8165_s7 + $0x38] sm:$0xff]  ;;  %v3295_v54 = vld [vmem:[%s8165_s7 + $0x130] sm:$0xff] }
 0x26a   : > { %3075 = vmatpush1.msra.mxu1 %v2412_v55  ;;  %3108 = vmatprep.mubr.f32.mxu1 %v5214_v4  ;;  %v3279_v55 = vld [vmem:[%s8165_s7 + $0xb0] sm:$0xff] }
 0x26b   : > { %4431 = vmatmul.mubr.msk.f32.vlgmr.msra.gmra.mxu0 %vm2395_vm3, %v6926_v37  ;;  %2859 = vmatprep.subr.mxu0 %v2427_v56  ;;  %v3310_v56 = vld [vmem:[%s8165_s7 + $0x1a8] sm:$0xff] }
 0x26c   : > { %4435 = vmatmul.mubr.msk.f32.vlgmr.msra.gmra.mxu1 %vm2395_vm3, %v6926_v37  ;;  %3214 = vmatprep.subr.mxu1 %v2437_v57  ;;  %v3263_v57 = vld [vmem:[%s8165_s7 + $0x30] sm:$0xff] }
 0x26d   : > { %2860 = vmatpush1.msra.mxu0 %v2426_v59  ;;  %3215 = vmatpush1.msra.mxu1 %v2436_v61  ;;  %v3294_v59 = vld [vmem:[%s8165_s7 + $0x128] sm:$0xff] }
 0x26e   : > { %2861 = vmatprep.subr.mxu0 %v2407_v62  ;;  %3216 = vmatprep.subr.mxu1 %v2417_v63  ;;  %v3278_v61 = vld [vmem:[%s8165_s7 + $0xa8] sm:$0xff]  ;;  %v3309_v62 = vld [vmem:[%s8165_s7 + $0x1a0] sm:$0xff] }
 0x26f   : > { %2862 = vmatpush1.msra.mxu0 %v2406_v0  ;;  %2895 = vmatprep.mubr.f32.mxu0 %v5214_v4  ;;  %v3262_v63 = vld [vmem:[%s8165_s7 + $0x28] sm:$0xff]  ;;  %v3293_v0 = vld [vmem:[%s8165_s7 + $0x120] sm:$0xff] }
 0x270   : > { %3217 = vmatpush1.msra.mxu1 %v2416_v1  ;;  %3250 = vmatprep.mubr.f32.mxu1 %v5214_v4  ;;  %v3277_v1 = vld [vmem:[%s8165_s7 + $0xa0] sm:$0xff] }
 0x271   : > { %4432 = vmatmul.mubr.msk.f32.vlgmr.msra.gmra.mxu0 %vm2395_vm3, %v6926_v37  ;;  %3001 = vmatprep.subr.mxu0 %v2431_v3  ;;  %v3308_v3 = vld [vmem:[%s8165_s7 + $0x198] sm:$0xff] }
 0x272   : > { %4437 = vmatmul.mubr.msk.f32.vlgmr.msra.gmra.mxu1 %vm2395_vm3, %v6926_v37  ;;  %3002 = vmatpush1.msra.mxu0 %v2430_v5  ;;  %v3261_v5 = vld [vmem:[%s8165_s7 + $0x20] sm:$0xff] }
 0x273   : > { %3003 = vmatprep.subr.mxu0 %v2411_v6  ;;  %3037 = vmatprep.mubr.f32.mxu0 %v5214_v4  ;;  %v3292_v6 = vld [vmem:[%s8165_s7 + $0x118] sm:$0xff] }
 0x274   : > { %3004 = vmatpush1.msra.mxu0 %v2410_v7  ;;  %4797 = vmatprep.subr.mxu1 %v3320_v8  ;;  %v3276_v7 = vld [vmem:[%s8165_s7 + $0x98] sm:$0xff]  ;;  %v3307_v8 = vld [vmem:[%s8165_s7 + $0x190] sm:$0xff] }
 0x275   : > { %4434 = vmatmul.mubr.msk.f32.vlgmr.msra.gmra.mxu0 %vm2395_vm3, %v6926_v37  ;;  %3143 = vmatprep.subr.mxu0 %v2435_v9  ;;  %v3260_v9 = vld [vmem:[%s8165_s7 + $0x18] sm:$0xff] }
 0x276   : > { %3144 = vmatpush1.msra.mxu0 %v2434_v10  ;;  %3179 = vmatprep.mubr.f32.mxu0 %v5214_v4  ;;  %v3275_v10 = vld [vmem:[%s8165_s7 + $0x90] sm:$0xff] }
 0x277   : > { %3145 = vmatprep.subr.mxu0 %v2415_v11  ;;  %4798 = vmatpush3.msra.mxu1 %v3304_v12  ;;  %v3259_v11 = vld [vmem:[%s8165_s7 + $0x10] sm:$0xff] }
 0x278   : > { %3146 = vmatpush1.msra.mxu0 %v2414_v14  ;;  %4799 = vmatprep.subr.mxu1 %v3319_v15  ;;  %v3291_v12 = vld [vmem:[%s8165_s7 + $0x110] sm:$0xff]  ;;  %v3274_v14 = vld [vmem:[%s8165_s7 + $0x88] sm:$0xff] }
 0x279   : > { %4436 = vmatmul.mubr.msk.f32.vlgmr.msra.gmra.mxu0 %vm2395_vm3, %v6926_v37  ;;  %4762 = vmatprep.subr.mxu0 %v3288_v16  ;;  %v3267_v37 = vld [vmem:[%s8165_s7 + $0x50] sm:$0xff]  ;;  %v3306_v15 = vld [vmem:[%s8165_s7 + $0x188] sm:$0xff] }
 0x27a   : > { %4763 = vmatpush3.msra.mxu0 %v3272_v18  ;;  %4800 = vmatpush3.msra.mxu1 %v3303_v42  ;;  %v3258_v16 = vld [vmem:[%s8165_s7 + $0x8] sm:$0xff]  ;;  %v3273_v42 = vld [vmem:[%s8165_s7 + $0x80] sm:$0xff] }
 0x27b   : > { %4764 = vmatprep.subr.mxu0 %v3287_v19  ;;  %4801 = vmatprep.subr.mxu1 %v3318_v20  ;;  %v3290_v18 = vld [vmem:[%s8165_s7 + $0x108] sm:$0xff]  ;;  %v3305_v19 = vld [vmem:[%s8165_s7 + $0x180] sm:$0xff] }
 0x27c   : > { %4765 = vmatpush3.msra.mxu0 %v3271_v21  ;;  %4802 = vmatpush3.msra.mxu1 %v3302_v22  ;;  %v3257_v20 = vld [vmem:[%s8165_s7] sm:$0xff]  ;;  %v3352_v22 = vld [vmem:[%s8165_s7 + $0x2f8] sm:$0xff] }
 0x27d   : > { %4766 = vmatprep.subr.mxu0 %v3286_v23  ;;  %4803 = vmatprep.subr.mxu1 %v3317_v24  ;;  %v3289_v21 = vld [vmem:[%s8165_s7 + $0x100] sm:$0xff]  ;;  %v3384_v23 = vld [vmem:[%s8165_s7 + $0x3f8] sm:$0xff] }
 0x27e   : > { %4767 = vmatpush3.msra.mxu0 %v3270_v26  ;;  %4804 = vmatpush3.msra.mxu1 %v3301_v53  ;;  %v7253_v24 = vld [vmem:[%s8164_s6] sm:$0xff] }
 0x27f   : > { %4768 = vmatprep.subr.mxu0 %v3285_v27  ;;  %4805 = vmatprep.subr.mxu1 %v3316_v28  ;;  %v2451_v26 = vrot.slane %v7253_v24, %v6046_v45  ;;  %v2459_v53 = vrot.slane %v7253_v24, %v6074_v60  ;;  %v2447_v27 = vrot.slane %v7253_v24, %v6038_v43 }
 0x280   : > { %4769 = vmatpush3.msra.mxu0 %v3269_v44  ;;  %4806 = vmatpush3.msra.mxu1 %v3300_v29  ;;  %v2455_v44 = vrot.slane %v7253_v24, %v6068_v58 }
 0x281   : > { %4770 = vmatprep.subr.mxu0 %v3284_v31  ;;  %4807 = vmatprep.subr.mxu1 %v3315_v32 }
 0x282   : > { %4771 = vmatpush3.msra.mxu0 %v3268_v33  ;;  %4808 = vmatpush3.msra.mxu1 %v3299_v34 }
 0x283   : > { %4772 = vmatprep.subr.mxu0 %v3283_v35  ;;  %4809 = vmatprep.subr.mxu1 %v3314_v36 }
 0x284   : > { %4773 = vmatpush3.msra.mxu0 %v3267_v37  ;;  %4810 = vmatpush3.msra.mxu1 %v3298_v38  ;;  %v2467_v37 = vrot.slane %v7253_v24, %v6150_v30  ;;  %v3336_v38 = vld [vmem:[%s8165_s7 + $0x278] sm:$0xff] }
 0x285   : > { %4774 = vmatprep.subr.mxu0 %v3282_v39  ;;  %4811 = vmatprep.subr.mxu1 %v3313_v40  ;;  %v3368_v39 = vld [vmem:[%s8165_s7 + $0x378] sm:$0xff] }
 0x286   : > { %4775 = vmatpush3.msra.mxu0 %v3266_v41  ;;  %4812 = vmatpush3.msra.mxu1 %v3297_v17  ;;  %v3351_v41 = vld [vmem:[%s8165_s7 + $0x2f0] sm:$0xff] }
 0x287   : > { %4776 = vmatprep.subr.mxu0 %v3281_v46  ;;  %4813 = vmatprep.subr.mxu1 %v3312_v47  ;;  %v3383_v17 = vld [vmem:[%s8165_s7 + $0x3f0] sm:$0xff] }
 0x288   : > { %4777 = vmatpush3.msra.mxu0 %v3265_v48  ;;  %4814 = vmatpush3.msra.mxu1 %v3296_v49  ;;  %v3335_v46 = vld [vmem:[%s8165_s7 + $0x270] sm:$0xff]  ;;  %v3350_v49 = vld [vmem:[%s8165_s7 + $0x2e8] sm:$0xff] }
 0x289   : > { %4778 = vmatprep.subr.mxu0 %v3280_v50  ;;  %4815 = vmatprep.subr.mxu1 %v3311_v51  ;;  %v3367_v47 = vld [vmem:[%s8165_s7 + $0x370] sm:$0xff]  ;;  %v3382_v51 = vld [vmem:[%s8165_s7 + $0x3e8] sm:$0xff] }
 0x28a   : > { %4779 = vmatpush3.msra.mxu0 %v3264_v52  ;;  %4816 = vmatpush3.msra.mxu1 %v3295_v54  ;;  %v3334_v52 = vld [vmem:[%s8165_s7 + $0x268] sm:$0xff] }
 0x28b   : > { %4780 = vmatprep.subr.mxu0 %v3279_v55  ;;  %4817 = vmatprep.subr.mxu1 %v3310_v56  ;;  %v3366_v54 = vld [vmem:[%s8165_s7 + $0x368] sm:$0xff]  ;;  %v3349_v55 = vld [vmem:[%s8165_s7 + $0x2e0] sm:$0xff]  ;;  %v2475_v56 = vrot.slane %v7253_v24, %v6223_v2 }
 0x28c   : > { %4781 = vmatpush3.msra.mxu0 %v3263_v57  ;;  %4818 = vmatpush3.msra.mxu1 %v3294_v59  ;;  %v3381_v57 = vld [vmem:[%s8165_s7 + $0x3e0] sm:$0xff] }
 0x28d   : > { %4782 = vmatprep.subr.mxu0 %v3278_v61  ;;  %4819 = vmatprep.subr.mxu1 %v3309_v62  ;;  %v3333_v59 = vld [vmem:[%s8165_s7 + $0x260] sm:$0xff] }
 0x28e   : > { %4783 = vmatpush3.msra.mxu0 %v3262_v63  ;;  %4820 = vmatpush3.msra.mxu1 %v3293_v0  ;;  %v3365_v62 = vld [vmem:[%s8165_s7 + $0x360] sm:$0xff]  ;;  %v3348_v63 = vld [vmem:[%s8165_s7 + $0x2d8] sm:$0xff] }
 0x28f   : > { %4784 = vmatprep.subr.mxu0 %v3277_v1  ;;  %4821 = vmatprep.subr.mxu1 %v3308_v3  ;;  %v3380_v0 = vld [vmem:[%s8165_s7 + $0x3d8] sm:$0xff] }
 0x290   : > { %4785 = vmatpush3.msra.mxu0 %v3261_v5  ;;  %4822 = vmatpush3.msra.mxu1 %v3292_v6  ;;  %v3332_v1 = vld [vmem:[%s8165_s7 + $0x258] sm:$0xff] }
 0x291   : > { %4786 = vmatprep.subr.mxu0 %v3276_v7  ;;  %4823 = vmatprep.subr.mxu1 %v3307_v8  ;;  %v3364_v5 = vld [vmem:[%s8165_s7 + $0x358] sm:$0xff]  ;;  %v3347_v7 = vld [vmem:[%s8165_s7 + $0x2d0] sm:$0xff] }
 0x292   : > { %4787 = vmatpush3.msra.mxu0 %v3260_v9  ;;  %4824 = vmatpush3.msra.mxu1 %v3291_v12  ;;  %v3379_v8 = vld [vmem:[%s8165_s7 + $0x3d0] sm:$0xff]  ;;  %v3378_v12 = vld [vmem:[%s8165_s7 + $0x3c8] sm:$0xff] }
 0x293   : > { %4788 = vmatprep.subr.mxu0 %v3275_v10  ;;  %4825 = vmatprep.subr.mxu1 %v3306_v15  ;;  %v3331_v9 = vld [vmem:[%s8165_s7 + $0x250] sm:$0xff]  ;;  %v3362_v15 = vld [vmem:[%s8165_s7 + $0x348] sm:$0xff] }
 0x294   : > { %4789 = vmatpush3.msra.mxu0 %v3259_v11  ;;  %4826 = vmatpush3.msra.mxu1 %v3290_v18  ;;  %v3363_v10 = vld [vmem:[%s8165_s7 + $0x350] sm:$0xff]  ;;  %v3346_v11 = vld [vmem:[%s8165_s7 + $0x2c8] sm:$0xff]  ;;  %v3377_v18 = vld [vmem:[%s8165_s7 + $0x3c0] sm:$0xff] }
 0x295   : > { %4790 = vmatprep.subr.mxu0 %v3274_v14  ;;  %4827 = vmatprep.subr.mxu1 %v3305_v19  ;;  %v3330_v14 = vld [vmem:[%s8165_s7 + $0x248] sm:$0xff]  ;;  %v3361_v19 = vld [vmem:[%s8165_s7 + $0x340] sm:$0xff] }
 0x296   : > { %4791 = vmatpush3.msra.mxu0 %v3258_v16  ;;  %4828 = vmatpush3.msra.mxu1 %v3289_v21  ;;  %v3345_v16 = vld [vmem:[%s8165_s7 + $0x2c0] sm:$0xff]  ;;  %v3376_v21 = vld [vmem:[%s8165_s7 + $0x3b8] sm:$0xff] }
 0x297   : > { %4792 = vmatprep.subr.mxu0 %v3273_v42  ;;  %4867 = vmatprep.subr.mxu1 %v3384_v23  ;;  %v3329_v42 = vld [vmem:[%s8165_s7 + $0x240] sm:$0xff]  ;;  %v3360_v23 = vld [vmem:[%s8165_s7 + $0x338] sm:$0xff] }
 0x298   : > { %4793 = vmatpush3.msra.mxu0 %v3257_v20  ;;  %v3344_v20 = vld [vmem:[%s8165_s7 + $0x2b8] sm:$0xff] }
 0x299   : > { %4832 = vmatprep.subr.mxu0 %v3352_v22  ;;  %v3328_v22 = vld [vmem:[%s8165_s7 + $0x238] sm:$0xff] }
 0x320   : > { %v2613_v28 = vpop.f32.mrf.mxu1  ;;  %v2684_v29 = vpop.f32.mrf.mxu0 }
 0x321   : > { %v2614_v35 = vadd.f32 %v2613_v28, %v2447_v27  ;;  %v2685_v36 = vadd.f32 %v2684_v29, %v2455_v44  ;;  %v3327_v27 = vld [vmem:[%s8165_s7 + $0x230] sm:$0xff]  ;;  %v3342_v44 = vld [vmem:[%s8165_s7 + $0x2a8] sm:$0xff] }
 0x322   : > { %v2615_v31 = vpop.f32.mrf.mxu1  ;;  %v2686_v32 = vpop.f32.mrf.mxu0  ;;  %v3359_v28 = vld [vmem:[%s8165_s7 + $0x330] sm:$0xff]  ;;  %v3374_v29 = vld [vmem:[%s8165_s7 + $0x3a8] sm:$0xff] }
 0x323   : > { %v2616_v33 = vadd.f32 %v2615_v31, %v2451_v26  ;;  %v2687_v34 = vadd.f32 %v2686_v32, %v2459_v53  ;;  %v3343_v26 = vld [vmem:[%s8165_s7 + $0x2b0] sm:$0xff]  ;;  %v3326_v31 = vld [vmem:[%s8165_s7 + $0x228] sm:$0xff] }
 0x324   : > { %v3375_v53 = vld [vmem:[%s8165_s7 + $0x3b0] sm:$0xff]  ;;  %v3358_v32 = vld [vmem:[%s8165_s7 + $0x328] sm:$0xff] }
 0x325   : > { %v7271_v40 = vpop.f32.mrf.mxu0  ;;  %3647 = vmatprep.mubr.f32.mxu0 %v2616_v33  ;;  %3717 = vmatprep.mubr.f32.mxu1 %v2687_v34  ;;  %v3341_v33 = vld [vmem:[%s8165_s7 + $0x2a0] sm:$0xff] }
 0x326   : > { %3648 = vmatmul.mubr.f32.vlgmr.msra.gmra.mxu0 %v2614_v35  ;;  %3718 = vmatmul.mubr.f32.vlgmr.msra.gmra.mxu1 %v2685_v36  ;;  %v3373_v34 = vld [vmem:[%s8165_s7 + $0x3a0] sm:$0xff] }
 0x327   : > { %v2757_v48 = vpop.f32.mrf.mxu0  ;;  %4833 = vmatpush3.msra.mxu0 %v3336_v38  ;;  %4868 = vmatpush3.msra.mxu1 %v3368_v39  ;;  %v3325_v35 = vld [vmem:[%s8165_s7 + $0x220] sm:$0xff]  ;;  %v3372_v38 = vld [vmem:[%s8165_s7 + $0x398] sm:$0xff] }
 0x328   : > { %v2758_v50 = vadd.f32 %v2757_v48, %v2467_v37  ;;  %4834 = vmatprep.subr.mxu0 %v3351_v41  ;;  %4869 = vmatprep.subr.mxu1 %v3383_v17  ;;  %v3357_v36 = vld [vmem:[%s8165_s7 + $0x320] sm:$0xff]  ;;  %v3340_v37 = vld [vmem:[%s8165_s7 + $0x298] sm:$0xff]  ;;  %v3339_v17 = vld [vmem:[%s8165_s7 + $0x290] sm:$0xff] }
 0x329   : > { %4835 = vmatpush3.msra.mxu0 %v3335_v46  ;;  %4870 = vmatpush3.msra.mxu1 %v3367_v47  ;;  %v3324_v39 = vld [vmem:[%s8165_s7 + $0x218] sm:$0xff]  ;;  %v3371_v46 = vld [vmem:[%s8165_s7 + $0x390] sm:$0xff] }
 0x32a   : > { %4836 = vmatprep.subr.mxu0 %v3350_v49  ;;  %3787 = vmatprep.mubr.f32.mxu0 %v2758_v50  ;;  %v3356_v41 = vld [vmem:[%s8165_s7 + $0x318] sm:$0xff]  ;;  %v3323_v47 = vld [vmem:[%s8165_s7 + $0x210] sm:$0xff]  ;;  %v3338_v50 = vld [vmem:[%s8165_s7 + $0x288] sm:$0xff] }
 0x32b   : > { %v7308_v61 = vpop.f32.mrf.mxu0  ;;  %4871 = vmatprep.subr.mxu1 %v3382_v51  ;;  %4837 = vmatpush3.msra.mxu0 %v3334_v52  ;;  %v3355_v48 = vld [vmem:[%s8165_s7 + $0x310] sm:$0xff]  ;;  %v3370_v51 = vld [vmem:[%s8165_s7 + $0x388] sm:$0xff]  ;;  %v2463_v52 = vrot.slane %v7253_v24, %v6135_v25 }
 0x32c   : > { %4872 = vmatpush3.msra.mxu1 %v3366_v54  ;;  %4838 = vmatprep.subr.mxu0 %v3349_v55  ;;  %v7443_v54 = vpop.f32.mrf.mxu1  ;;  %v2471_v55 = vrot.slane %v7253_v24, %v6250_v13  ;;  %v3337_v24 = vld [vmem:[%s8165_s7 + $0x280] sm:$0xff] }
 0x32d   : > { %v2828_v3 = vpop.f32.mrf.mxu0  ;;  %4873 = vmatprep.subr.mxu1 %v3381_v57  ;;  %4839 = vmatpush3.msra.mxu0 %v3333_v59  ;;  %v3354_v57 = vld [vmem:[%s8165_s7 + $0x308] sm:$0xff] }
 0x32e   : > { %v2829_v6 = vadd.f32 %v2828_v3, %v2475_v56  ;;  %4874 = vmatpush3.msra.mxu1 %v3365_v62  ;;  %4840 = vmatprep.subr.mxu0 %v3348_v63  ;;  %v3322_v56 = vld [vmem:[%s8165_s7 + $0x208] sm:$0xff]  ;;  %v3369_v62 = vld [vmem:[%s8165_s7 + $0x380] sm:$0xff] }
 0x32f   : > { %4875 = vmatprep.subr.mxu1 %v3380_v0  ;;  %4841 = vmatpush3.msra.mxu0 %v3332_v1  ;;  %v7456_v59 = vld [vmem:[%s8164_s6 + $0x8] sm:$0xff]  ;;  %v3321_v0 = vld [vmem:[%s8165_s7 + $0x200] sm:$0xff] }
 0x330   : > { %3857 = vmatprep.mubr.f32.mxu1 %v2829_v6  ;;  %4876 = vmatpush3.msra.mxu1 %v3364_v5  ;;  %v2483_v63 = vrot.slane %v7456_v59, %v6046_v45  ;;  %v3353_v1 = vld [vmem:[%s8165_s7 + $0x300] sm:$0xff]  ;;  %v2491_v3 = vrot.slane %v7456_v59, %v6074_v60  ;;  %v2756_v6 = vadd.f32 %v7271_v40, %v2463_v52  ;;  %v3407_v52 = vld [vmem:[%s8165_s7 + $0x4b0] sm:$0xff] }
 0x331   : > { %4842 = vmatprep.subr.mxu0 %v3347_v7  ;;  %4877 = vmatprep.subr.mxu1 %v3379_v8  ;;  %v7433_v49 = vpop.f32.mrf.mxu0  ;;  %v2970_v7 = vpop.f32.mrf.mxu1  ;;  %v2827_v8 = vadd.f32 %v7308_v61, %v2471_v55  ;;  %v3432_v61 = vld [vmem:[%s8165_s7 + $0x578] sm:$0xff]  ;;  %v3439_v55 = vld [vmem:[%s8165_s7 + $0x5b0] sm:$0xff] }
 0x332   : > { %4843 = vmatpush3.msra.mxu0 %v3331_v9  ;;  %4878 = vmatpush3.msra.mxu1 %v3363_v10  ;;  %v3416_v9 = vld [vmem:[%s8165_s7 + $0x4f8] sm:$0xff] }
 0x333   : > { %4844 = vmatprep.subr.mxu0 %v3346_v11  ;;  %4879 = vmatprep.subr.mxu1 %v3378_v12  ;;  %v2899_v5 = vpop.f32.mrf.mxu0  ;;  %v3448_v10 = vld [vmem:[%s8165_s7 + $0x5f8] sm:$0xff]  ;;  %v2971_v12 = vadd.f32 %v2970_v7, %v2491_v3  ;;  %v3437_v3 = vld [vmem:[%s8165_s7 + $0x5a0] sm:$0xff] }
 0x334   : > { %4845 = vmatpush3.msra.mxu0 %v3330_v14  ;;  %4880 = vmatpush3.msra.mxu1 %v3362_v15  ;;  %v3400_v11 = vld [vmem:[%s8165_s7 + $0x478] sm:$0xff]  ;;  %v2900_v40 = vadd.f32 %v2899_v5, %v2483_v63  ;;  %v3415_v14 = vld [vmem:[%s8165_s7 + $0x4f0] sm:$0xff]  ;;  %v3390_v63 = vld [vmem:[%s8165_s7 + $0x428] sm:$0xff] }
 0x335   : > { %4846 = vmatprep.subr.mxu0 %v3345_v16  ;;  %4881 = vmatprep.subr.mxu1 %v3377_v18  ;;  %v3447_v15 = vld [vmem:[%s8165_s7 + $0x5f0] sm:$0xff]  ;;  %v3389_v5 = vld [vmem:[%s8165_s7 + $0x420] sm:$0xff]  ;;  %v3404_v7 = vld [vmem:[%s8165_s7 + $0x498] sm:$0xff] }
 0x336   : > { %4847 = vmatpush3.msra.mxu0 %v3329_v42  ;;  %4882 = vmatpush3.msra.mxu1 %v3361_v19  ;;  %v3399_v16 = vld [vmem:[%s8165_s7 + $0x470] sm:$0xff]  ;;  %v3414_v42 = vld [vmem:[%s8165_s7 + $0x4e8] sm:$0xff] }
 0x337   : > { %4848 = vmatprep.subr.mxu0 %v3344_v20  ;;  %4883 = vmatprep.subr.mxu1 %v3376_v21  ;;  %v3431_v18 = vld [vmem:[%s8165_s7 + $0x570] sm:$0xff]  ;;  %v3446_v19 = vld [vmem:[%s8165_s7 + $0x5e8] sm:$0xff] }
 0x338   : > { %4849 = vmatpush3.msra.mxu0 %v3328_v22  ;;  %4884 = vmatpush3.msra.mxu1 %v3360_v23  ;;  %v3398_v20 = vld [vmem:[%s8165_s7 + $0x468] sm:$0xff]  ;;  %v3413_v22 = vld [vmem:[%s8165_s7 + $0x4e0] sm:$0xff] }
 0x339   : > { %4850 = vmatprep.subr.mxu0 %v3343_v26  ;;  %4885 = vmatprep.subr.mxu1 %v3375_v53  ;;  %v3430_v21 = vld [vmem:[%s8165_s7 + $0x568] sm:$0xff]  ;;  %v3445_v23 = vld [vmem:[%s8165_s7 + $0x5e0] sm:$0xff] }
 0x33a   : > { %4851 = vmatpush3.msra.mxu0 %v3327_v27  ;;  %4886 = vmatpush3.msra.mxu1 %v3359_v28  ;;  %v3397_v26 = vld [vmem:[%s8165_s7 + $0x460] sm:$0xff]  ;;  %v3412_v27 = vld [vmem:[%s8165_s7 + $0x4d8] sm:$0xff] }
 0x33b   : > { %4852 = vmatprep.subr.mxu0 %v3342_v44  ;;  %4887 = vmatprep.subr.mxu1 %v3374_v29  ;;  %v3429_v53 = vld [vmem:[%s8165_s7 + $0x560] sm:$0xff]  ;;  %v3444_v28 = vld [vmem:[%s8165_s7 + $0x5d8] sm:$0xff] }
 0x33c   : > { %4853 = vmatpush3.msra.mxu0 %v3326_v31  ;;  %4888 = vmatpush3.msra.mxu1 %v3358_v32  ;;  %v3396_v44 = vld [vmem:[%s8165_s7 + $0x458] sm:$0xff]  ;;  %v3411_v31 = vld [vmem:[%s8165_s7 + $0x4d0] sm:$0xff] }
 0x33d   : > { %4854 = vmatprep.subr.mxu0 %v3341_v33  ;;  %4889 = vmatprep.subr.mxu1 %v3373_v34  ;;  %v3428_v29 = vld [vmem:[%s8165_s7 + $0x558] sm:$0xff]  ;;  %v3443_v32 = vld [vmem:[%s8165_s7 + $0x5d0] sm:$0xff] }
 0x33e   : > { %4855 = vmatpush3.msra.mxu0 %v3325_v35  ;;  %4890 = vmatpush3.msra.mxu1 %v3357_v36  ;;  %v3395_v33 = vld [vmem:[%s8165_s7 + $0x450] sm:$0xff]  ;;  %v3410_v35 = vld [vmem:[%s8165_s7 + $0x4c8] sm:$0xff] }
 0x33f   : > { %4856 = vmatprep.subr.mxu0 %v3340_v37  ;;  %4891 = vmatprep.subr.mxu1 %v3372_v38  ;;  %v3427_v34 = vld [vmem:[%s8165_s7 + $0x550] sm:$0xff]  ;;  %v3442_v36 = vld [vmem:[%s8165_s7 + $0x5c8] sm:$0xff] }
 0x340   : > { %4857 = vmatpush3.msra.mxu0 %v3324_v39  ;;  %4892 = vmatpush3.msra.mxu1 %v3356_v41  ;;  %v3394_v37 = vld [vmem:[%s8165_s7 + $0x448] sm:$0xff]  ;;  %v3409_v39 = vld [vmem:[%s8165_s7 + $0x4c0] sm:$0xff] }
 0x341   : > { %4858 = vmatprep.subr.mxu0 %v3339_v17  ;;  %4893 = vmatprep.subr.mxu1 %v3371_v46  ;;  %v3426_v38 = vld [vmem:[%s8165_s7 + $0x548] sm:$0xff]  ;;  %v3441_v41 = vld [vmem:[%s8165_s7 + $0x5c0] sm:$0xff] }
 0x342   : > { %4859 = vmatpush3.msra.mxu0 %v3323_v47  ;;  %4894 = vmatpush3.msra.mxu1 %v3355_v48  ;;  %v3393_v17 = vld [vmem:[%s8165_s7 + $0x440] sm:$0xff]  ;;  %v3408_v47 = vld [vmem:[%s8165_s7 + $0x4b8] sm:$0xff] }
 0x343   : > { %4860 = vmatprep.subr.mxu0 %v3338_v50  ;;  %4895 = vmatprep.subr.mxu1 %v3370_v51  ;;  %v3425_v46 = vld [vmem:[%s8165_s7 + $0x540] sm:$0xff]  ;;  %v3440_v48 = vld [vmem:[%s8165_s7 + $0x5b8] sm:$0xff] }
 0x344   : > { %4861 = vmatpush3.msra.mxu0 %v3322_v56  ;;  %4896 = vmatpush3.msra.mxu1 %v3354_v57  ;;  %v3392_v50 = vld [vmem:[%s8165_s7 + $0x438] sm:$0xff]  ;;  %v3391_v56 = vld [vmem:[%s8165_s7 + $0x430] sm:$0xff] }
 0x345   : > { %4862 = vmatprep.subr.mxu0 %v3337_v24  ;;  %4897 = vmatprep.subr.mxu1 %v3369_v62  ;;  %v3424_v51 = vld [vmem:[%s8165_s7 + $0x538] sm:$0xff]  ;;  %v3423_v57 = vld [vmem:[%s8165_s7 + $0x530] sm:$0xff]  ;;  %v3406_v24 = vld [vmem:[%s8165_s7 + $0x4a8] sm:$0xff] }
 0x346   : > { %4863 = vmatpush3.msra.mxu0 %v3321_v0  ;;  %4898 = vmatpush3.msra.mxu1 %v3353_v1  ;;  %v3438_v62 = vld [vmem:[%s8165_s7 + $0x5a8] sm:$0xff]  ;;  %v3405_v1 = vld [vmem:[%s8165_s7 + $0x4a0] sm:$0xff] }
 0x347   : > { %3788 = vmatmul.mubr.f32.vlgmr.msra.gmra.mxu0 %v2756_v6  ;;  %3858 = vmatmul.mubr.f32.vlgmr.msra.gmra.mxu1 %v2827_v8  ;;  %v3422_v0 = vld [vmem:[%s8165_s7 + $0x528] sm:$0xff]  ;;  %v3421_v6 = vld [vmem:[%s8165_s7 + $0x520] sm:$0xff]  ;;  %v3436_v8 = vld [vmem:[%s8165_s7 + $0x598] sm:$0xff] }
 0x348   : > { %4902 = vmatprep.subr.mxu0 %v3416_v9  ;;  %4937 = vmatprep.subr.mxu1 %v3448_v10  ;;  %v3388_v9 = vld [vmem:[%s8165_s7 + $0x418] sm:$0xff] }
 0x349   : > { %4903 = vmatpush3.msra.mxu0 %v3400_v11  ;;  %3927 = vmatprep.mubr.f32.mxu0 %v2900_v40  ;;  %v3420_v10 = vld [vmem:[%s8165_s7 + $0x518] sm:$0xff]  ;;  %v3403_v11 = vld [vmem:[%s8165_s7 + $0x490] sm:$0xff] }
 0x34a   : > { %4938 = vmatpush3.msra.mxu1 %v3432_v61  ;;  %3997 = vmatprep.mubr.f32.mxu1 %v2971_v12  ;;  %v3435_v40 = vld [vmem:[%s8165_s7 + $0x590] sm:$0xff] }
 0x34b   : > { %4904 = vmatprep.subr.mxu0 %v3415_v14  ;;  %4939 = vmatprep.subr.mxu1 %v3447_v15  ;;  %v3387_v61 = vld [vmem:[%s8165_s7 + $0x410] sm:$0xff]  ;;  %v7644_v14 = vpop.f32.mrf.mxu0  ;;  %v3402_v15 = vld [vmem:[%s8165_s7 + $0x488] sm:$0xff] }
 0x34c   : > { %4905 = vmatpush3.msra.mxu0 %v3399_v16  ;;  %4940 = vmatpush3.msra.mxu1 %v3431_v18  ;;  %v3419_v12 = vld [vmem:[%s8165_s7 + $0x510] sm:$0xff]  ;;  %v3434_v16 = vld [vmem:[%s8165_s7 + $0x588] sm:$0xff]  ;;  %v2487_v18 = vrot.slane %v7456_v59, %v6068_v58 }
 0x34d   : > { %4906 = vmatprep.subr.mxu0 %v3414_v42  ;;  %4941 = vmatprep.subr.mxu1 %v3446_v19  ;;  %v7654_v42 = vpop.f32.mrf.mxu1  ;;  %v2479_v19 = vrot.slane %v7456_v59, %v6038_v43 }
 0x34e   : > { %4907 = vmatpush3.msra.mxu0 %v3398_v20  ;;  %4942 = vmatpush3.msra.mxu1 %v3430_v21  ;;  %v3386_v20 = vld [vmem:[%s8165_s7 + $0x408] sm:$0xff] }
 0x34f   : > { %4908 = vmatprep.subr.mxu0 %v3413_v22  ;;  %4943 = vmatprep.subr.mxu1 %v3445_v23  ;;  %v3418_v21 = vld [vmem:[%s8165_s7 + $0x508] sm:$0xff]  ;;  %v3401_v22 = vld [vmem:[%s8165_s7 + $0x480] sm:$0xff] }
 0x350   : > { %4909 = vmatpush3.msra.mxu0 %v3397_v26  ;;  %4944 = vmatpush3.msra.mxu1 %v3429_v53  ;;  %v3433_v23 = vld [vmem:[%s8165_s7 + $0x580] sm:$0xff]  ;;  %v2499_v26 = vrot.slane %v7456_v59, %v6150_v30  ;;  %v2898_v30 = vadd.f32 %v7433_v49, %v2479_v19  ;;  %v3496_v49 = vld [vmem:[%s8165_s7 + $0x778] sm:$0xff]  ;;  %v3487_v19 = vld [vmem:[%s8165_s7 + $0x730] sm:$0xff] }
 0x351   : > { %4910 = vmatprep.subr.mxu0 %v3412_v27  ;;  %4945 = vmatprep.subr.mxu1 %v3444_v28  ;;  %v3385_v53 = vld [vmem:[%s8165_s7 + $0x400] sm:$0xff]  ;;  %v2507_v28 = vrot.slane %v7456_v59, %v6223_v2  ;;  %v3464_v2 = vld [vmem:[%s8165_s7 + $0x678] sm:$0xff] }
 0x352   : > { %4911 = vmatpush3.msra.mxu0 %v3396_v44  ;;  %4946 = vmatpush3.msra.mxu1 %v3428_v29  ;;  %v3417_v27 = vld [vmem:[%s8165_s7 + $0x500] sm:$0xff]  ;;  %v3041_v44 = vpop.f32.mrf.mxu0  ;;  %v2969_v29 = vadd.f32 %v7443_v54, %v2487_v18  ;;  %v3455_v18 = vld [vmem:[%s8165_s7 + $0x630] sm:$0xff] }
 0x353   : > { %4912 = vmatprep.subr.mxu0 %v3411_v31  ;;  %4947 = vmatprep.subr.mxu1 %v3443_v32  ;;  %v3112_v31 = vpop.f32.mrf.mxu1  ;;  %v3480_v32 = vld [vmem:[%s8165_s7 + $0x6f8] sm:$0xff]  ;;  %v3042_v54 = vadd.f32 %v3041_v44, %v2499_v26  ;;  %v3469_v26 = vld [vmem:[%s8165_s7 + $0x6a0] sm:$0xff] }
 0x354   : > { %4913 = vmatpush3.msra.mxu0 %v3395_v33  ;;  %4948 = vmatpush3.msra.mxu1 %v3427_v34  ;;  %v3512_v33 = vld [vmem:[%s8165_s7 + $0x7f8] sm:$0xff]  ;;  %v3113_v34 = vadd.f32 %v3112_v31, %v2507_v28  ;;  %v3485_v28 = vld [vmem:[%s8165_s7 + $0x720] sm:$0xff] }
 0x355   : > { %4914 = vmatprep.subr.mxu0 %v3410_v35  ;;  %4949 = vmatprep.subr.mxu1 %v3442_v36  ;;  %v3479_v35 = vld [vmem:[%s8165_s7 + $0x6f0] sm:$0xff]  ;;  %v3468_v44 = vld [vmem:[%s8165_s7 + $0x698] sm:$0xff] }
 0x356   : > { %4915 = vmatpush3.msra.mxu0 %v3394_v37  ;;  %4950 = vmatpush3.msra.mxu1 %v3426_v38  ;;  %v3511_v36 = vld [vmem:[%s8165_s7 + $0x7f0] sm:$0xff]  ;;  %v3452_v31 = vld [vmem:[%s8165_s7 + $0x618] sm:$0xff] }
 0x357   : > { %4916 = vmatprep.subr.mxu0 %v3409_v39  ;;  %4951 = vmatprep.subr.mxu1 %v3441_v41  ;;  %v3463_v37 = vld [vmem:[%s8165_s7 + $0x670] sm:$0xff]  ;;  %v3478_v39 = vld [vmem:[%s8165_s7 + $0x6e8] sm:$0xff] }
 0x358   : > { %4917 = vmatpush3.msra.mxu0 %v3393_v17  ;;  %4952 = vmatpush3.msra.mxu1 %v3425_v46  ;;  %v3495_v38 = vld [vmem:[%s8165_s7 + $0x770] sm:$0xff]  ;;  %v3510_v41 = vld [vmem:[%s8165_s7 + $0x7e8] sm:$0xff] }
 0x359   : > { %4918 = vmatprep.subr.mxu0 %v3408_v47  ;;  %4953 = vmatprep.subr.mxu1 %v3440_v48  ;;  %v3462_v17 = vld [vmem:[%s8165_s7 + $0x668] sm:$0xff]  ;;  %v3477_v47 = vld [vmem:[%s8165_s7 + $0x6e0] sm:$0xff] }
 0x35a   : > { %4919 = vmatpush3.msra.mxu0 %v3392_v50  ;;  %4954 = vmatpush3.msra.mxu1 %v3424_v51  ;;  %v3494_v46 = vld [vmem:[%s8165_s7 + $0x768] sm:$0xff]  ;;  %v3509_v48 = vld [vmem:[%s8165_s7 + $0x7e0] sm:$0xff] }
 0x35b   : > { %4920 = vmatprep.subr.mxu0 %v3407_v52  ;;  %4955 = vmatprep.subr.mxu1 %v3439_v55  ;;  %v3461_v50 = vld [vmem:[%s8165_s7 + $0x660] sm:$0xff]  ;;  %v3476_v52 = vld [vmem:[%s8165_s7 + $0x6d8] sm:$0xff] }
 0x35c   : > { %4921 = vmatpush3.msra.mxu0 %v3391_v56  ;;  %4956 = vmatpush3.msra.mxu1 %v3423_v57  ;;  %v3493_v51 = vld [vmem:[%s8165_s7 + $0x760] sm:$0xff]  ;;  %v3508_v55 = vld [vmem:[%s8165_s7 + $0x7d8] sm:$0xff] }
 0x35d   : > { %4922 = vmatprep.subr.mxu0 %v3406_v24  ;;  %4957 = vmatprep.subr.mxu1 %v3438_v62  ;;  %v3460_v56 = vld [vmem:[%s8165_s7 + $0x658] sm:$0xff]  ;;  %v3475_v24 = vld [vmem:[%s8165_s7 + $0x6d0] sm:$0xff] }
 0x35e   : > { %4923 = vmatpush3.msra.mxu0 %v3390_v63  ;;  %4958 = vmatpush3.msra.mxu1 %v3422_v0  ;;  %v3492_v57 = vld [vmem:[%s8165_s7 + $0x758] sm:$0xff]  ;;  %v3507_v62 = vld [vmem:[%s8165_s7 + $0x7d0] sm:$0xff] }
 0x35f   : > { %4924 = vmatprep.subr.mxu0 %v3405_v1  ;;  %4959 = vmatprep.subr.mxu1 %v3437_v3  ;;  %v3459_v63 = vld [vmem:[%s8165_s7 + $0x650] sm:$0xff]  ;;  %v3474_v1 = vld [vmem:[%s8165_s7 + $0x6c8] sm:$0xff] }
 0x360   : > { %4925 = vmatpush3.msra.mxu0 %v3389_v5  ;;  %4960 = vmatpush3.msra.mxu1 %v3421_v6  ;;  %v3491_v0 = vld [vmem:[%s8165_s7 + $0x750] sm:$0xff]  ;;  %v3506_v3 = vld [vmem:[%s8165_s7 + $0x7c8] sm:$0xff] }
 0x361   : > { %4926 = vmatprep.subr.mxu0 %v3404_v7  ;;  %4961 = vmatprep.subr.mxu1 %v3436_v8  ;;  %v3458_v5 = vld [vmem:[%s8165_s7 + $0x648] sm:$0xff]  ;;  %v3473_v7 = vld [vmem:[%s8165_s7 + $0x6c0] sm:$0xff] }
 0x362   : > { %4927 = vmatpush3.msra.mxu0 %v3388_v9  ;;  %4962 = vmatpush3.msra.mxu1 %v3420_v10  ;;  %v3490_v6 = vld [vmem:[%s8165_s7 + $0x748] sm:$0xff]  ;;  %v3505_v8 = vld [vmem:[%s8165_s7 + $0x7c0] sm:$0xff] }
 0x363   : > { %4928 = vmatprep.subr.mxu0 %v3403_v11  ;;  %4963 = vmatprep.subr.mxu1 %v3435_v40  ;;  %v3457_v9 = vld [vmem:[%s8165_s7 + $0x640] sm:$0xff]  ;;  %v3472_v11 = vld [vmem:[%s8165_s7 + $0x6b8] sm:$0xff] }
 0x364   : > { %4929 = vmatpush3.msra.mxu0 %v3387_v61  ;;  %4964 = vmatpush3.msra.mxu1 %v3419_v12  ;;  %v3489_v10 = vld [vmem:[%s8165_s7 + $0x740] sm:$0xff]  ;;  %v3504_v40 = vld [vmem:[%s8165_s7 + $0x7b8] sm:$0xff] }
 0x365   : > { %4930 = vmatprep.subr.mxu0 %v3402_v15  ;;  %4965 = vmatprep.subr.mxu1 %v3434_v16  ;;  %v3456_v61 = vld [vmem:[%s8165_s7 + $0x638] sm:$0xff]  ;;  %v3471_v15 = vld [vmem:[%s8165_s7 + $0x6b0] sm:$0xff] }
 0x366   : > { %4931 = vmatpush3.msra.mxu0 %v3386_v20  ;;  %4966 = vmatpush3.msra.mxu1 %v3418_v21  ;;  %v3488_v12 = vld [vmem:[%s8165_s7 + $0x738] sm:$0xff]  ;;  %v3503_v16 = vld [vmem:[%s8165_s7 + $0x7b0] sm:$0xff]  ;;  %v3470_v20 = vld [vmem:[%s8165_s7 + $0x6a8] sm:$0xff] }
 0x367   : > { %4932 = vmatprep.subr.mxu0 %v3401_v22  ;;  %4967 = vmatprep.subr.mxu1 %v3433_v23  ;;  %v3502_v21 = vld [vmem:[%s8165_s7 + $0x7a8] sm:$0xff] }
 0x368   : > { %4933 = vmatpush3.msra.mxu0 %v3385_v53  ;;  %4968 = vmatpush3.msra.mxu1 %v3417_v27  ;;  %v3454_v22 = vld [vmem:[%s8165_s7 + $0x628] sm:$0xff]  ;;  %v3501_v53 = vld [vmem:[%s8165_s7 + $0x7a0] sm:$0xff] }
 0x369   : > { %3928 = vmatmul.mubr.f32.vlgmr.msra.gmra.mxu0 %v2898_v30  ;;  %3998 = vmatmul.mubr.f32.vlgmr.msra.gmra.mxu1 %v2969_v29  ;;  %v3486_v23 = vld [vmem:[%s8165_s7 + $0x728] sm:$0xff]  ;;  %v3453_v27 = vld [vmem:[%s8165_s7 + $0x620] sm:$0xff]  ;;  %v3500_v29 = vld [vmem:[%s8165_s7 + $0x798] sm:$0xff] }
 0x36a   : > { %4972 = vmatprep.subr.mxu0 %v3480_v32  ;;  %5007 = vmatprep.subr.mxu1 %v3512_v33  ;;  %v3484_v30 = vld [vmem:[%s8165_s7 + $0x718] sm:$0xff]  ;;  %v3467_v32 = vld [vmem:[%s8165_s7 + $0x690] sm:$0xff] }
 0x36b   : > { %4973 = vmatpush3.msra.mxu0 %v3464_v2  ;;  %4067 = vmatprep.mubr.f32.mxu0 %v3042_v54  ;;  %v3499_v33 = vld [vmem:[%s8165_s7 + $0x790] sm:$0xff] }
 0x36c   : > { %5008 = vmatpush3.msra.mxu1 %v3496_v49  ;;  %4137 = vmatprep.mubr.f32.mxu1 %v3113_v34  ;;  %v3451_v2 = vld [vmem:[%s8165_s7 + $0x610] sm:$0xff]  ;;  %v7850_v49 = vpop.f32.mrf.mxu0  ;;  %v3466_v34 = vld [vmem:[%s8165_s7 + $0x688] sm:$0xff] }
 0x36d   : > { %4974 = vmatprep.subr.mxu0 %v3479_v35  ;;  %5009 = vmatprep.subr.mxu1 %v3511_v36  ;;  %v3483_v54 = vld [vmem:[%s8165_s7 + $0x710] sm:$0xff]  ;;  %v3498_v35 = vld [vmem:[%s8165_s7 + $0x788] sm:$0xff]  ;;  %v2503_v36 = vrot.slane %v7456_v59, %v6250_v13  ;;  %v3497_v13 = vld [vmem:[%s8165_s7 + $0x780] sm:$0xff] }
 0x36e   : > { %4975 = vmatpush3.msra.mxu0 %v3463_v37  ;;  %5010 = vmatpush3.msra.mxu1 %v3495_v38  ;;  %v7860_v37 = vpop.f32.mrf.mxu1  ;;  %v2495_v38 = vrot.slane %v7456_v59, %v6135_v25  ;;  %v3465_v25 = vld [vmem:[%s8165_s7 + $0x680] sm:$0xff] }
 0x36f   : > { %4976 = vmatprep.subr.mxu0 %v3478_v39  ;;  %5011 = vmatprep.subr.mxu1 %v3510_v41  ;;  %v3450_v39 = vld [vmem:[%s8165_s7 + $0x608] sm:$0xff] }
 0x370   : > { %4977 = vmatpush3.msra.mxu0 %v3462_v17  ;;  %5012 = vmatpush3.msra.mxu1 %v3494_v46  ;;  %v3482_v41 = vld [vmem:[%s8165_s7 + $0x708] sm:$0xff]  ;;  %v7873_v17 = vld [vmem:[%s8164_s6 + $0x10] sm:$0xf]  ;;  %v3449_v46 = vld [vmem:[%s8165_s7 + $0x600] sm:$0xff] }
 0x371   : > { %4978 = vmatprep.subr.mxu0 %v3477_v47  ;;  %5013 = vmatprep.subr.mxu1 %v3509_v48  ;;  %v2515_v59 = vrot.slane %v7873_v17, %v6046_v45  ;;  %v3481_v47 = vld [vmem:[%s8165_s7 + $0x700] sm:$0xff]  ;;  %v2523_v48 = vrot.slane %v7873_v17, %v6074_v60  ;;  %v3040_v45 = vadd.f32 %v7644_v14, %v2495_v38  ;;  %v3528_v60 = vld [vmem:[%s8165_s7 + $0x878] sm:$0xff] }
 0x372   : > { %4979 = vmatpush3.msra.mxu0 %v3461_v50  ;;  %5014 = vmatpush3.msra.mxu1 %v3493_v51  ;;  %v3183_v50 = vpop.f32.mrf.mxu0  ;;  %v3111_v51 = vadd.f32 %v7654_v42, %v2503_v36  ;;  %v3560_v42 = vld [vmem:[%s8165_s7 + $0x978] sm:$0xff]  ;;  %v3530_v36 = vld [vmem:[%s8165_s7 + $0x888] sm:$0xff]  ;;  %v2511_v38 = vrot.slane %v7873_v17, %v6038_v43  ;;  %v3513_v43 = vld [vmem:[%s8165_s7 + $0x800] sm:$0xff] }
 0x373   : > { %4980 = vmatprep.subr.mxu0 %v3476_v52  ;;  %5015 = vmatprep.subr.mxu1 %v3508_v55  ;;  %v3254_v52 = vpop.f32.mrf.mxu1  ;;  %v3544_v55 = vld [vmem:[%s8165_s7 + $0x8f8] sm:$0xff] }
 0x374   : > { %4981 = vmatpush3.msra.mxu0 %v3460_v56  ;;  %5016 = vmatpush3.msra.mxu1 %v3492_v57  ;;  %v3184_v56 = vadd.f32 %v3183_v50, %v2515_v59  ;;  %v3255_v14 = vadd.f32 %v3254_v52, %v2523_v48  ;;  %v3543_v57 = vld [vmem:[%s8165_s7 + $0x8f0] sm:$0xff]  ;;  %v3182_v59 = vadd.f32 %v7850_v49, %v2511_v38  ;;  %v3566_v48 = vld [vmem:[%s8165_s7 + $0x9a8] sm:$0xff]  ;;  %v3565_v50 = vld [vmem:[%s8165_s7 + $0x9a0] sm:$0xff] }
 0x375   : > { %4982 = vmatprep.subr.mxu0 %v3475_v24  ;;  %5017 = vmatprep.subr.mxu1 %v3507_v62  ;;  %v3527_v24 = vld [vmem:[%s8165_s7 + $0x870] sm:$0xff] }
 0x376   : > { %4983 = vmatpush3.msra.mxu0 %v3459_v63  ;;  %5018 = vmatpush3.msra.mxu1 %v3491_v0  ;;  %v3559_v62 = vld [vmem:[%s8165_s7 + $0x970] sm:$0xff]  ;;  %v3542_v63 = vld [vmem:[%s8165_s7 + $0x8e8] sm:$0xff] }
 0x377   : > { %4984 = vmatprep.subr.mxu0 %v3474_v1  ;;  %5019 = vmatprep.subr.mxu1 %v3506_v3  ;;  %v3526_v0 = vld [vmem:[%s8165_s7 + $0x868] sm:$0xff]  ;;  %v3541_v3 = vld [vmem:[%s8165_s7 + $0x8e0] sm:$0xff]  ;;  %v3567_v49 = vld [vmem:[%s8165_s7 + $0x9b0] sm:$0xff] }
 0x378   : > { %4985 = vmatpush3.msra.mxu0 %v3458_v5  ;;  %5020 = vmatpush3.msra.mxu1 %v3490_v6  ;;  %v3558_v1 = vld [vmem:[%s8165_s7 + $0x968] sm:$0xff]  ;;  %v3525_v5 = vld [vmem:[%s8165_s7 + $0x860] sm:$0xff]  ;;  %v3563_v52 = vld [vmem:[%s8165_s7 + $0x990] sm:$0xff] }
 0x379   : > { %4986 = vmatprep.subr.mxu0 %v3473_v7  ;;  %5021 = vmatprep.subr.mxu1 %v3505_v8  ;;  %v3557_v6 = vld [vmem:[%s8165_s7 + $0x960] sm:$0xff]  ;;  %v3540_v7 = vld [vmem:[%s8165_s7 + $0x8d8] sm:$0xff] }
 0x37a   : > { %4987 = vmatpush3.msra.mxu0 %v3457_v9  ;;  %5022 = vmatpush3.msra.mxu1 %v3489_v10  ;;  %v3524_v8 = vld [vmem:[%s8165_s7 + $0x858] sm:$0xff]  ;;  %v3539_v10 = vld [vmem:[%s8165_s7 + $0x8d0] sm:$0xff] }
 0x37b   : > { %4988 = vmatprep.subr.mxu0 %v3472_v11  ;;  %5023 = vmatprep.subr.mxu1 %v3504_v40  ;;  %v3556_v9 = vld [vmem:[%s8165_s7 + $0x958] sm:$0xff]  ;;  %v3523_v11 = vld [vmem:[%s8165_s7 + $0x850] sm:$0xff] }
 0x37c   : > { %4989 = vmatpush3.msra.mxu0 %v3456_v61  ;;  %5024 = vmatpush3.msra.mxu1 %v3488_v12  ;;  %v3555_v40 = vld [vmem:[%s8165_s7 + $0x950] sm:$0xff]  ;;  %v3538_v61 = vld [vmem:[%s8165_s7 + $0x8c8] sm:$0xff] }
 0x37d   : > { %4990 = vmatprep.subr.mxu0 %v3471_v15  ;;  %5025 = vmatprep.subr.mxu1 %v3503_v16  ;;  %v3522_v12 = vld [vmem:[%s8165_s7 + $0x848] sm:$0xff]  ;;  %v3537_v16 = vld [vmem:[%s8165_s7 + $0x8c0] sm:$0xff] }
 0x37e   : > { %4991 = vmatpush3.msra.mxu0 %v3455_v18  ;;  %5026 = vmatpush3.msra.mxu1 %v3487_v19  ;;  %v3554_v15 = vld [vmem:[%s8165_s7 + $0x948] sm:$0xff]  ;;  %v3521_v18 = vld [vmem:[%s8165_s7 + $0x840] sm:$0xff] }
 0x37f   : > { %4992 = vmatprep.subr.mxu0 %v3470_v20  ;;  %5027 = vmatprep.subr.mxu1 %v3502_v21  ;;  %v3553_v19 = vld [vmem:[%s8165_s7 + $0x940] sm:$0xff]  ;;  %v3536_v20 = vld [vmem:[%s8165_s7 + $0x8b8] sm:$0xff] }
 0x380   : > { %4993 = vmatpush3.msra.mxu0 %v3454_v22  ;;  %5028 = vmatpush3.msra.mxu1 %v3486_v23  ;;  %v3520_v21 = vld [vmem:[%s8165_s7 + $0x838] sm:$0xff]  ;;  %v3535_v23 = vld [vmem:[%s8165_s7 + $0x8b0] sm:$0xff] }
 0x381   : > { %4994 = vmatprep.subr.mxu0 %v3469_v26  ;;  %5029 = vmatprep.subr.mxu1 %v3501_v53  ;;  %v3552_v22 = vld [vmem:[%s8165_s7 + $0x938] sm:$0xff]  ;;  %v3519_v26 = vld [vmem:[%s8165_s7 + $0x830] sm:$0xff] }
 0x382   : > { %4995 = vmatpush3.msra.mxu0 %v3453_v27  ;;  %5030 = vmatpush3.msra.mxu1 %v3485_v28  ;;  %v3551_v53 = vld [vmem:[%s8165_s7 + $0x930] sm:$0xff]  ;;  %v3534_v27 = vld [vmem:[%s8165_s7 + $0x8a8] sm:$0xff] }
 0x383   : > { %4996 = vmatprep.subr.mxu0 %v3468_v44  ;;  %5031 = vmatprep.subr.mxu1 %v3500_v29  ;;  %v3518_v28 = vld [vmem:[%s8165_s7 + $0x828] sm:$0xff]  ;;  %v3533_v29 = vld [vmem:[%s8165_s7 + $0x8a0] sm:$0xff] }
 0x384   : > { %4997 = vmatpush3.msra.mxu0 %v3452_v31  ;;  %5032 = vmatpush3.msra.mxu1 %v3484_v30  ;;  %v3550_v44 = vld [vmem:[%s8165_s7 + $0x928] sm:$0xff]  ;;  %v3517_v31 = vld [vmem:[%s8165_s7 + $0x820] sm:$0xff] }
 0x385   : > { %4998 = vmatprep.subr.mxu0 %v3467_v32  ;;  %5033 = vmatprep.subr.mxu1 %v3499_v33  ;;  %v3549_v30 = vld [vmem:[%s8165_s7 + $0x920] sm:$0xff]  ;;  %v3532_v32 = vld [vmem:[%s8165_s7 + $0x898] sm:$0xff] }
 0x386   : > { %4999 = vmatpush3.msra.mxu0 %v3451_v2  ;;  %5034 = vmatpush3.msra.mxu1 %v3483_v54  ;;  %v3516_v33 = vld [vmem:[%s8165_s7 + $0x818] sm:$0xff]  ;;  %v3531_v54 = vld [vmem:[%s8165_s7 + $0x890] sm:$0xff] }
 0x387   : > { %5000 = vmatprep.subr.mxu0 %v3466_v34  ;;  %5035 = vmatprep.subr.mxu1 %v3498_v35  ;;  %v3548_v2 = vld [vmem:[%s8165_s7 + $0x918] sm:$0xff]  ;;  %v3515_v34 = vld [vmem:[%s8165_s7 + $0x810] sm:$0xff] }
 0x388   : > { %5001 = vmatpush3.msra.mxu0 %v3450_v39  ;;  %5036 = vmatpush3.msra.mxu1 %v3482_v41  ;;  %v3547_v35 = vld [vmem:[%s8165_s7 + $0x910] sm:$0xff]  ;;  %v3514_v39 = vld [vmem:[%s8165_s7 + $0x808] sm:$0xff] }
 0x389   : > { %5002 = vmatprep.subr.mxu0 %v3465_v25  ;;  %5037 = vmatprep.subr.mxu1 %v3497_v13  ;;  %v3546_v41 = vld [vmem:[%s8165_s7 + $0x908] sm:$0xff]  ;;  %v3529_v25 = vld [vmem:[%s8165_s7 + $0x880] sm:$0xff] }
 0x38a   : > { %5003 = vmatpush3.msra.mxu0 %v3449_v46  ;;  %5038 = vmatpush3.msra.mxu1 %v3481_v47  ;;  %v3545_v13 = vld [vmem:[%s8165_s7 + $0x900] sm:$0xff]  ;;  %v3568_v47 = vld [vmem:[%s8165_s7 + $0x9b8] sm:$0xff] }
 0x38b   : > { %4068 = vmatmul.mubr.f32.vlgmr.msra.gmra.mxu0 %v3040_v45  ;;  %4138 = vmatmul.mubr.f32.vlgmr.msra.gmra.mxu1 %v3111_v51  ;;  %v3569_v46 = vld [vmem:[%s8165_s7 + $0x9c0] sm:$0xf]  ;;  %v3564_v51 = vld [vmem:[%s8165_s7 + $0x998] sm:$0xff]  ;;  %v2519_v45 = vrot.slane %v7873_v17, %v6068_v58 }
 0x38c   : > { %5042 = vmatprep.subr.mxu0 %v3544_v55  ;;  %4213 = vmatprep.subr.mxu1 %v5214_v4  ;;  %v3562_v55 = vld [vmem:[%s8165_s7 + $0x988] sm:$0xff] }
 0x38d   : > { %5043 = vmatpush3.msra.mxu0 %v3528_v60  ;;  %4207 = vmatprep.mubr.f32.mxu0 %v3184_v56  ;;  %v3561_v60 = vld [vmem:[%s8165_s7 + $0x980] sm:$0xff]  ;;  %v3253_v56 = vadd.f32 %v7860_v37, %v2519_v45 }
 0x38e   : > { %4214 = vmatpush1.msra.mxu1 %v3560_v42  ;;  %4440 = vmatprep.mubr.msk.f32.mxu1 %vm1687_vm1, %v3255_v14 }
 0x38f   : > { %5044 = vmatprep.subr.mxu0 %v3543_v57  ;;  %4215 = vmatprep.subr.mxu1 %v5214_v4 }
 0x390   : > { %5045 = vmatpush3.msra.mxu0 %v3527_v24  ;;  %4216 = vmatpush1.msra.mxu1 %v3559_v62 }
 0x391   : > { %5046 = vmatprep.subr.mxu0 %v3542_v63  ;;  %4217 = vmatprep.subr.mxu1 %v5214_v4 }
 0x392   : > { %5047 = vmatpush3.msra.mxu0 %v3526_v0  ;;  %4218 = vmatpush1.msra.mxu1 %v3558_v1 }
 0x393   : > { %5048 = vmatprep.subr.mxu0 %v3541_v3  ;;  %4219 = vmatprep.subr.mxu1 %v5214_v4 }
 0x394   : > { %5049 = vmatpush3.msra.mxu0 %v3525_v5  ;;  %4220 = vmatpush1.msra.mxu1 %v3557_v6 }
 0x395   : > { %5050 = vmatprep.subr.mxu0 %v3540_v7  ;;  %4221 = vmatprep.subr.mxu1 %v5214_v4 }
 0x396   : > { %5051 = vmatpush3.msra.mxu0 %v3524_v8  ;;  %4222 = vmatpush1.msra.mxu1 %v3556_v9 }
 0x397   : > { %5052 = vmatprep.subr.mxu0 %v3539_v10  ;;  %4223 = vmatprep.subr.mxu1 %v5214_v4 }
 0x398   : > { %5053 = vmatpush3.msra.mxu0 %v3523_v11  ;;  %4224 = vmatpush1.msra.mxu1 %v3555_v40 }
 0x399   : > { %5054 = vmatprep.subr.mxu0 %v3538_v61  ;;  %4225 = vmatprep.subr.mxu1 %v5214_v4 }
 0x39a   : > { %5055 = vmatpush3.msra.mxu0 %v3522_v12  ;;  %4226 = vmatpush1.msra.mxu1 %v3554_v15 }
 0x39b   : > { %5056 = vmatprep.subr.mxu0 %v3537_v16  ;;  %4227 = vmatprep.subr.mxu1 %v5214_v4 }
 0x39c   : > { %5057 = vmatpush3.msra.mxu0 %v3521_v18  ;;  %4228 = vmatpush1.msra.mxu1 %v3553_v19 }
 0x39d   : > { %5058 = vmatprep.subr.mxu0 %v3536_v20  ;;  %4229 = vmatprep.subr.mxu1 %v5214_v4 }
 0x39e   : > { %5059 = vmatpush3.msra.mxu0 %v3520_v21  ;;  %4230 = vmatpush1.msra.mxu1 %v3552_v22 }
 0x39f   : > { %5060 = vmatprep.subr.mxu0 %v3535_v23  ;;  %4231 = vmatprep.subr.mxu1 %v5214_v4 }
 0x3a0   : > { %5061 = vmatpush3.msra.mxu0 %v3519_v26  ;;  %4232 = vmatpush1.msra.mxu1 %v3551_v53 }
 0x3a1   : > { %5062 = vmatprep.subr.mxu0 %v3534_v27  ;;  %4233 = vmatprep.subr.mxu1 %v5214_v4 }
 0x3a2   : > { %5063 = vmatpush3.msra.mxu0 %v3518_v28  ;;  %4234 = vmatpush1.msra.mxu1 %v3550_v44 }
 0x3a3   : > { %5064 = vmatprep.subr.mxu0 %v3533_v29  ;;  %4235 = vmatprep.subr.mxu1 %v5214_v4 }
 0x3a4   : > { %5065 = vmatpush3.msra.mxu0 %v3517_v31  ;;  %4236 = vmatpush1.msra.mxu1 %v3549_v30 }
 0x3a5   : > { %5066 = vmatprep.subr.mxu0 %v3532_v32  ;;  %4237 = vmatprep.subr.mxu1 %v5214_v4 }
 0x3a6   : > { %5067 = vmatpush3.msra.mxu0 %v3516_v33  ;;  %4238 = vmatpush1.msra.mxu1 %v3548_v2 }
 0x3a7   : > { %5068 = vmatprep.subr.mxu0 %v3531_v54  ;;  %4239 = vmatprep.subr.mxu1 %v5214_v4 }
 0x3a8   : > { %5069 = vmatpush3.msra.mxu0 %v3515_v34  ;;  %4240 = vmatpush1.msra.mxu1 %v3547_v35 }
 0x3a9   : > { %5070 = vmatprep.subr.mxu0 %v3530_v36  ;;  %4241 = vmatprep.subr.mxu1 %v5214_v4 }
 0x3aa   : > { %5071 = vmatpush3.msra.mxu0 %v3514_v39  ;;  %4242 = vmatpush1.msra.mxu1 %v3546_v41 }
 0x3ab   : > { %5072 = vmatprep.subr.mxu0 %v3529_v25  ;;  %4243 = vmatprep.subr.mxu1 %v5214_v4 }
 0x3ac   : > { %5073 = vmatpush3.msra.mxu0 %v3513_v43  ;;  %4244 = vmatpush1.msra.mxu1 %v3545_v13 }
 0x3ad   : > { %4208 = vmatmul.mubr.f32.vlgmr.msra.gmra.mxu0 %v3182_v59  ;;  %4259 = vmatprep.subr.mxu1 %v5214_v4 }
 0x3ae   : > { %4439 = vmatpush2.msk.msra.mxu1 %vm1691_vm2, %v3569_v46 }
 0x3af   : > { %4261 = vmatprep.subr.mxu1 %v5214_v4 }
 0x3b0   : > { %4262 = vmatpush2.msra.mxu1 %v3568_v47 }
 0x3b1   : > { %4263 = vmatprep.subr.mxu1 %v5214_v4 }
 0x3b2   : > { %4264 = vmatpush2.msra.mxu1 %v3567_v49 }
 0x3b3   : > { %4265 = vmatprep.subr.mxu1 %v5214_v4 }
 0x3b4   : > { %4266 = vmatpush2.msra.mxu1 %v3566_v48 }
 0x3b5   : > { %4267 = vmatprep.subr.mxu1 %v5214_v4 }
 0x3b6   : > { %4268 = vmatpush2.msra.mxu1 %v3565_v50 }
 0x3b7   : > { %4269 = vmatprep.subr.mxu1 %v5214_v4 }
 0x3b8   : > { %4270 = vmatpush2.msra.mxu1 %v3564_v51 }
 0x3b9   : > { %4271 = vmatprep.subr.mxu1 %v5214_v4 }
 0x3ba   : > { %4272 = vmatpush2.msra.mxu1 %v3563_v52 }
 0x3bb   : > { %4273 = vmatprep.subr.mxu1 %v5214_v4 }
 0x3bc   : > { %4274 = vmatpush2.msra.mxu1 %v3562_v55 }
 0x3bd   : > { %4275 = vmatprep.subr.mxu1 %v5214_v4 }
 0x3be   : > { %4276 = vmatpush2.msra.mxu1 %v3561_v60 }
 0x3bf   : > { %4278 = vmatmul.mubr.f32.vlgmr.msra.gmra.mxu1 %v3253_v56 }
 0x3c0   : > { %5135 = shalt.err (!%p5132_p3)
}
 0x3c1   : > { %s5136_s0 = scalar_lea.hbm %s4315_s27, 128  ;;  %s5140_s25 = scalar_lea.hbm %s8168_s10, 256 }
 0x3c2   : > { %p5137_p4 = scmp.ne.s32.totalorder %s4315_s27, %s5136_s0  ;;  %p5141_p9 = scmp.lt.s32.totalorder %s4315_s27, %s8168_s10 }
 0x3c3   : > { %p5142_p10 = scmp.lt.s32.totalorder %s5140_s25, %s5136_s0 }
 0x3c4   : > { %p5138_p7 = pnand %p5137_p4, %p5310_p5 }
 0x3c5   : > { %p5143_p11 = por %p5142_p10, %p5141_p9 }
 0x3c6   : > { %p5139_p8 = pneg %p5138_p7 }
 0x3c8   : > { %p5144_p12 = pnand %p5143_p11, %p5139_p8 }
 0x3ca   : > { %5147 = shalt.err (!%p5144_p12)
}
 0x3cb   : > { %5078 = dma.vmem_to_hbm [thread:$0]  (%p5310_p5), %s4318_s29, 128, %s4315_s27, %s4291_s11   ;;  %v4438_v14 = vld [vmem:[%s8166_s8] ss:$0 sm:$0xff] }
 0x3cc   : > { %s8178_s0 = sshll.u32 %s6923_s20, 3  ;;  %s8179_s27 = sshll.u32 %s5293_s17, 7 }
 0x3cd   : > { %s354_s1 = scalar_lea.vmem [#allocation2], %s8178_s0  ;;  %s4302_s12 = scalar_lea.hbm %s8167_s9, %s8179_s27 }
 0x3ce   : > { %s4304_s28 = sshll.u32 %s354_s1, 4  ;;  %s4286_s18 = scalar_lea.sflag [#allocation3], %s6923_s20  ;;  %s4305_s28 = int_to_ptr.vmem [resolvable:$true] %s4304_s28 }
 0x3cf   : > { %s5148_s30 = scalar_lea.vmem %s4305_s28, 128  ;;  %s5216_s21 = smov [#allocation2]  }
 0x3d0   : > { %p5149_p13 = scmp.ne.s32.totalorder %s4305_s28, %s5148_s30  ;;  %s5152_s25 = sshll.u32 %s5216_s21, 4  ;;  %s5153_s25 = int_to_ptr.vmem [resolvable:$false] %s5152_s25 }
 0x3d1   : > { %s5154_s22 = scalar_lea.vmem %s5153_s25, 256  ;;  %p5155_p2 = scmp.lt.s32.totalorder %s4305_s28, %s5153_s25 }
 0x3d2   : > { %p5150_p0 = pnand %p5149_p13, %p5310_p5  ;;  %p5156_p3 = scmp.lt.s32.totalorder %s5154_s22, %s5148_s30 }
 0x3d4   : > { %p5151_p1 = pneg %p5150_p0  ;;  %p5157_p4 = por %p5156_p3, %p5155_p2 }
 0x3d6   : > { %p5158_p7 = pnand %p5157_p4, %p5151_p1 }
 0x3e6   : > { %v4794_v4 = vpop.f32.mrf.mxu0  ;;  %v4829_v37 = vpop.f32.mrf.mxu1 }
 0x3e8   : > { %v4795_v58 = vpop.f32.mrf.mxu0  ;;  %v4830_v57 = vpop.f32.mrf.mxu1 }
 0x3e9   : > { %v4796_v42 = vadd.f32 %v4795_v58, %v4794_v4  ;;  %v4831_v1 = vadd.f32 %v4830_v57, %v4829_v37 }
 0x3eb   : > { %v3650_v62 = vadd.f32 %v4796_v42, %v4438_v14 }
 0x3ed   : > { %v3720_v5 = vadd.f32 %v4831_v1, %v3650_v62 }
 0x407   : > { %v4864_v17 = vpop.f32.mrf.mxu0  ;;  %v4899_v63 = vpop.f32.mrf.mxu1 }
 0x409   : > { %v4865_v24 = vpop.f32.mrf.mxu0  ;;  %v4900_v6 = vpop.f32.mrf.mxu1 }
 0x40a   : > { %v4866_v3 = vadd.f32 %v4865_v24, %v4864_v17  ;;  %v4901_v11 = vadd.f32 %v4900_v6, %v4899_v63 }
 0x40c   : > { %v3790_v8 = vadd.f32 %v4866_v3, %v3720_v5 }
 0x40e   : > { %v3860_v61 = vadd.f32 %v4901_v11, %v3790_v8 }
 0x429   : > { %v4934_v0 = vpop.f32.mrf.mxu0  ;;  %v4969_v9 = vpop.f32.mrf.mxu1 }
 0x42b   : > { %v4935_v7 = vpop.f32.mrf.mxu0  ;;  %v4970_v12 = vpop.f32.mrf.mxu1 }
 0x42c   : > { %v4936_v40 = vadd.f32 %v4935_v7, %v4934_v0  ;;  %v4971_v20 = vadd.f32 %v4970_v12, %v4969_v9 }
 0x42e   : > { %v3930_v16 = vadd.f32 %v4936_v40, %v3860_v61 }
 0x430   : > { %v4000_v22 = vadd.f32 %v4971_v20, %v3930_v16 }
 0x44b   : > { %v5004_v10 = vpop.f32.mrf.mxu0  ;;  %v5039_v18 = vpop.f32.mrf.mxu1 }
 0x44d   : > { %v5005_v15 = vpop.f32.mrf.mxu0  ;;  %v5040_v23 = vpop.f32.mrf.mxu1 }
 0x44e   : > { %v5006_v21 = vadd.f32 %v5005_v15, %v5004_v10  ;;  %v5041_v27 = vadd.f32 %v5040_v23, %v5039_v18 }
 0x450   : > { %v4070_v53 = vadd.f32 %v5006_v21, %v4000_v22 }
 0x452   : > { %v4140_v44 = vadd.f32 %v5041_v27, %v4070_v53 }
 0x46d   : > { %v5074_v19 = vpop.f32.mrf.mxu0 }
 0x46f   : > { %v5075_v26 = vpop.f32.mrf.mxu0 }
 0x470   : > { %v5076_v28 = vadd.f32 %v5075_v26, %v5074_v19 }
 0x472   : > { %v4210_v29 = vadd.f32 %v5076_v28, %v4140_v44 }
 0x47f   : > { %v4279_v31 = vpop.f32.mrf.mxu1 }
 0x480   : > { %v4280_v30 = vadd.f32 %v4279_v31, %v4210_v29 }
 0x481   : > { %v4281_v32 = vpop.f32.mrf.mxu1 }
 0x482   : > { %v4283_v33 = vmax.f32 %v4280_v30, 0.0 }
 0x484   : > { %4284 = vst.msk [vmem:[%s354_s1] sm:$0xff] %vm633_vm0, %v4283_v33 }
 0x485   : > { %5161 = shalt.err (!%p5158_p7)
}
 0x486   : > { %s5162_s17 = scalar_lea.hbm %s4302_s12, 128  ;;  %s5166_s0 = scalar_lea.hbm %s8167_s9, 256 }
 0x487   : > { %p5163_p8 = scmp.ne.s32.totalorder %s4302_s12, %s5162_s17  ;;  %p5167_p11 = scmp.lt.s32.totalorder %s4302_s12, %s8167_s9 }
 0x488   : > { %p5168_p12 = scmp.lt.s32.totalorder %s5166_s0, %s5162_s17 }
 0x489   : > { %p5164_p9 = pnand %p5163_p8, %p5310_p5 }
 0x48a   : > { %p5169_p13 = por %p5168_p12, %p5167_p11 }
 0x48b   : > { %p5165_p10 = pneg %p5164_p9 }
 0x48d   : > { %p5170_p0 = pnand %p5169_p13, %p5165_p10 }
 0x48f   : > { %5173 = shalt.err (!%p5170_p0)
}
 0x490   : > { %5077 = dma.vmem_to_hbm [thread:$0]  (%p5310_p5), %s4305_s28, 128, %s4302_s12, %s4286_s18  }
 0x491 PF: > { %p5088_p1 = scmp.ge.s32.totalorder %s5212_s16, 2  ;;  %s4329_s29 = sand.u32 1, %s5200_s13  }
 0x492   : > { %s4330_s11 = scalar_lea.sflag [#allocation3], %s4329_s29 }
 0x493   : > { %p5082_p2 = pnand %p5088_p1, %p5314_p6 }
 0x495   : > { %p5083_p3 = pneg %p5082_p2 }
 0x497   : > { %5191 = dma.done.wait (%p5083_p3), %s4330_s11, 128  }
 0x498   : > { %5193 = vsyncadd (%p5083_p3), %s4330_s11, 4294967168  ;;  %s4339_s30 = scalar_lea.sflag [#allocation5], %s4329_s29 }
 0x499   : > { %5195 = dma.done.wait (%p5083_p3), %s4339_s30, 128  }
 0x49a   : > { %5197 = vsyncadd (%p5083_p3), %s4339_s30, 4294967168  ;;  %s8180_s23 = sld [smem:[#allocation8_spill]]  ;;  %p24_p5 = scmp.ge.s32.totalorder %s5297_s19, 4  }
 0x49b   : > { %s8181_s13 = smov %s5204_s14  ;;  %s8182_s14 = smov %s5208_s15 }
 0x49c   : > { %s8184_s16 = smov %s5297_s19  ;;  %26 = sbr.rel (!%p24_p5) target bundleno = 8 (0x8), region = 108 }
 0x4a0   : > { %s8183_s15 = smov %s8180_s23 }
 0x4a1   :  { %4344 = vsyncpa [#allocation3], 1 }
 0x4a2   :  { %4346 = vsyncpa [#allocation3 + $0x1], 1 }
 0x4a3   :  { %4347 = vsyncpa [#allocation5], 1 }
 0x4a4   :  { %4349 = vsyncpa [#allocation5 + $0x1], 1 }

</bundles_post_ra>
